<compile_context>
chip_gen: v7x
topology: tpu7x:2x2x1
jax: 0.10.0
libtpu: 0.0.40
codegen_flags: <defaults>
</compile_context>

<pallas_src>
import functools
import math

import jax
import jax.numpy as jnp
import numpy as np
from jax.experimental import pallas as pl
from jax.experimental.pallas import tpu as pltpu


# --------------------------------------------------------------------------------------
# Fused kernel body builder
# --------------------------------------------------------------------------------------

def _build_kernel(mode, group_sizes, slopes, out_f32, bblk, height):
    """Build the fused forward kernel for one (min_level, max_level) structure.

    mode        : "seq" (integral cur_level) or "blend" (fractional, fade-in path)
    group_sizes : layer counts per group (blend: a/im/mid/omin/omax; seq: one group)
    slopes      : per-layer LeakyReLU negative slope (None for the 1x1 fromRGB/toRGB)
    out_f32     : per-layer flag: final output layers stay f32, others return bf16
    bblk, height: batch-block size and image height (rows per image)
    """
    n_layers = len(slopes)

    def kernel(*refs):
        if mode == "blend":
            wb_ref, x_ref, bias_ref = refs[0], refs[1], refs[2]
            t_refs = refs[3:-1]
        else:
            x_ref, bias_ref = refs[0], refs[1]
            t_refs = refs[2:-1]
        out_ref = refs[-1]

        l_in0 = x_ref.shape[-1]
        rows = bblk * height
        x = x_ref[...].reshape(rows, l_in0)          # bf16, batch folded into M

        # Per-image (H, H) 0/1 row-shift tensors, built ONCE per kernel trace and reused
        # for every 3x3 conv (JAX does not CSE iota/broadcast).
        shift_cache = {}

        def shift_tensor(delta):
            if delta not in shift_cache:
                r = jax.lax.broadcasted_iota(jnp.int32, (height, height), 0)
                c = jax.lax.broadcasted_iota(jnp.int32, (height, height), 1)
                s = jnp.where(c == r + delta, 1.0, 0.0).astype(jnp.bfloat16)
                shift_cache[delta] = jnp.broadcast_to(s, (bblk, height, height))
            return shift_cache[delta]

        cursor = [0]

        def apply(h):
            """One conv layer in row layout: KxK 'SAME' conv + bias (+ LeakyReLU)."""
            i = cursor[0]
            cursor[0] += 1
            t_ref = t_refs[i]
            K, l_in, l_out = t_ref.shape
            pad = (K - 1) // 2
            hb = h.astype(jnp.bfloat16)
            h3 = hb.reshape(bblk, height, l_in)
            acc = jnp.zeros((rows, l_out), jnp.float32)
            for kh in range(K):
                delta = kh - pad
                if delta == 0:
                    lhs = hb
                else:
                    # Exact per-image zero-padded H shift as a tiny batched 0/1 matmul
                    # (bf16-exact; avoids a (Bblk*H)^2 block-diagonal shift matrix).
                    lhs = jnp.einsum(
                        "brh,bhl->brl", shift_tensor(delta), h3,
                        preferred_element_type=jnp.float32,
                    ).astype(jnp.bfloat16).reshape(rows, l_in)
                acc = acc + jnp.dot(lhs, t_ref[kh],
                                    preferred_element_type=jnp.float32)
            acc = acc + bias_ref[i:i + 1, :l_out]
            if slopes[i] is not None:
                acc = jnp.where(acc > 0, acc, acc * slopes[i])
            return acc.astype(jnp.float32 if out_f32[i] else jnp.bfloat16)

        if mode == "seq":                             # integral cur_level: pure chain
            h = x
            for _ in range(n_layers):
                h = apply(h)
            out_ref[...] = h.reshape(bblk, height, h.shape[-1]).astype(out_ref.dtype)
        else:                                         # fractional cur_level: fade-in path
            n_a, n_im, n_mid, n_omin, n_omax = group_sizes
            w_min = wb_ref[0]                         # SMEM scalars: alpha ramp does not
            w_max = wb_ref[1]                         # trigger any recompilation
            a = x
            for _ in range(n_a):                      # chain[max](nins[max](x))
                a = apply(a)
            im = x
            for _ in range(n_im):                     # nins[min](x) (channel resize folded)
                im = apply(im)
            h = (w_min * im.astype(jnp.float32)
                 + w_max * a.astype(jnp.float32)).astype(jnp.bfloat16)
            for _ in range(n_mid):                    # chain[min .. 2N-min-1]
                h = apply(h)
            om = h
            for _ in range(n_omin):                   # nins[2N-min-1]
                om = apply(om)
            t = h
            for _ in range(n_omax):                   # nins[2N-max-1](chain[2N-max-1](.))
                t = apply(t)
            res = w_min * om.astype(jnp.float32) + w_max * t.astype(jnp.float32)
            out_ref[...] = res.reshape(bblk, height, res.shape[-1]).astype(out_ref.dtype)

    return kernel


# --------------------------------------------------------------------------------------
# Host-side weight preparation (block-Toeplitz "row" weights)
# --------------------------------------------------------------------------------------

def _to_row_params(w, b, width):
    """HWIO conv weight (K,K,Cin,Cout) + bias (Cout,) -> row-layout weights.

    Returns T (K, W*Cin, W*Cout) bf16 and b_row (1, W*Cout) f32 such that
    y_rows = sum_kh row_shift_kh(x_rows) @ T[kh] + b_row equals the 'SAME' conv in the
    (B, H, W*C) layout (kw taps and W zero-padding baked into T).
    """
    K, _, cin, cout = w.shape
    pad = (K - 1) // 2
    wf = w.astype(jnp.float32)
    mats = []
    for kh in range(K):
        t = jnp.zeros((width * cin, width * cout), jnp.float32)
        for kw in range(K):
            shift = jnp.eye(width, k=pad - kw, dtype=jnp.float32)
            t = t + jnp.kron(shift, wf[kh, kw])
        mats.append(t)
    t_all = jnp.stack(mats, axis=0).astype(jnp.bfloat16)
    b_row = jnp.tile(b.astype(jnp.float32), width).reshape(1, width * cout)
    return t_all, b_row


def _channel_selection(cin, cout, dtype):
    """resize_activations channel truncate / zero-pad as a (cin, cout) matrix."""
    m = min(cin, cout)
    p = jnp.zeros((cin, cout), dtype)
    return p.at[jnp.arange(m), jnp.arange(m)].set(1.0)


def _pick_bblk(batch, height):
    """Largest divisor of batch with bblk*height <= 512 rows; prefer >=2 grid steps
    (v7x megacore) when each block still keeps >=128 rows for MXU fill."""
    divisors = [d for d in range(1, batch + 1) if batch % d == 0]
    fit = [d for d in divisors if d * height <= 512]
    if not fit:
        return 1
    good = [d for d in fit if d * height >= 128 and batch // d >= 2]
    return max(good) if good else max(fit)


# --------------------------------------------------------------------------------------
# The module
# --------------------------------------------------------------------------------------

class AEDSelectLayerPallas:
    """JAX/Pallas port of AEDSelectLayer.forward (one fused TPU kernel per level bracket).

    chain entries are 3x3 'SAME' convs + LeakyReLU(negative_slope); nins entries are 1x1
    convs (fromRGB / toRGB).  Parameters are supplied explicitly (HWIO weights) so the
    whole forward fuses into a single pallas_call.  cur_level must be a Python / numpy
    number (the PyTorch module drives control flow with np.floor / int() too).
    """

    def __init__(self, pre, chain_params, nins_params, negative_slope=0.2):
        assert len(chain_params) == len(nins_params)
        self.pre = pre
        self.chain_params = [(jnp.asarray(w), jnp.asarray(b)) for w, b in chain_params]
        self.nins_params = [(jnp.asarray(w), jnp.asarray(b)) for w, b in nins_params]
        self.negative_slope = float(negative_slope)
        self.N = len(chain_params) // 2
        self._cache = {}

    def __call__(self, x, cur_level=None):
        if self.pre is not None:
            x = self.pre(x)                                   # pre runs in NCHW (plain JAX)
        if cur_level is None:
            cur_level = self.N
        mx = int(np.floor(self.N - cur_level))
        mn = int(np.ceil(self.N - cur_level))
        assert 0 <= mx <= mn <= self.N - 1, "unsupported cur_level for this chain"
        w_min = float(int(cur_level + 1) - cur_level)
        w_max = float(cur_level - int(cur_level))
        bsz, cx, hh, ww = (int(d) for d in x.shape)           # NCHW like PyTorch
        fwd = self._get_impl(bsz, cx, hh, ww, mn, mx)
        wb = jnp.array([w_min, w_max], jnp.float32)
        return fwd(jnp.asarray(x, jnp.float32), wb)

    # ----------------------------------------------------------------------------------
    def _layer(self, kind, idx):
        if kind == "chain":
            w, b = self.chain_params[idx]
            return w, b, self.negative_slope
        w, b = self.nins_params[idx]
        return w, b, None

    def _get_impl(self, batch, cx, height, width, mn, mx):
        key = (batch, cx, height, width, mn, mx)
        if key in self._cache:
            return self._cache[key]
        n = self.N

        if mx == mn:                                          # stabilized (integral) stage
            mode = "seq"
            groups = [("seq",
                       [("nins", mn)]
                       + [("chain", lvl) for lvl in range(mn, 2 * n - mn)]
                       + [("nins", 2 * n - mn - 1)])]
            final_groups = ("seq",)
            x_groups = ("seq",)
        else:                                                 # fade-in (fractional) stage
            mode = "blend"
            groups = [("a",    [("nins", mx), ("chain", mx)]),
                      ("im",   [("nins", mn)]),
                      ("mid",  [("chain", lvl) for lvl in range(mn, 2 * n - mn)]),
                      ("omin", [("nins", 2 * n - mn - 1)]),
                      ("omax", [("chain", 2 * n - mn), ("nins", 2 * n - mn)])]
            final_groups = ("omin", "omax")
            x_groups = ("a", "im")

        raw = {name: [self._layer(*e) for e in entries] for name, entries in groups}

        if mode == "blend":
            # resize_activations channel truncate / zero-pad is folded into the 1x1 conv
            # feeding each blend, so the kernel only ever blends equal-shaped tensors.
            # TODO(synk): spatial (avg_pool2d / bicubic upsample) resize branches are not
            # supported; every chain module here preserves spatial dims.
            c_a = int(raw["a"][-1][0].shape[-1])
            w_im, b_im, s_im = raw["im"][-1]
            if int(w_im.shape[-1]) != c_a:
                p = _channel_selection(int(w_im.shape[-1]), c_a, w_im.dtype)
                raw["im"][-1] = (jnp.tensordot(w_im, p, axes=([3], [0])), b_im @ p, s_im)
            c_omax = int(raw["omax"][-1][0].shape[-1])
            w_om, b_om, s_om = raw["omin"][-1]
            if int(w_om.shape[-1]) != c_omax:
                p = _channel_selection(int(w_om.shape[-1]), c_omax, w_om.dtype)
                raw["omin"][-1] = (jnp.tensordot(w_om, p, axes=([3], [0])), b_om @ p, s_om)

        step = 128 // math.gcd(width, 128)

        # Lane-dense store: zero-pad the FINAL output channels so width*c_out_pad % 128 == 0
        # (padded lanes are sliced off in the wrapper).
        c_out = int(raw[final_groups[-1]][-1][0].shape[-1])
        c_out_pad = c_out if (width * c_out) % 128 == 0 else -(-c_out // step) * step
        if c_out_pad != c_out:
            for name in final_groups:
                w, b, s = raw[name][-1]
                w = jnp.pad(w, ((0, 0), (0, 0), (0, 0), (0, c_out_pad - c_out)))
                b = jnp.pad(b, ((0, c_out_pad - c_out),))
                raw[name][-1] = (w, b, s)

        # Lane-dense input load / 128-aligned first contraction: zero-pad x's channels and
        # the input rows of every layer that consumes x.
        cx_pad = cx if (width * cx) % 128 == 0 else -(-cx // step) * step
        if cx_pad != cx:
            for name in x_groups:
                w, b, s = raw[name][0]
                w = jnp.pad(w, ((0, 0), (0, 0), (0, cx_pad - cx), (0, 0)))
                raw[name][0] = (w, b, s)

        # Block-Toeplitz row weights + one packed bias table.
        t_arrays, bias_rows, slopes, out_f32, group_sizes = [], [], [], [], []
        for name, _ in groups:
            layers = raw[name]
            group_sizes.append(len(layers))
            for li, (w, b, act) in enumerate(layers):
                t, b_row = _to_row_params(w, b, width)
                t_arrays.append(t)
                bias_rows.append(b_row)
                slopes.append(act)
                out_f32.append((name in final_groups) and (li == len(layers) - 1))
        max_l = max(int(b.shape[1]) for b in bias_rows)
        bias_all = jnp.concatenate(
            [jnp.pad(b, ((0, 0), (0, max_l - int(b.shape[1])))) for b in bias_rows],
            axis=0)

        l_in = width * cx_pad
        l_out_pad = width * c_out_pad
        bblk = _pick_bblk(batch, height)
        nblk = batch // bblk

        kernel = _build_kernel(mode, tuple(group_sizes), tuple(slopes),
                               tuple(out_f32), bblk, height)

        in_specs = []
        if mode == "blend":
            # blend weights as SMEM scalars -> compile-once across the alpha ramp
            in_specs.append(pl.BlockSpec(memory_space=pltpu.MemorySpace.SMEM))
        in_specs.append(pl.BlockSpec((bblk, height, l_in), lambda i: (i, 0, 0)))
        in_specs.append(pl.BlockSpec(bias_all.shape, lambda i: (0, 0)))
        for t in t_arrays:
            in_specs.append(pl.BlockSpec(t.shape, lambda i: (0, 0, 0)))

        flops = sum(2 * batch * height * int(t.shape[0]) * int(t.shape[1]) * int(t.shape[2])
                    for t in t_arrays)
        bytes_accessed = (batch * height * l_in * 2
                          + sum(int(np.prod(t.shape)) * 2 for t in t_arrays)
                          + int(np.prod(bias_all.shape)) * 4
                          + batch * height * l_out_pad * 4)

        # VMEM headroom only when the Toeplitz expansion gets big (large brackets).
        vmem_need = (2 * sum(int(np.prod(t.shape)) * 2 for t in t_arrays)
                     + 2 * int(np.prod(bias_all.shape)) * 4
                     + 2 * bblk * height * (l_in * 2 + l_out_pad * 4)
                     + (4 << 20))
        cp_kwargs = dict(dimension_semantics=("parallel",))
        if vmem_need > 16 * 1024 * 1024:
            cp_kwargs["vmem_limit_bytes"] = int(min(max(vmem_need, 32 * 1024 * 1024),
                                                    64 * 1024 * 1024))

        call = pl.pallas_call(
            kernel,
            out_shape=jax.ShapeDtypeStruct((batch, height, l_out_pad), jnp.float32),
            grid=(nblk,),
            in_specs=in_specs,
            out_specs=pl.BlockSpec((bblk, height, l_out_pad), lambda i: (i, 0, 0)),
            compiler_params=pltpu.CompilerParams(**cp_kwargs),
            cost_estimate=pl.CostEstimate(flops=int(flops), transcendentals=0,
                                          bytes_accessed=int(bytes_accessed)),
        )

        @jax.jit
        def fwd(x_nchw, wb):
            # NCHW -> lane-dense bf16 row layout (B, H, W*Cpad).
            # TODO(synk): this transpose is a separate XLA HBM pass around the custom
            # call; keep surrounding activations in NHWC/row layout when stacking layers.
            xh = jnp.transpose(x_nchw, (0, 2, 3, 1))
            if cx_pad != cx:
                xh = jnp.pad(xh, ((0, 0), (0, 0), (0, 0), (0, cx_pad - cx)))
            x_row = xh.reshape(batch, height, l_in).astype(jnp.bfloat16)
            args = ([wb] if mode == "blend" else []) + [x_row, bias_all] + t_arrays
            out_row = call(*args)
            out = out_row.reshape(batch, height, width, c_out_pad)[..., :c_out]
            return jnp.transpose(out, (0, 3, 1, 2))

        self._cache[key] = fwd
        return fwd


# --------------------------------------------------------------------------------------
# Pure-XLA reference (f32, HIGHEST precision) with the exact PyTorch control flow
# --------------------------------------------------------------------------------------

def _ref_conv(x_nhwc, w, b, slope):
    y = jax.lax.conv_general_dilated(
        x_nhwc, w, (1, 1), "SAME",
        dimension_numbers=("NHWC", "HWIO", "NHWC"),
        precision=jax.lax.Precision.HIGHEST) + b
    if slope is not None:
        y = jnp.where(y > 0, y, slope * y)
    return y


def _ref_resize(v, so):
    si = list(v.shape)
    so = list(so)
    if si[-1] > so[-1]:
        v = v[..., : so[-1]]
    if si[1] != so[1] or si[2] != so[2]:
        raise NotImplementedError("spatial resize not exercised by this configuration")
    if v.shape[-1] < so[-1]:
        pad = jnp.zeros(tuple(so[:-1]) + (so[-1] - v.shape[-1],), v.dtype)
        v = jnp.concatenate([v, pad], axis=-1)
    return v


def aed_forward_reference(x_nchw, cur_level, chain_params, nins_params, negative_slope):
    n = len(chain_params) // 2
    if cur_level is None:
        cur_level = n
    mx = int(np.floor(n - cur_level))
    mn = int(np.ceil(n - cur_level))
    w_min = int(cur_level + 1) - cur_level
    w_max = cur_level - int(cur_level)
    chain = [functools.partial(_ref_conv, w=w, b=b, slope=negative_slope)
             for (w, b) in chain_params]
    nins = [functools.partial(_ref_conv, w=w, b=b, slope=None)
            for (w, b) in nins_params]

    x = jnp.transpose(x_nchw, (0, 2, 3, 1))
    in_max = None if mx == mn else chain[mx](nins[mx](x))
    for level in range(mn, n):
        if level == mn:
            in_min = nins[level](x)
            if mx != mn:
                x = w_min * _ref_resize(in_min, in_max.shape) + w_max * in_max
            else:
                x = in_min
        x = chain[level](x)
    out_min = None
    for level in range(n, 2 * n - mn):
        x = chain[level](x)
        if level == 2 * n - mn - 1:
            out_min = nins[level](x)
    if mx == mn:
        x = out_min
    else:
        out_max = nins[2 * n - mx - 1](chain[2 * n - mx - 1](x))
        x = w_min * _ref_resize(out_min, out_max.shape) + w_max * out_max
    return jnp.transpose(x, (0, 3, 1, 2))


# --------------------------------------------------------------------------------------
# Deterministic demo + correctness check
# --------------------------------------------------------------------------------------

if __name__ == "__main__":
    key = jax.random.PRNGKey(0)
    B, IMG_C, H, W = 2, 4, 16, 16
    enc_ch = [8, 16, 32]                  # feature widths; N = len(chain)//2 = 2

    keys = jax.random.split(key, 16)
    ki = iter(keys)

    def conv_params(k, cin, cout, ksize):
        fan_in = ksize * ksize * cin
        std = math.sqrt(2.0 / fan_in)     # kaiming_normal-style, deterministic
        w = jax.random.normal(k, (ksize, ksize, cin, cout), jnp.float32) * std
        b = jnp.zeros((cout,), jnp.float32)
        return w, b

    chain_shapes = [(enc_ch[0], enc_ch[1]), (enc_ch[1], enc_ch[2]),
                    (enc_ch[2], enc_ch[1]), (enc_ch[1], enc_ch[0])]
    nins_shapes = [(IMG_C, enc_ch[0]), (IMG_C, enc_ch[1]),
                   (enc_ch[1], IMG_C), (enc_ch[0], IMG_C)]

    chain_params = [conv_params(next(ki), ci, co, 3) for ci, co in chain_shapes]
    nins_params = [conv_params(next(ki), ci, co, 1) for ci, co in nins_shapes]

    model = AEDSelectLayerPallas(pre=None, chain_params=chain_params,
                                 nins_params=nins_params, negative_slope=0.2)

    x = jax.random.normal(next(ki), (B, IMG_C, H, W), jnp.float32)   # NCHW like PyTorch

    out = jax.block_until_ready(model(x))                      # stabilized (integral) path
    out_f1 = jax.block_until_ready(model(x, cur_level=1.5))    # fade-in path
    out_f2 = jax.block_until_ready(model(x, cur_level=1.25))   # same kernel, new alpha
    assert out.shape == (B, IMG_C, H, W)
    assert out_f1.shape == (B, IMG_C, H, W) and out_f2.shape == (B, IMG_C, H, W)

    ref = jax.block_until_ready(
        aed_forward_reference(x, None, chain_params, nins_params, 0.2))
    ref_f1 = jax.block_until_ready(
        aed_forward_reference(x, 1.5, chain_params, nins_params, 0.2))
    ref_f2 = jax.block_until_ready(
        aed_forward_reference(x, 1.25, chain_params, nins_params, 0.2))

    # bf16 MXU inputs / bf16 intermediates vs an f32 HIGHEST-precision XLA reference
    np.testing.assert_allclose(np.asarray(out), np.asarray(ref), rtol=1e-1, atol=1e-1)
    np.testing.assert_allclose(np.asarray(out_f1), np.asarray(ref_f1), rtol=1e-1, atol=1e-1)
    np.testing.assert_allclose(np.asarray(out_f2), np.asarray(ref_f2), rtol=1e-1, atol=1e-1)

    print("KERNEL_OK")
</pallas_src>

<mosaic_0001>
module attributes {stable_mosaic.version = 11 : i64} {
  func.func @kernel(%arg0: i32, %arg1: memref<2x16x128xbf16, #tpu.memory_space<vmem>>, %arg2: memref<6x512xf32, #tpu.memory_space<vmem>>, %arg3: memref<1x128x128xbf16, #tpu.memory_space<vmem>>, %arg4: memref<3x128x256xbf16, #tpu.memory_space<vmem>>, %arg5: memref<3x256x512xbf16, #tpu.memory_space<vmem>>, %arg6: memref<3x512x256xbf16, #tpu.memory_space<vmem>>, %arg7: memref<3x256x128xbf16, #tpu.memory_space<vmem>>, %arg8: memref<1x128x128xbf16, #tpu.memory_space<vmem>>, %arg9: memref<2x16x128xf32, #tpu.memory_space<vmem>>) attributes {dimension_semantics = [#tpu.dimension_semantics<parallel>], iteration_bounds = array<i64: 1>, scalar_prefetch = 0 : i64, scratch_operands = 0 : i64, tpu.core_type = #tpu.core_type<tc>, window_params = [{transform_indices = @transform_0, window_bounds = array<i64: 2, 16, 128>}, {pipeline_mode = #tpu.pipeline_mode<synchronous>, transform_indices = @transform_1, window_bounds = array<i64: 6, 512>}, {pipeline_mode = #tpu.pipeline_mode<synchronous>, transform_indices = @transform_2, window_bounds = array<i64: 1, 128, 128>}, {pipeline_mode = #tpu.pipeline_mode<synchronous>, transform_indices = @transform_3, window_bounds = array<i64: 3, 128, 256>}, {pipeline_mode = #tpu.pipeline_mode<synchronous>, transform_indices = @transform_4, window_bounds = array<i64: 3, 256, 512>}, {pipeline_mode = #tpu.pipeline_mode<synchronous>, transform_indices = @transform_5, window_bounds = array<i64: 3, 512, 256>}, {pipeline_mode = #tpu.pipeline_mode<synchronous>, transform_indices = @transform_6, window_bounds = array<i64: 3, 256, 128>}, {pipeline_mode = #tpu.pipeline_mode<synchronous>, transform_indices = @transform_7, window_bounds = array<i64: 1, 128, 128>}, {transform_indices = @transform_8, window_bounds = array<i64: 2, 16, 128>}]} {
    %c0 = arith.constant 0 : index
    %c0_0 = arith.constant 0 : index
    %c0_1 = arith.constant 0 : index
    %0 = vector.load %arg1[%c0, %c0_0, %c0_1] : memref<2x16x128xbf16, #tpu.memory_space<vmem>>, vector<2x16x128xbf16>
    %1 = vector.shape_cast %0 : vector<2x16x128xbf16> to vector<32x128xbf16>
    %cst = arith.constant 0.000000e+00 : f32
    %2 = vector.broadcast %cst : f32 to vector<32x128xf32>
    %c0_2 = arith.constant 0 : index
    %c0_3 = arith.constant 0 : index
    %c0_4 = arith.constant 0 : index
    %3 = vector.load %arg3[%c0_2, %c0_3, %c0_4] : memref<1x128x128xbf16, #tpu.memory_space<vmem>>, vector<1x128x128xbf16>
    %4 = vector.shape_cast %3 : vector<1x128x128xbf16> to vector<128x128xbf16>
    %cst_5 = arith.constant dense<0.000000e+00> : vector<32x128xf32>
    %5 = tpu.matmul %1, %4, %cst_5 {dimension_numbers = #tpu.dot_dimension_numbers<[1], [0], [0], [1], [0, 0, 1, 1], [], []>} : vector<32x128xbf16>, vector<128x128xbf16>, vector<32x128xf32> -> vector<32x128xf32>
    %6 = arith.addf %2, %5 : vector<32x128xf32>
    %c0_6 = arith.constant 0 : index
    %c0_7 = arith.constant 0 : index
    %7 = vector.load %arg2[%c0_6, %c0_7] : memref<6x512xf32, #tpu.memory_space<vmem>>, vector<1x128xf32>
    %8 = vector.broadcast %7 : vector<1x128xf32> to vector<32x128xf32>
    %9 = arith.addf %6, %8 : vector<32x128xf32>
    %10 = arith.truncf %9 : vector<32x128xf32> to vector<32x128xbf16>
    %11 = vector.shape_cast %10 : vector<32x128xbf16> to vector<2x16x128xbf16>
    %cst_8 = arith.constant 0.000000e+00 : f32
    %12 = vector.broadcast %cst_8 : f32 to vector<32x256xf32>
    %13 = tpu.iota {dimensions = array<i32: 0>} : vector<16x16xi32>
    %14 = tpu.iota {dimensions = array<i32: 1>} : vector<16x16xi32>
    %c-1_i32 = arith.constant -1 : i32
    %15 = vector.broadcast %c-1_i32 : i32 to vector<16x16xi32>
    %16 = arith.addi %13, %15 : vector<16x16xi32>
    %17 = arith.cmpi eq, %14, %16 : vector<16x16xi32>
    %cst_9 = arith.constant 1.000000e+00 : f32
    %cst_10 = arith.constant 0.000000e+00 : f32
    %18 = vector.broadcast %cst_9 : f32 to vector<16x16xf32>
    %19 = vector.broadcast %cst_10 : f32 to vector<16x16xf32>
    %20 = arith.select %17, %18, %19 : vector<16x16xi1>, vector<16x16xf32>
    %21 = arith.truncf %20 : vector<16x16xf32> to vector<16x16xbf16>
    %22 = vector.shape_cast %21 : vector<16x16xbf16> to vector<1x16x16xbf16>
    %23 = vector.broadcast %22 : vector<1x16x16xbf16> to vector<2x16x16xbf16>
    "tpu.trace_start"() <{level = 10 : i32, message = "brh,bhl->brl"}> : () -> ()
    %cst_11 = arith.constant dense<0.000000e+00> : vector<2x16x128xf32>
    %24 = tpu.matmul %23, %11, %cst_11 {dimension_numbers = #tpu.dot_dimension_numbers<[2], [1], [1], [2], [0, 0, 0, 1, 1, 2], [0], [0]>} : vector<2x16x16xbf16>, vector<2x16x128xbf16>, vector<2x16x128xf32> -> vector<2x16x128xf32>
    "tpu.trace_stop"() : () -> ()
    %25 = arith.truncf %24 : vector<2x16x128xf32> to vector<2x16x128xbf16>
    %26 = vector.shape_cast %25 : vector<2x16x128xbf16> to vector<32x128xbf16>
    %c0_12 = arith.constant 0 : index
    %c0_13 = arith.constant 0 : index
    %c0_14 = arith.constant 0 : index
    %27 = vector.load %arg4[%c0_12, %c0_13, %c0_14] : memref<3x128x256xbf16, #tpu.memory_space<vmem>>, vector<1x128x256xbf16>
    %28 = vector.shape_cast %27 : vector<1x128x256xbf16> to vector<128x256xbf16>
    %cst_15 = arith.constant dense<0.000000e+00> : vector<32x256xf32>
    %29 = tpu.matmul %26, %28, %cst_15 {dimension_numbers = #tpu.dot_dimension_numbers<[1], [0], [0], [1], [0, 0, 1, 1], [], []>} : vector<32x128xbf16>, vector<128x256xbf16>, vector<32x256xf32> -> vector<32x256xf32>
    %30 = arith.addf %12, %29 : vector<32x256xf32>
    %c1 = arith.constant 1 : index
    %c0_16 = arith.constant 0 : index
    %c0_17 = arith.constant 0 : index
    %31 = vector.load %arg4[%c1, %c0_16, %c0_17] : memref<3x128x256xbf16, #tpu.memory_space<vmem>>, vector<1x128x256xbf16>
    %32 = vector.shape_cast %31 : vector<1x128x256xbf16> to vector<128x256xbf16>
    %cst_18 = arith.constant dense<0.000000e+00> : vector<32x256xf32>
    %33 = tpu.matmul %10, %32, %cst_18 {dimension_numbers = #tpu.dot_dimension_numbers<[1], [0], [0], [1], [0, 0, 1, 1], [], []>} : vector<32x128xbf16>, vector<128x256xbf16>, vector<32x256xf32> -> vector<32x256xf32>
    %34 = arith.addf %30, %33 : vector<32x256xf32>
    %35 = tpu.iota {dimensions = array<i32: 0>} : vector<16x16xi32>
    %36 = tpu.iota {dimensions = array<i32: 1>} : vector<16x16xi32>
    %c1_i32 = arith.constant 1 : i32
    %37 = vector.broadcast %c1_i32 : i32 to vector<16x16xi32>
    %38 = arith.addi %35, %37 : vector<16x16xi32>
    %39 = arith.cmpi eq, %36, %38 : vector<16x16xi32>
    %cst_19 = arith.constant 1.000000e+00 : f32
    %cst_20 = arith.constant 0.000000e+00 : f32
    %40 = vector.broadcast %cst_19 : f32 to vector<16x16xf32>
    %41 = vector.broadcast %cst_20 : f32 to vector<16x16xf32>
    %42 = arith.select %39, %40, %41 : vector<16x16xi1>, vector<16x16xf32>
    %43 = arith.truncf %42 : vector<16x16xf32> to vector<16x16xbf16>
    %44 = vector.shape_cast %43 : vector<16x16xbf16> to vector<1x16x16xbf16>
    %45 = vector.broadcast %44 : vector<1x16x16xbf16> to vector<2x16x16xbf16>
    "tpu.trace_start"() <{level = 10 : i32, message = "brh,bhl->brl"}> : () -> ()
    %cst_21 = arith.constant dense<0.000000e+00> : vector<2x16x128xf32>
    %46 = tpu.matmul %45, %11, %cst_21 {dimension_numbers = #tpu.dot_dimension_numbers<[2], [1], [1], [2], [0, 0, 0, 1, 1, 2], [0], [0]>} : vector<2x16x16xbf16>, vector<2x16x128xbf16>, vector<2x16x128xf32> -> vector<2x16x128xf32>
    "tpu.trace_stop"() : () -> ()
    %47 = arith.truncf %46 : vector<2x16x128xf32> to vector<2x16x128xbf16>
    %48 = vector.shape_cast %47 : vector<2x16x128xbf16> to vector<32x128xbf16>
    %c2 = arith.constant 2 : index
    %c0_22 = arith.constant 0 : index
    %c0_23 = arith.constant 0 : index
    %49 = vector.load %arg4[%c2, %c0_22, %c0_23] : memref<3x128x256xbf16, #tpu.memory_space<vmem>>, vector<1x128x256xbf16>
    %50 = vector.shape_cast %49 : vector<1x128x256xbf16> to vector<128x256xbf16>
    %cst_24 = arith.constant dense<0.000000e+00> : vector<32x256xf32>
    %51 = tpu.matmul %48, %50, %cst_24 {dimension_numbers = #tpu.dot_dimension_numbers<[1], [0], [0], [1], [0, 0, 1, 1], [], []>} : vector<32x128xbf16>, vector<128x256xbf16>, vector<32x256xf32> -> vector<32x256xf32>
    %52 = arith.addf %34, %51 : vector<32x256xf32>
    %c1_25 = arith.constant 1 : index
    %c0_26 = arith.constant 0 : index
    %53 = vector.load %arg2[%c1_25, %c0_26] : memref<6x512xf32, #tpu.memory_space<vmem>>, vector<1x256xf32>
    %54 = vector.broadcast %53 : vector<1x256xf32> to vector<32x256xf32>
    %55 = arith.addf %52, %54 : vector<32x256xf32>
    %cst_27 = arith.constant 0.000000e+00 : f32
    %56 = vector.broadcast %cst_27 : f32 to vector<32x256xf32>
    %57 = arith.cmpf ogt, %55, %56 : vector<32x256xf32>
    %cst_28 = arith.constant 2.000000e-01 : f32
    %58 = vector.broadcast %cst_28 : f32 to vector<32x256xf32>
    %59 = arith.mulf %55, %58 : vector<32x256xf32>
    %60 = arith.select %57, %55, %59 : vector<32x256xi1>, vector<32x256xf32>
    %61 = arith.truncf %60 : vector<32x256xf32> to vector<32x256xbf16>
    %62 = vector.shape_cast %61 : vector<32x256xbf16> to vector<2x16x256xbf16>
    %cst_29 = arith.constant 0.000000e+00 : f32
    %63 = vector.broadcast %cst_29 : f32 to vector<32x512xf32>
    "tpu.trace_start"() <{level = 10 : i32, message = "brh,bhl->brl"}> : () -> ()
    %cst_30 = arith.constant dense<0.000000e+00> : vector<2x16x256xf32>
    %64 = tpu.matmul %23, %62, %cst_30 {dimension_numbers = #tpu.dot_dimension_numbers<[2], [1], [1], [2], [0, 0, 0, 1, 1, 2], [0], [0]>} : vector<2x16x16xbf16>, vector<2x16x256xbf16>, vector<2x16x256xf32> -> vector<2x16x256xf32>
    "tpu.trace_stop"() : () -> ()
    %65 = arith.truncf %64 : vector<2x16x256xf32> to vector<2x16x256xbf16>
    %66 = vector.shape_cast %65 : vector<2x16x256xbf16> to vector<32x256xbf16>
    %c0_31 = arith.constant 0 : index
    %c0_32 = arith.constant 0 : index
    %c0_33 = arith.constant 0 : index
    %67 = vector.load %arg5[%c0_31, %c0_32, %c0_33] : memref<3x256x512xbf16, #tpu.memory_space<vmem>>, vector<1x256x512xbf16>
    %68 = vector.shape_cast %67 : vector<1x256x512xbf16> to vector<256x512xbf16>
    %cst_34 = arith.constant dense<0.000000e+00> : vector<32x512xf32>
    %69 = tpu.matmul %66, %68, %cst_34 {dimension_numbers = #tpu.dot_dimension_numbers<[1], [0], [0], [1], [0, 0, 1, 1], [], []>} : vector<32x256xbf16>, vector<256x512xbf16>, vector<32x512xf32> -> vector<32x512xf32>
    %70 = arith.addf %63, %69 : vector<32x512xf32>
    %c1_35 = arith.constant 1 : index
    %c0_36 = arith.constant 0 : index
    %c0_37 = arith.constant 0 : index
    %71 = vector.load %arg5[%c1_35, %c0_36, %c0_37] : memref<3x256x512xbf16, #tpu.memory_space<vmem>>, vector<1x256x512xbf16>
    %72 = vector.shape_cast %71 : vector<1x256x512xbf16> to vector<256x512xbf16>
    %cst_38 = arith.constant dense<0.000000e+00> : vector<32x512xf32>
    %73 = tpu.matmul %61, %72, %cst_38 {dimension_numbers = #tpu.dot_dimension_numbers<[1], [0], [0], [1], [0, 0, 1, 1], [], []>} : vector<32x256xbf16>, vector<256x512xbf16>, vector<32x512xf32> -> vector<32x512xf32>
    %74 = arith.addf %70, %73 : vector<32x512xf32>
    "tpu.trace_start"() <{level = 10 : i32, message = "brh,bhl->brl"}> : () -> ()
    %cst_39 = arith.constant dense<0.000000e+00> : vector<2x16x256xf32>
    %75 = tpu.matmul %45, %62, %cst_39 {dimension_numbers = #tpu.dot_dimension_numbers<[2], [1], [1], [2], [0, 0, 0, 1, 1, 2], [0], [0]>} : vector<2x16x16xbf16>, vector<2x16x256xbf16>, vector<2x16x256xf32> -> vector<2x16x256xf32>
    "tpu.trace_stop"() : () -> ()
    %76 = arith.truncf %75 : vector<2x16x256xf32> to vector<2x16x256xbf16>
    %77 = vector.shape_cast %76 : vector<2x16x256xbf16> to vector<32x256xbf16>
    %c2_40 = arith.constant 2 : index
    %c0_41 = arith.constant 0 : index
    %c0_42 = arith.constant 0 : index
    %78 = vector.load %arg5[%c2_40, %c0_41, %c0_42] : memref<3x256x512xbf16, #tpu.memory_space<vmem>>, vector<1x256x512xbf16>
    %79 = vector.shape_cast %78 : vector<1x256x512xbf16> to vector<256x512xbf16>
    %cst_43 = arith.constant dense<0.000000e+00> : vector<32x512xf32>
    %80 = tpu.matmul %77, %79, %cst_43 {dimension_numbers = #tpu.dot_dimension_numbers<[1], [0], [0], [1], [0, 0, 1, 1], [], []>} : vector<32x256xbf16>, vector<256x512xbf16>, vector<32x512xf32> -> vector<32x512xf32>
    %81 = arith.addf %74, %80 : vector<32x512xf32>
    %c2_44 = arith.constant 2 : index
    %c0_45 = arith.constant 0 : index
    %82 = vector.load %arg2[%c2_44, %c0_45] : memref<6x512xf32, #tpu.memory_space<vmem>>, vector<1x512xf32>
    %83 = vector.broadcast %82 : vector<1x512xf32> to vector<32x512xf32>
    %84 = arith.addf %81, %83 : vector<32x512xf32>
    %cst_46 = arith.constant 0.000000e+00 : f32
    %85 = vector.broadcast %cst_46 : f32 to vector<32x512xf32>
    %86 = arith.cmpf ogt, %84, %85 : vector<32x512xf32>
    %cst_47 = arith.constant 2.000000e-01 : f32
    %87 = vector.broadcast %cst_47 : f32 to vector<32x512xf32>
    %88 = arith.mulf %84, %87 : vector<32x512xf32>
    %89 = arith.select %86, %84, %88 : vector<32x512xi1>, vector<32x512xf32>
    %90 = arith.truncf %89 : vector<32x512xf32> to vector<32x512xbf16>
    %91 = vector.shape_cast %90 : vector<32x512xbf16> to vector<2x16x512xbf16>
    %cst_48 = arith.constant 0.000000e+00 : f32
    %92 = vector.broadcast %cst_48 : f32 to vector<32x256xf32>
    "tpu.trace_start"() <{level = 10 : i32, message = "brh,bhl->brl"}> : () -> ()
    %cst_49 = arith.constant dense<0.000000e+00> : vector<2x16x512xf32>
    %93 = tpu.matmul %23, %91, %cst_49 {dimension_numbers = #tpu.dot_dimension_numbers<[2], [1], [1], [2], [0, 0, 0, 1, 1, 2], [0], [0]>} : vector<2x16x16xbf16>, vector<2x16x512xbf16>, vector<2x16x512xf32> -> vector<2x16x512xf32>
    "tpu.trace_stop"() : () -> ()
    %94 = arith.truncf %93 : vector<2x16x512xf32> to vector<2x16x512xbf16>
    %95 = vector.shape_cast %94 : vector<2x16x512xbf16> to vector<32x512xbf16>
    %c0_50 = arith.constant 0 : index
    %c0_51 = arith.constant 0 : index
    %c0_52 = arith.constant 0 : index
    %96 = vector.load %arg6[%c0_50, %c0_51, %c0_52] : memref<3x512x256xbf16, #tpu.memory_space<vmem>>, vector<1x512x256xbf16>
    %97 = vector.shape_cast %96 : vector<1x512x256xbf16> to vector<512x256xbf16>
    %cst_53 = arith.constant dense<0.000000e+00> : vector<32x256xf32>
    %98 = tpu.matmul %95, %97, %cst_53 {dimension_numbers = #tpu.dot_dimension_numbers<[1], [0], [0], [1], [0, 0, 1, 1], [], []>} : vector<32x512xbf16>, vector<512x256xbf16>, vector<32x256xf32> -> vector<32x256xf32>
    %99 = arith.addf %92, %98 : vector<32x256xf32>
    %c1_54 = arith.constant 1 : index
    %c0_55 = arith.constant 0 : index
    %c0_56 = arith.constant 0 : index
    %100 = vector.load %arg6[%c1_54, %c0_55, %c0_56] : memref<3x512x256xbf16, #tpu.memory_space<vmem>>, vector<1x512x256xbf16>
    %101 = vector.shape_cast %100 : vector<1x512x256xbf16> to vector<512x256xbf16>
    %cst_57 = arith.constant dense<0.000000e+00> : vector<32x256xf32>
    %102 = tpu.matmul %90, %101, %cst_57 {dimension_numbers = #tpu.dot_dimension_numbers<[1], [0], [0], [1], [0, 0, 1, 1], [], []>} : vector<32x512xbf16>, vector<512x256xbf16>, vector<32x256xf32> -> vector<32x256xf32>
    %103 = arith.addf %99, %102 : vector<32x256xf32>
    "tpu.trace_start"() <{level = 10 : i32, message = "brh,bhl->brl"}> : () -> ()
    %cst_58 = arith.constant dense<0.000000e+00> : vector<2x16x512xf32>
    %104 = tpu.matmul %45, %91, %cst_58 {dimension_numbers = #tpu.dot_dimension_numbers<[2], [1], [1], [2], [0, 0, 0, 1, 1, 2], [0], [0]>} : vector<2x16x16xbf16>, vector<2x16x512xbf16>, vector<2x16x512xf32> -> vector<2x16x512xf32>
    "tpu.trace_stop"() : () -> ()
    %105 = arith.truncf %104 : vector<2x16x512xf32> to vector<2x16x512xbf16>
    %106 = vector.shape_cast %105 : vector<2x16x512xbf16> to vector<32x512xbf16>
    %c2_59 = arith.constant 2 : index
    %c0_60 = arith.constant 0 : index
    %c0_61 = arith.constant 0 : index
    %107 = vector.load %arg6[%c2_59, %c0_60, %c0_61] : memref<3x512x256xbf16, #tpu.memory_space<vmem>>, vector<1x512x256xbf16>
    %108 = vector.shape_cast %107 : vector<1x512x256xbf16> to vector<512x256xbf16>
    %cst_62 = arith.constant dense<0.000000e+00> : vector<32x256xf32>
    %109 = tpu.matmul %106, %108, %cst_62 {dimension_numbers = #tpu.dot_dimension_numbers<[1], [0], [0], [1], [0, 0, 1, 1], [], []>} : vector<32x512xbf16>, vector<512x256xbf16>, vector<32x256xf32> -> vector<32x256xf32>
    %110 = arith.addf %103, %109 : vector<32x256xf32>
    %c3 = arith.constant 3 : index
    %c0_63 = arith.constant 0 : index
    %111 = vector.load %arg2[%c3, %c0_63] : memref<6x512xf32, #tpu.memory_space<vmem>>, vector<1x256xf32>
    %112 = vector.broadcast %111 : vector<1x256xf32> to vector<32x256xf32>
    %113 = arith.addf %110, %112 : vector<32x256xf32>
    %cst_64 = arith.constant 0.000000e+00 : f32
    %114 = vector.broadcast %cst_64 : f32 to vector<32x256xf32>
    %115 = arith.cmpf ogt, %113, %114 : vector<32x256xf32>
    %cst_65 = arith.constant 2.000000e-01 : f32
    %116 = vector.broadcast %cst_65 : f32 to vector<32x256xf32>
    %117 = arith.mulf %113, %116 : vector<32x256xf32>
    %118 = arith.select %115, %113, %117 : vector<32x256xi1>, vector<32x256xf32>
    %119 = arith.truncf %118 : vector<32x256xf32> to vector<32x256xbf16>
    %120 = vector.shape_cast %119 : vector<32x256xbf16> to vector<2x16x256xbf16>
    %cst_66 = arith.constant 0.000000e+00 : f32
    %121 = vector.broadcast %cst_66 : f32 to vector<32x128xf32>
    "tpu.trace_start"() <{level = 10 : i32, message = "brh,bhl->brl"}> : () -> ()
    %cst_67 = arith.constant dense<0.000000e+00> : vector<2x16x256xf32>
    %122 = tpu.matmul %23, %120, %cst_67 {dimension_numbers = #tpu.dot_dimension_numbers<[2], [1], [1], [2], [0, 0, 0, 1, 1, 2], [0], [0]>} : vector<2x16x16xbf16>, vector<2x16x256xbf16>, vector<2x16x256xf32> -> vector<2x16x256xf32>
    "tpu.trace_stop"() : () -> ()
    %123 = arith.truncf %122 : vector<2x16x256xf32> to vector<2x16x256xbf16>
    %124 = vector.shape_cast %123 : vector<2x16x256xbf16> to vector<32x256xbf16>
    %c0_68 = arith.constant 0 : index
    %c0_69 = arith.constant 0 : index
    %c0_70 = arith.constant 0 : index
    %125 = vector.load %arg7[%c0_68, %c0_69, %c0_70] : memref<3x256x128xbf16, #tpu.memory_space<vmem>>, vector<1x256x128xbf16>
    %126 = vector.shape_cast %125 : vector<1x256x128xbf16> to vector<256x128xbf16>
    %cst_71 = arith.constant dense<0.000000e+00> : vector<32x128xf32>
    %127 = tpu.matmul %124, %126, %cst_71 {dimension_numbers = #tpu.dot_dimension_numbers<[1], [0], [0], [1], [0, 0, 1, 1], [], []>} : vector<32x256xbf16>, vector<256x128xbf16>, vector<32x128xf32> -> vector<32x128xf32>
    %128 = arith.addf %121, %127 : vector<32x128xf32>
    %c1_72 = arith.constant 1 : index
    %c0_73 = arith.constant 0 : index
    %c0_74 = arith.constant 0 : index
    %129 = vector.load %arg7[%c1_72, %c0_73, %c0_74] : memref<3x256x128xbf16, #tpu.memory_space<vmem>>, vector<1x256x128xbf16>
    %130 = vector.shape_cast %129 : vector<1x256x128xbf16> to vector<256x128xbf16>
    %cst_75 = arith.constant dense<0.000000e+00> : vector<32x128xf32>
    %131 = tpu.matmul %119, %130, %cst_75 {dimension_numbers = #tpu.dot_dimension_numbers<[1], [0], [0], [1], [0, 0, 1, 1], [], []>} : vector<32x256xbf16>, vector<256x128xbf16>, vector<32x128xf32> -> vector<32x128xf32>
    %132 = arith.addf %128, %131 : vector<32x128xf32>
    "tpu.trace_start"() <{level = 10 : i32, message = "brh,bhl->brl"}> : () -> ()
    %cst_76 = arith.constant dense<0.000000e+00> : vector<2x16x256xf32>
    %133 = tpu.matmul %45, %120, %cst_76 {dimension_numbers = #tpu.dot_dimension_numbers<[2], [1], [1], [2], [0, 0, 0, 1, 1, 2], [0], [0]>} : vector<2x16x16xbf16>, vector<2x16x256xbf16>, vector<2x16x256xf32> -> vector<2x16x256xf32>
    "tpu.trace_stop"() : () -> ()
    %134 = arith.truncf %133 : vector<2x16x256xf32> to vector<2x16x256xbf16>
    %135 = vector.shape_cast %134 : vector<2x16x256xbf16> to vector<32x256xbf16>
    %c2_77 = arith.constant 2 : index
    %c0_78 = arith.constant 0 : index
    %c0_79 = arith.constant 0 : index
    %136 = vector.load %arg7[%c2_77, %c0_78, %c0_79] : memref<3x256x128xbf16, #tpu.memory_space<vmem>>, vector<1x256x128xbf16>
    %137 = vector.shape_cast %136 : vector<1x256x128xbf16> to vector<256x128xbf16>
    %cst_80 = arith.constant dense<0.000000e+00> : vector<32x128xf32>
    %138 = tpu.matmul %135, %137, %cst_80 {dimension_numbers = #tpu.dot_dimension_numbers<[1], [0], [0], [1], [0, 0, 1, 1], [], []>} : vector<32x256xbf16>, vector<256x128xbf16>, vector<32x128xf32> -> vector<32x128xf32>
    %139 = arith.addf %132, %138 : vector<32x128xf32>
    %c4 = arith.constant 4 : index
    %c0_81 = arith.constant 0 : index
    %140 = vector.load %arg2[%c4, %c0_81] : memref<6x512xf32, #tpu.memory_space<vmem>>, vector<1x128xf32>
    %141 = vector.broadcast %140 : vector<1x128xf32> to vector<32x128xf32>
    %142 = arith.addf %139, %141 : vector<32x128xf32>
    %cst_82 = arith.constant 0.000000e+00 : f32
    %143 = vector.broadcast %cst_82 : f32 to vector<32x128xf32>
    %144 = arith.cmpf ogt, %142, %143 : vector<32x128xf32>
    %cst_83 = arith.constant 2.000000e-01 : f32
    %145 = vector.broadcast %cst_83 : f32 to vector<32x128xf32>
    %146 = arith.mulf %142, %145 : vector<32x128xf32>
    %147 = arith.select %144, %142, %146 : vector<32x128xi1>, vector<32x128xf32>
    %148 = arith.truncf %147 : vector<32x128xf32> to vector<32x128xbf16>
    %cst_84 = arith.constant 0.000000e+00 : f32
    %149 = vector.broadcast %cst_84 : f32 to vector<32x128xf32>
    %c0_85 = arith.constant 0 : index
    %c0_86 = arith.constant 0 : index
    %c0_87 = arith.constant 0 : index
    %150 = vector.load %arg8[%c0_85, %c0_86, %c0_87] : memref<1x128x128xbf16, #tpu.memory_space<vmem>>, vector<1x128x128xbf16>
    %151 = vector.shape_cast %150 : vector<1x128x128xbf16> to vector<128x128xbf16>
    %cst_88 = arith.constant dense<0.000000e+00> : vector<32x128xf32>
    %152 = tpu.matmul %148, %151, %cst_88 {dimension_numbers = #tpu.dot_dimension_numbers<[1], [0], [0], [1], [0, 0, 1, 1], [], []>} : vector<32x128xbf16>, vector<128x128xbf16>, vector<32x128xf32> -> vector<32x128xf32>
    %153 = arith.addf %149, %152 : vector<32x128xf32>
    %c5 = arith.constant 5 : index
    %c0_89 = arith.constant 0 : index
    %154 = vector.load %arg2[%c5, %c0_89] : memref<6x512xf32, #tpu.memory_space<vmem>>, vector<1x128xf32>
    %155 = vector.broadcast %154 : vector<1x128xf32> to vector<32x128xf32>
    %156 = arith.addf %153, %155 : vector<32x128xf32>
    %157 = vector.shape_cast %156 : vector<32x128xf32> to vector<2x16x128xf32>
    %c0_90 = arith.constant 0 : index
    %c0_91 = arith.constant 0 : index
    %c0_92 = arith.constant 0 : index
    %158 = vector.load %arg9[%c0_90, %c0_91, %c0_92] : memref<2x16x128xf32, #tpu.memory_space<vmem>>, vector<2x16x128xf32>
    tpu.vector_store %arg9[%c0_90, %c0_91, %c0_92], %157 {strides = array<i32>} : memref<2x16x128xf32, #tpu.memory_space<vmem>>, vector<2x16x128xf32>,
    return
  }
  func.func @transform_0(%arg0: i32) -> (i32, i32, i32) {
    %c0_i32 = arith.constant 0 : i32
    %c0_i32_0 = arith.constant 0 : i32
    %c0_i32_1 = arith.constant 0 : i32
    return %arg0, %c0_i32, %c0_i32_0 : i32, i32, i32
  }
  func.func @transform_1(%arg0: i32) -> (i32, i32) {
    %c0_i32 = arith.constant 0 : i32
    %c0_i32_0 = arith.constant 0 : i32
    %c0_i32_1 = arith.constant 0 : i32
    return %c0_i32, %c0_i32_0 : i32, i32
  }
  func.func @transform_2(%arg0: i32) -> (i32, i32, i32) {
    %c0_i32 = arith.constant 0 : i32
    %c0_i32_0 = arith.constant 0 : i32
    %c0_i32_1 = arith.constant 0 : i32
    %c0_i32_2 = arith.constant 0 : i32
    return %c0_i32, %c0_i32_0, %c0_i32_1 : i32, i32, i32
  }
  func.func @transform_3(%arg0: i32) -> (i32, i32, i32) {
    %c0_i32 = arith.constant 0 : i32
    %c0_i32_0 = arith.constant 0 : i32
    %c0_i32_1 = arith.constant 0 : i32
    %c0_i32_2 = arith.constant 0 : i32
    return %c0_i32, %c0_i32_0, %c0_i32_1 : i32, i32, i32
  }
  func.func @transform_4(%arg0: i32) -> (i32, i32, i32) {
    %c0_i32 = arith.constant 0 : i32
    %c0_i32_0 = arith.constant 0 : i32
    %c0_i32_1 = arith.constant 0 : i32
    %c0_i32_2 = arith.constant 0 : i32
    return %c0_i32, %c0_i32_0, %c0_i32_1 : i32, i32, i32
  }
  func.func @transform_5(%arg0: i32) -> (i32, i32, i32) {
    %c0_i32 = arith.constant 0 : i32
    %c0_i32_0 = arith.constant 0 : i32
    %c0_i32_1 = arith.constant 0 : i32
    %c0_i32_2 = arith.constant 0 : i32
    return %c0_i32, %c0_i32_0, %c0_i32_1 : i32, i32, i32
  }
  func.func @transform_6(%arg0: i32) -> (i32, i32, i32) {
    %c0_i32 = arith.constant 0 : i32
    %c0_i32_0 = arith.constant 0 : i32
    %c0_i32_1 = arith.constant 0 : i32
    %c0_i32_2 = arith.constant 0 : i32
    return %c0_i32, %c0_i32_0, %c0_i32_1 : i32, i32, i32
  }
  func.func @transform_7(%arg0: i32) -> (i32, i32, i32) {
    %c0_i32 = arith.constant 0 : i32
    %c0_i32_0 = arith.constant 0 : i32
    %c0_i32_1 = arith.constant 0 : i32
    %c0_i32_2 = arith.constant 0 : i32
    return %c0_i32, %c0_i32_0, %c0_i32_1 : i32, i32, i32
  }
  func.func @transform_8(%arg0: i32) -> (i32, i32, i32) {
    %c0_i32 = arith.constant 0 : i32
    %c0_i32_0 = arith.constant 0 : i32
    %c0_i32_1 = arith.constant 0 : i32
    return %arg0, %c0_i32, %c0_i32_0 : i32, i32, i32
  }
}

</mosaic_0001>

<bundles_post_ra>
// kernel: fwd.1
= control target key start
LH: loop header
LB: loop body
LE: loop exit
PB: predicated region body
PF: predicated region fallthrough
CT: control target
= control target key end

     0   :  { %v7226_v10 = vmov 0.0   ;;  %vm7227_vm0 = vmmov 0   ;;  %v162_v11 = vlaneseq  ;;  %vm174_vm3 = vcmask 130048   ;;  %s9122_s2 = inlined_call_operand.vmem [shape: bf16[1,128,128], index: 2, kind: input, shape index: {}]   ;;  %s9123_s0 = inlined_call_operand.vmem [shape: bf16[2,16,128], index: 0, kind: input, shape index: {}]   ;;  %s9124_s3 = inlined_call_operand.vmem [shape: bf16[3,128,256], index: 3, kind: input, shape index: {}]   ;;  %s9125_s1 = inlined_call_operand.vmem [shape: f32[6,512], index: 1, kind: input, shape index: {}]   ;;  %s9126_s4 = inlined_call_operand.vmem [shape: bf16[3,256,512], index: 4, kind: input, shape index: {}]   ;;  %s9127_s5 = inlined_call_operand.vmem [shape: bf16[3,512,256], index: 5, kind: input, shape index: {}]   ;;  %s9128_s6 = inlined_call_operand.vmem [shape: bf16[3,256,128], index: 6, kind: input, shape index: {}]   ;;  %s9129_s7 = inlined_call_operand.vmem [shape: bf16[1,128,128], index: 7, kind: input, shape index: {}]   ;;  %s9130_s8 = inlined_call_operand.vmem [shape: f32[2,16,128], index: 8, kind: output, shape index: {}]  }
   0x1   :  { %v6512_v0 = vld [vmem:[%s9122_s2] sm:$0xff]   ;;  %v6513_v1 = vld [vmem:[%s9122_s2 + $0x8] sm:$0xff]   ;;  %v6514_v2 = vld [vmem:[%s9122_s2 + $0x10] sm:$0xff]   ;;  %6377 = vmatprep.subr.bf16.mxu0 %v7226_v10  ;;  %6379 = vmatprep.mubr.msk.bf16.mxu0 %vm7227_vm0, %v7226_v10  ;;  %v7228_v40 = vmov 0  }
   0x2   :  { %6357 = vmatprep.subr.bf16.mxu1 %v6512_v0  ;;  %v6515_v3 = vld [vmem:[%s9122_s2 + $0x18] sm:$0xff]   ;;  %v6520_v4 = vld [vmem:[%s9123_s0] sm:$0xff]   ;;  %v6517_v6 = vld [vmem:[%s9122_s2 + $0x28] sm:$0xff]   ;;  %v7310_v12 = vshrl.u32 %v162_v11, 7  ;;  %v166_v14 = vand.u32 127, %v162_v11 }
   0x3   :  { %6358 = vmatpush3.bf16.msra.mxu1 %v6512_v0  ;;  %6373 = vmatprep.mubr.bf16.mxu1 %v6520_v4  ;;  %v6516_v5 = vld [vmem:[%s9122_s2 + $0x20] sm:$0xff]   ;;  %v6518_v7 = vld [vmem:[%s9122_s2 + $0x30] sm:$0xff]   ;;  %v6519_v8 = vld [vmem:[%s9122_s2 + $0x38] sm:$0xff]  }
   0x4   :  { %6359 = vmatprep.subr.bf16.mxu1 %v6513_v1  ;;  %v6521_v9 = vld [vmem:[%s9123_s0 + $0x8] sm:$0xff]   ;;  %v164_v13 = vadd.s32 8, %v7310_v12  ;;  %v167_v15 = vadd.s32 4294967295, %v7310_v12  ;;  %v50_v18 = vld [vmem:[%s9125_s1] ss:$0 sm:$0xff]  ;;  %v561_v30 = vadd.s32 1, %v7310_v12 }
   0x5   :  { %v6524_v28 = vld [vmem:[%s9124_s3 + $0x84] ss:$8 sps:$4 sm:$0xff]   ;;  %v6522_v34 = vld [vmem:[%s9124_s3 + $0x80] ss:$8 sps:$4 sm:$0xff]   ;;  %v6527_v35 = vld [vmem:[%s9124_s3 + $0x94] ss:$8 sps:$4 sm:$0xff]  }
   0x6   :  { %v168_v16 = vadd.s32 4294967295, %v164_v13  ;;  %vm169_vm1 = vcmp.eq.s32.totalorder %v166_v14, %v167_v15  ;;  %v562_v31 = vadd.s32 1, %v164_v13  ;;  %vm563_vm4 = vcmp.eq.s32.totalorder %v166_v14, %v561_v30  ;;  %v6525_v36 = vld [vmem:[%s9124_s3 + $0x90] ss:$8 sps:$4 sm:$0xff]   ;;  %v6530_v37 = vld [vmem:[%s9124_s3 + $0xa4] ss:$8 sps:$4 sm:$0xff]  }
   0x7   :  { %6360 = vmatpush3.bf16.msra.mxu1 %v6513_v1  ;;  %v171_v24 = vsel %vm169_vm1, 1.0, %v7226_v10  ;;  %v565_v38 = vsel %vm563_vm4, 1.0, %v7226_v10  ;;  %v6528_v41 = vld [vmem:[%s9124_s3 + $0xa0] ss:$8 sps:$4 sm:$0xff]   ;;  %v6533_v43 = vld [vmem:[%s9124_s3 + $0xb4] ss:$8 sps:$4 sm:$0xff]  }
   0x8   :  { %6361 = vmatprep.subr.bf16.mxu1 %v6514_v2  ;;  %vm170_vm2 = vcmp.eq.s32.totalorder %v166_v14, %v168_v16  ;;  %vm564_vm5 = vcmp.eq.s32.totalorder %v166_v14, %v562_v31  ;;  %v6531_v44 = vld [vmem:[%s9124_s3 + $0xb0] ss:$8 sps:$4 sm:$0xff]   ;;  %v6536_v45 = vld [vmem:[%s9124_s3 + $0xc4] ss:$8 sps:$4 sm:$0xff]   ;;  %v6534_v46 = vld [vmem:[%s9124_s3 + $0xc0] ss:$8 sps:$4 sm:$0xff]  }
   0x9   :  { %v172_v25 = vsel %vm170_vm2, 1.0, %v7226_v10  ;;  %v566_v39 = vsel %vm564_vm5, 1.0, %v7226_v10  ;;  %v6539_v47 = vld [vmem:[%s9124_s3 + $0xd4] ss:$8 sps:$4 sm:$0xff]   ;;  %v6537_v48 = vld [vmem:[%s9124_s3 + $0xd0] ss:$8 sps:$4 sm:$0xff]  }
   0xa   :  { %v7325_v33 = vpack.c.bf16 %v172_v25, %v171_v24  ;;  %v7354_v42 = vpack.c.bf16 %v566_v39, %v565_v38  ;;  %v6542_v49 = vld [vmem:[%s9124_s3 + $0xe4] ss:$8 sps:$4 sm:$0xff]   ;;  %v6540_v50 = vld [vmem:[%s9124_s3 + $0xe0] ss:$8 sps:$4 sm:$0xff]   ;;  %v6545_v51 = vld [vmem:[%s9124_s3 + $0xf4] ss:$8 sps:$4 sm:$0xff]  }
   0xb   :  { %6362 = vmatpush3.bf16.msra.mxu1 %v6514_v2  ;;  %v6543_v52 = vld [vmem:[%s9124_s3 + $0xf0] ss:$8 sps:$4 sm:$0xff]   ;;  %v6548_v53 = vld [vmem:[%s9124_s3 + $0x4] ss:$8 sps:$4 sm:$0xff]   ;;  %v6546_v54 = vld [vmem:[%s9124_s3] ss:$8 sps:$4 sm:$0xff]  }
   0xc   :  { %6363 = vmatprep.subr.bf16.mxu1 %v6515_v3  ;;  %v6551_v55 = vld [vmem:[%s9124_s3 + $0x14] ss:$8 sps:$4 sm:$0xff]   ;;  %v6549_v56 = vld [vmem:[%s9124_s3 + $0x10] ss:$8 sps:$4 sm:$0xff]   ;;  %v6554_v57 = vld [vmem:[%s9124_s3 + $0x24] ss:$8 sps:$4 sm:$0xff]  }
   0xd   :  { %v6552_v58 = vld [vmem:[%s9124_s3 + $0x20] ss:$8 sps:$4 sm:$0xff]   ;;  %v6557_v59 = vld [vmem:[%s9124_s3 + $0x34] ss:$8 sps:$4 sm:$0xff]   ;;  %v6555_v60 = vld [vmem:[%s9124_s3 + $0x30] ss:$8 sps:$4 sm:$0xff]  }
   0xe   :  { %v6560_v61 = vld [vmem:[%s9124_s3 + $0x44] ss:$8 sps:$4 sm:$0xff]   ;;  %v6558_v62 = vld [vmem:[%s9124_s3 + $0x40] ss:$8 sps:$4 sm:$0xff]   ;;  %v6563_v63 = vld [vmem:[%s9124_s3 + $0x54] ss:$8 sps:$4 sm:$0xff]  }
   0xf   :  { %6364 = vmatpush3.bf16.msra.mxu1 %v6515_v3  ;;  %v6561_v0 = vld [vmem:[%s9124_s3 + $0x50] ss:$8 sps:$4 sm:$0xff]   ;;  %v6566_v1 = vld [vmem:[%s9124_s3 + $0x64] ss:$8 sps:$4 sm:$0xff]   ;;  %v6564_v2 = vld [vmem:[%s9124_s3 + $0x60] ss:$8 sps:$4 sm:$0xff]  }
  0x10   :  { %6365 = vmatprep.subr.bf16.mxu1 %v6516_v5  ;;  %v6569_v3 = vld [vmem:[%s9124_s3 + $0x74] ss:$8 sps:$4 sm:$0xff]   ;;  %v6567_v4 = vld [vmem:[%s9124_s3 + $0x70] ss:$8 sps:$4 sm:$0xff]   ;;  %v6570_v13 = vld [vmem:[%s9124_s3 + $0x100] ss:$8 sps:$4 sm:$0xff]  }
  0x11   :  { %v6581_v25 = vld [vmem:[%s9124_s3 + $0x134] ss:$8 sps:$4 sm:$0xff]   ;;  %v6585_v38 = vld [vmem:[%s9124_s3 + $0x150] ss:$8 sps:$4 sm:$0xff]   ;;  %v6590_v39 = vld [vmem:[%s9124_s3 + $0x164] ss:$8 sps:$4 sm:$0xff]  }
  0x13   :  { %6366 = vmatpush3.bf16.msra.mxu1 %v6516_v5  ;;  %v6572_v5 = vld [vmem:[%s9124_s3 + $0x104] ss:$8 sps:$4 sm:$0xff]  }
  0x14   :  { %6367 = vmatprep.subr.bf16.mxu1 %v6517_v6 }
  0x17   :  { %6368 = vmatpush3.bf16.msra.mxu1 %v6517_v6 }
  0x18   :  { %6369 = vmatprep.subr.bf16.mxu1 %v6518_v7 }
  0x1b   :  { %6370 = vmatpush3.bf16.msra.mxu1 %v6518_v7 }
  0x1c   :  { %6371 = vmatprep.subr.bf16.mxu1 %v6519_v8 }
  0x1f   :  { %6372 = vmatpush3.bf16.msra.mxu1 %v6519_v8 }
  0x20   :  { %6383 = vmatprep.subr.bf16.mxu1 %v7226_v10 }
  0x22   :  { %6374 = vmatmul.mubr.bf16.vlgmr.msra.gmra.mrb[0].mxu1 %v6521_v9 }
  0x23   :  { %6385 = vmatprep.mubr.msk.bf16.mxu1 %vm7227_vm0, %v7226_v10 }
  0xf5   :  { %v6375_v17 = vpop.f32.mrb[0].mxu1 }
  0xf6   :  { %v145_v19 = vpop.f32.mrb[1].mxu1  ;;  %v154_v21 = vadd.f32 %v6375_v17, %v50_v18 }
  0xf7   :  { %v6376_v20 = vpop.f32.mrb[2].mxu1  ;;  %v146_v26 = vadd.f32 %v145_v19, %v50_v18  ;;  %v6573_v19 = vld [vmem:[%s9124_s3 + $0x110] ss:$8 sps:$4 sm:$0xff]  }
  0xf8   :  { %v157_v22 = vadd.f32 %v6376_v20, %v50_v18  ;;  %v148_v23 = vpop.f32.mrb[3].mxu1  ;;  %v6578_v20 = vld [vmem:[%s9124_s3 + $0x124] ss:$8 sps:$4 sm:$0xff]  }
  0xf9   :  { %v149_v27 = vadd.f32 %v148_v23, %v50_v18  ;;  %v6575_v18 = vld [vmem:[%s9124_s3 + $0x114] ss:$8 sps:$4 sm:$0xff]   ;;  %v6576_v23 = vld [vmem:[%s9124_s3 + $0x120] ss:$8 sps:$4 sm:$0xff]  }
  0xfa   :  { %v7322_v29 = vpack.c.bf16 %v157_v22, %v154_v21 }
  0xfb   :  { %v160_v32 = vpack.c.bf16 %v149_v27, %v146_v26 }
  0xfc   :  { %6384 = vmatpush3.bf16.msra.mxu1 %v7322_v29 }
  0xfd   :  { %6378 = vmatpush3.bf16.msra.mxu0 %v160_v32  ;;  %375 = vmatprep.subr.bf16.mxu1 %v6524_v28  ;;  %v6579_v28 = vld [vmem:[%s9124_s3 + $0x130] ss:$8 sps:$4 sm:$0xff]  }
  0xfe   :  { %6389 = vmatprep.subr.bf16.mxu0 %v7226_v10 }
  0xff   :  { %6386 = vmatmul.mubr.msk.bf16.vlgmr.msra.gmra.mrb[4].mxu1 %vm174_vm3, %v7325_v33 }
 0x100   :  { %6380 = vmatmul.mubr.msk.bf16.vlgmr.msra.gmra.mrb[0].mxu0 %vm174_vm3, %v7325_v33  ;;  %376 = vmatpush1.bf16.msra.mxu1 %v6522_v34 }
 0x101   :  { %6390 = vmatpush3.bf16.msra.mxu0 %v160_v32  ;;  %377 = vmatprep.subr.bf16.mxu1 %v6527_v35  ;;  %v6587_v35 = vld [vmem:[%s9124_s3 + $0x154] ss:$8 sps:$4 sm:$0xff]  }
 0x102   :  { %6391 = vmatprep.mubr.msk.bf16.mxu0 %vm7227_vm0, %v7226_v10  ;;  %6395 = vmatprep.subr.bf16.mxu0 %v7226_v10 }
 0x103   :  { %407 = vmatprep.mubr.bf16.mxu1 %v7228_v40 }
 0x104   :  { %378 = vmatpush1.bf16.msra.mxu1 %v6525_v36 }
 0x105   :  { %379 = vmatprep.subr.bf16.mxu1 %v6530_v37 }
 0x108   :  { %380 = vmatpush1.bf16.msra.mxu1 %v6528_v41  ;;  %6392 = vmatmul.mubr.msk.bf16.vlgmr.msra.gmra.mrb[4].mxu0 %vm174_vm3, %v7354_v42  ;;  %v6588_v41 = vld [vmem:[%s9124_s3 + $0x160] ss:$8 sps:$4 sm:$0xff]  }
 0x109   :  { %6396 = vmatpush3.bf16.msra.mxu0 %v7322_v29  ;;  %381 = vmatprep.subr.bf16.mxu1 %v6533_v43  ;;  %v6593_v43 = vld [vmem:[%s9124_s3 + $0x174] ss:$8 sps:$4 sm:$0xff]  }
 0x10a   :  { %6397 = vmatprep.mubr.msk.bf16.mxu0 %vm7227_vm0, %v7226_v10 }
 0x10c   :  { %382 = vmatpush1.bf16.msra.mxu1 %v6531_v44  ;;  %v6591_v44 = vld [vmem:[%s9124_s3 + $0x170] ss:$8 sps:$4 sm:$0xff]  }
 0x10d   :  { %383 = vmatprep.subr.bf16.mxu1 %v6536_v45  ;;  %v6596_v45 = vld [vmem:[%s9126_s4 + $0x20c] ss:$16 sps:$4 sm:$0xff]  }
 0x110   :  { %384 = vmatpush1.bf16.msra.mxu1 %v6534_v46  ;;  %6398 = vmatmul.mubr.msk.bf16.vlgmr.msra.gmra.mrb[8].mxu0 %vm174_vm3, %v7354_v42  ;;  %v6594_v46 = vld [vmem:[%s9126_s4 + $0x208] ss:$16 sps:$4 sm:$0xff]  }
 0x111   :  { %385 = vmatprep.subr.bf16.mxu1 %v6539_v47  ;;  %894 = vmatprep.mubr.bf16.mxu0 %v7228_v40  ;;  %v6599_v47 = vld [vmem:[%s9126_s4 + $0x22c] ss:$16 sps:$4 sm:$0xff]  }
 0x114   :  { %386 = vmatpush1.bf16.msra.mxu1 %v6537_v48  ;;  %v6597_v48 = vld [vmem:[%s9126_s4 + $0x228] ss:$16 sps:$4 sm:$0xff]  }
 0x115   :  { %387 = vmatprep.subr.bf16.mxu1 %v6542_v49  ;;  %v6602_v49 = vld [vmem:[%s9126_s4 + $0x24c] ss:$16 sps:$4 sm:$0xff]  }
 0x118   :  { %388 = vmatpush1.bf16.msra.mxu1 %v6540_v50  ;;  %v6600_v50 = vld [vmem:[%s9126_s4 + $0x248] ss:$16 sps:$4 sm:$0xff]  }
 0x119   :  { %389 = vmatprep.subr.bf16.mxu1 %v6545_v51  ;;  %v6605_v51 = vld [vmem:[%s9126_s4 + $0x26c] ss:$16 sps:$4 sm:$0xff]  }
 0x11c   :  { %390 = vmatpush1.bf16.msra.mxu1 %v6543_v52  ;;  %v6603_v52 = vld [vmem:[%s9126_s4 + $0x268] ss:$16 sps:$4 sm:$0xff]  }
 0x11d   :  { %508 = vmatprep.subr.bf16.mxu1 %v6548_v53  ;;  %v6608_v53 = vld [vmem:[%s9126_s4 + $0x28c] ss:$16 sps:$4 sm:$0xff]  }
 0x11f   :  { %408 = vmatmul.mubr.bf16.vlgmr.msra.gmra.mrb[8].mxu1 %v160_v32  ;;  %v6582_v32 = vld [vmem:[%s9124_s3 + $0x140] ss:$8 sps:$4 sm:$0xff]  }
 0x120   :  { %417 = vmatprep.mubr.bf16.mxu1 %v7228_v40  ;;  %509 = vmatpush1.bf16.msra.mxu1 %v6546_v54  ;;  %v6606_v54 = vld [vmem:[%s9126_s4 + $0x288] ss:$16 sps:$4 sm:$0xff]  }
 0x121   :  { %510 = vmatprep.subr.bf16.mxu1 %v6551_v55  ;;  %v6611_v55 = vld [vmem:[%s9126_s4 + $0x2ac] ss:$16 sps:$4 sm:$0xff]  }
 0x124   :  { %511 = vmatpush1.bf16.msra.mxu1 %v6549_v56  ;;  %v6609_v56 = vld [vmem:[%s9126_s4 + $0x2a8] ss:$16 sps:$4 sm:$0xff]  }
 0x125   :  { %512 = vmatprep.subr.bf16.mxu1 %v6554_v57  ;;  %v6614_v57 = vld [vmem:[%s9126_s4 + $0x2cc] ss:$16 sps:$4 sm:$0xff]  }
 0x127   :  { %418 = vmatmul.mubr.bf16.gmra.mrb[12].mxu1 %v7322_v29  ;;  %v6584_v29 = vld [vmem:[%s9124_s3 + $0x144] ss:$8 sps:$4 sm:$0xff]  }
 0x128   :  { %513 = vmatpush1.bf16.msra.mxu1 %v6552_v58  ;;  %540 = vmatprep.mubr.bf16.mxu1 %v7228_v40  ;;  %v6612_v58 = vld [vmem:[%s9126_s4 + $0x2c8] ss:$16 sps:$4 sm:$0xff]  }
 0x129   :  { %514 = vmatprep.subr.bf16.mxu1 %v6557_v59  ;;  %v6617_v59 = vld [vmem:[%s9126_s4 + $0x2ec] ss:$16 sps:$4 sm:$0xff]  }
 0x12c   :  { %515 = vmatpush1.bf16.msra.mxu1 %v6555_v60  ;;  %v6615_v60 = vld [vmem:[%s9126_s4 + $0x2e8] ss:$16 sps:$4 sm:$0xff]  }
 0x12d   :  { %516 = vmatprep.subr.bf16.mxu1 %v6560_v61  ;;  %v6620_v61 = vld [vmem:[%s9126_s4 + $0x30c] ss:$16 sps:$4 sm:$0xff]  }
 0x130   :  { %517 = vmatpush1.bf16.msra.mxu1 %v6558_v62  ;;  %v6618_v62 = vld [vmem:[%s9126_s4 + $0x308] ss:$16 sps:$4 sm:$0xff]  }
 0x131   :  { %518 = vmatprep.subr.bf16.mxu1 %v6563_v63  ;;  %v6623_v63 = vld [vmem:[%s9126_s4 + $0x32c] ss:$16 sps:$4 sm:$0xff]  }
 0x134   :  { %519 = vmatpush1.bf16.msra.mxu1 %v6561_v0  ;;  %v6621_v0 = vld [vmem:[%s9126_s4 + $0x328] ss:$16 sps:$4 sm:$0xff]  }
 0x135   :  { %520 = vmatprep.subr.bf16.mxu1 %v6566_v1  ;;  %v6626_v1 = vld [vmem:[%s9126_s4 + $0x34c] ss:$16 sps:$4 sm:$0xff]  }
 0x138   :  { %521 = vmatpush1.bf16.msra.mxu1 %v6564_v2  ;;  %v6624_v2 = vld [vmem:[%s9126_s4 + $0x348] ss:$16 sps:$4 sm:$0xff]  }
 0x139   :  { %522 = vmatprep.subr.bf16.mxu1 %v6569_v3  ;;  %v6629_v3 = vld [vmem:[%s9126_s4 + $0x36c] ss:$16 sps:$4 sm:$0xff]  }
 0x13c   :  { %523 = vmatpush1.bf16.msra.mxu1 %v6567_v4  ;;  %v6627_v4 = vld [vmem:[%s9126_s4 + $0x368] ss:$16 sps:$4 sm:$0xff]  }
 0x13d   :  { %752 = vmatprep.subr.bf16.mxu1 %v6572_v5  ;;  %v6632_v5 = vld [vmem:[%s9126_s4 + $0x38c] ss:$16 sps:$4 sm:$0xff]  }
 0x1d2   :  { %v253_v6 = vpop.f32.mrb[4].mxu1 }
 0x1d3   :  { %v212_v7 = vpop.f32.mrb[0].mxu0  ;;  %v6387_v8 = vpop.f32.mrb[5].mxu1 }
 0x1d4   :  { %v6381_v9 = vpop.f32.mrb[1].mxu0  ;;  %v256_v10 = vpop.f32.mrb[6].mxu1  ;;  %v6633_v8 = vld [vmem:[%s9126_s4 + $0x3a8] ss:$16 sps:$4 sm:$0xff]  }
 0x1d5   :  { %v215_v11 = vpop.f32.mrb[2].mxu0  ;;  %v261_v14 = vpack.c.bf16 %v256_v10, %v253_v6  ;;  %v6388_v15 = vpop.f32.mrb[7].mxu1  ;;  %v6630_v6 = vld [vmem:[%s9126_s4 + $0x388] ss:$16 sps:$4 sm:$0xff]   ;;  %v6638_v9 = vld [vmem:[%s9126_s4 + $0x3cc] ss:$16 sps:$4 sm:$0xff]  }
 0x1d6   :  { %v260_v16 = vpack.c.bf16 %v215_v11, %v212_v7  ;;  %v6382_v17 = vpop.f32.mrb[3].mxu0  ;;  %v6635_v7 = vld [vmem:[%s9126_s4 + $0x3ac] ss:$16 sps:$4 sm:$0xff]   ;;  %v6636_v10 = vld [vmem:[%s9126_s4 + $0x3c8] ss:$16 sps:$4 sm:$0xff]  }
 0x1d7   :  { %v6641_v11 = vld [vmem:[%s9126_s4 + $0x3ec] ss:$16 sps:$4 sm:$0xff]   ;;  %v5466_v15 = vld [vmem:[%s9125_s1 + $0x1] ss:$8 sm:$0x3] }
 0x1d8   :  { %541 = vmatmul.mubr.bf16.vlgmr.msra.gmra.mrb[8].mxu1 %v260_v16  ;;  %v7599_v16 = vsub.s32 1, %v7310_v12 }
 0x1d9   :  { %753 = vmatpush1.bf16.msra.mxu1 %v6570_v13  ;;  %550 = vmatprep.mubr.bf16.mxu1 %v7228_v40  ;;  %v6639_v13 = vld [vmem:[%s9126_s4 + $0x3e8] ss:$16 sps:$4 sm:$0xff]  }
 0x1da   :  { %754 = vmatprep.subr.bf16.mxu1 %v6575_v18  ;;  %v823_v18 = vrot.slane %v5466_v15, %v7599_v16 }
 0x1db   :  { %v605_v21 = vpop.f32.mrb[4].mxu0 }
 0x1dc   :  { %v6393_v22 = vpop.f32.mrb[5].mxu0 }
 0x1dd   :  { %755 = vmatpush1.bf16.msra.mxu1 %v6573_v19  ;;  %v608_v24 = vpop.f32.mrb[6].mxu0 }
 0x1de   :  { %756 = vmatprep.subr.bf16.mxu1 %v6578_v20  ;;  %v653_v26 = vpack.c.bf16 %v608_v24, %v605_v21  ;;  %v6394_v27 = vpop.f32.mrb[7].mxu0 }
 0x1e0   :  { %551 = vmatmul.mubr.bf16.gmra.mrb[12].mxu1 %v261_v14  ;;  %v7593_v14 = vsub.s32 0, %v7310_v12 }
 0x1e1   :  { %757 = vmatpush1.bf16.msra.mxu1 %v6576_v23  ;;  %784 = vmatprep.mubr.bf16.mxu1 %v7228_v40 }
 0x1e2   :  { %758 = vmatprep.subr.bf16.mxu1 %v6581_v25  ;;  %v819_v17 = vrot.slane %v5466_v15, %v7593_v14  ;;  %v6659_v15 = vld [vmem:[%s9126_s4 + $0x2a4] ss:$16 sps:$4 sm:$0xff]  }
 0x1e3   :  { %v646_v30 = vpop.f32.mrb[8].mxu0 }
 0x1e4   :  { %v6399_v31 = vpop.f32.mrb[9].mxu0 }
 0x1e5   :  { %759 = vmatpush1.bf16.msra.mxu1 %v6579_v28  ;;  %v649_v34 = vpop.f32.mrb[10].mxu0 }
 0x1e6   :  { %760 = vmatprep.subr.bf16.mxu1 %v6584_v29  ;;  %v654_v36 = vpack.c.bf16 %v649_v34, %v646_v30  ;;  %v6400_v37 = vpop.f32.mrb[11].mxu0 }
 0x1e9   :  { %761 = vmatpush1.bf16.msra.mxu1 %v6582_v32 }
 0x1ea   :  { %762 = vmatprep.subr.bf16.mxu1 %v6587_v35 }
 0x1ed   :  { %763 = vmatpush1.bf16.msra.mxu1 %v6585_v38 }
 0x1ee   :  { %764 = vmatprep.subr.bf16.mxu1 %v6590_v39 }
 0x1f1   :  { %765 = vmatpush1.bf16.msra.mxu1 %v6588_v41 }
 0x1f2   :  { %766 = vmatprep.subr.bf16.mxu1 %v6593_v43 }
 0x1f5   :  { %767 = vmatpush1.bf16.msra.mxu1 %v6591_v44 }
 0x1f6   :  { %1454 = vmatprep.subr.bf16.mxu1 %v6596_v45 }
 0x1f8   :  { %785 = vmatmul.mubr.bf16.vlgmr.msra.gmra.mrb[8].mxu1 %v653_v26 }
 0x1f9   :  { %794 = vmatprep.mubr.bf16.mxu1 %v7228_v40  ;;  %1455 = vmatpush1.bf16.msra.mxu1 %v6594_v46 }
 0x1fa   :  { %1456 = vmatprep.subr.bf16.mxu1 %v6599_v47 }
 0x1fd   :  { %1457 = vmatpush1.bf16.msra.mxu1 %v6597_v48 }
 0x1fe   :  { %1458 = vmatprep.subr.bf16.mxu1 %v6602_v49 }
 0x200   :  { %795 = vmatmul.mubr.bf16.gmra.mrb[12].mxu1 %v654_v36 }
 0x201   :  { %1459 = vmatpush1.bf16.msra.mxu1 %v6600_v50 }
 0x202   :  { %1460 = vmatprep.subr.bf16.mxu1 %v6605_v51 }
 0x205   :  { %1461 = vmatpush1.bf16.msra.mxu1 %v6603_v52 }
 0x206   :  { %1462 = vmatprep.subr.bf16.mxu1 %v6608_v53 }
 0x209   :  { %1463 = vmatpush1.bf16.msra.mxu1 %v6606_v54 }
 0x20a   :  { %1464 = vmatprep.subr.bf16.mxu1 %v6611_v55 }
 0x20d   :  { %1465 = vmatpush1.bf16.msra.mxu1 %v6609_v56 }
 0x20e   :  { %1466 = vmatprep.subr.bf16.mxu1 %v6614_v57 }
 0x211   :  { %1467 = vmatpush1.bf16.msra.mxu1 %v6612_v58  ;;  %v6644_v58 = vld [vmem:[%s9126_s4 + $0x204] ss:$16 sps:$4 sm:$0xff]  }
 0x212   :  { %1468 = vmatprep.subr.bf16.mxu1 %v6617_v59  ;;  %v6642_v59 = vld [vmem:[%s9126_s4 + $0x200] ss:$16 sps:$4 sm:$0xff]  }
 0x215   :  { %1469 = vmatpush1.bf16.msra.mxu1 %v6615_v60  ;;  %v6647_v60 = vld [vmem:[%s9126_s4 + $0x224] ss:$16 sps:$4 sm:$0xff]  }
 0x216   :  { %1470 = vmatprep.subr.bf16.mxu1 %v6620_v61  ;;  %v6738_v61 = vld [vmem:[%s9126_s4 + $0x8] ss:$16 sps:$4 sm:$0xff]  }
 0x219   :  { %1471 = vmatpush1.bf16.msra.mxu1 %v6618_v62  ;;  %v6740_v62 = vld [vmem:[%s9126_s4 + $0xc] ss:$16 sps:$4 sm:$0xff]  }
 0x21a   :  { %1472 = vmatprep.subr.bf16.mxu1 %v6623_v63  ;;  %v6743_v63 = vld [vmem:[%s9126_s4 + $0x2c] ss:$16 sps:$4 sm:$0xff]  }
 0x21d   :  { %1473 = vmatpush1.bf16.msra.mxu1 %v6621_v0  ;;  %v6645_v0 = vld [vmem:[%s9126_s4 + $0x220] ss:$16 sps:$4 sm:$0xff]  }
 0x21e   :  { %1474 = vmatprep.subr.bf16.mxu1 %v6626_v1  ;;  %v6650_v1 = vld [vmem:[%s9126_s4 + $0x244] ss:$16 sps:$4 sm:$0xff]  }
 0x221   :  { %1475 = vmatpush1.bf16.msra.mxu1 %v6624_v2  ;;  %v6741_v2 = vld [vmem:[%s9126_s4 + $0x28] ss:$16 sps:$4 sm:$0xff]  }
 0x222   :  { %1476 = vmatprep.subr.bf16.mxu1 %v6629_v3  ;;  %v6746_v3 = vld [vmem:[%s9126_s4 + $0x4c] ss:$16 sps:$4 sm:$0xff]  }
 0x225   :  { %1477 = vmatpush1.bf16.msra.mxu1 %v6627_v4  ;;  %v6648_v4 = vld [vmem:[%s9126_s4 + $0x240] ss:$16 sps:$4 sm:$0xff]  }
 0x226   :  { %1478 = vmatprep.subr.bf16.mxu1 %v6632_v5  ;;  %v6653_v5 = vld [vmem:[%s9126_s4 + $0x264] ss:$16 sps:$4 sm:$0xff]  }
 0x229   :  { %1479 = vmatpush1.bf16.msra.mxu1 %v6630_v6  ;;  %v6744_v6 = vld [vmem:[%s9126_s4 + $0x48] ss:$16 sps:$4 sm:$0xff]  }
 0x22a   :  { %1480 = vmatprep.subr.bf16.mxu1 %v6635_v7  ;;  %v6749_v7 = vld [vmem:[%s9126_s4 + $0x6c] ss:$16 sps:$4 sm:$0xff]  }
 0x22d   :  { %1481 = vmatpush1.bf16.msra.mxu1 %v6633_v8  ;;  %v6651_v8 = vld [vmem:[%s9126_s4 + $0x260] ss:$16 sps:$4 sm:$0xff]  }
 0x22e   :  { %1482 = vmatprep.subr.bf16.mxu1 %v6638_v9  ;;  %v6656_v9 = vld [vmem:[%s9126_s4 + $0x284] ss:$16 sps:$4 sm:$0xff]  }
 0x231   :  { %1483 = vmatpush1.bf16.msra.mxu1 %v6636_v10  ;;  %v6747_v10 = vld [vmem:[%s9126_s4 + $0x68] ss:$16 sps:$4 sm:$0xff]  }
 0x232   :  { %1484 = vmatprep.subr.bf16.mxu1 %v6641_v11  ;;  %v6752_v11 = vld [vmem:[%s9126_s4 + $0x8c] ss:$16 sps:$4 sm:$0xff]  }
 0x235   :  { %1485 = vmatpush1.bf16.msra.mxu1 %v6639_v13  ;;  %v6654_v13 = vld [vmem:[%s9126_s4 + $0x280] ss:$16 sps:$4 sm:$0xff]  }
 0x236   :  { %1880 = vmatprep.subr.bf16.mxu1 %v6740_v62  ;;  %v6684_v62 = vld [vmem:[%s9126_s4 + $0x3c0] ss:$16 sps:$4 sm:$0xff]  }
 0x2cb   :  { %v786_v19 = vpop.f32.mrb[8].mxu1 }
 0x2cc   :  { %v826_v20 = vadd.f32 %v819_v17, %v786_v19  ;;  %v788_v21 = vpop.f32.mrb[9].mxu1  ;;  %v6657_v19 = vld [vmem:[%s9126_s4 + $0x2a0] ss:$16 sps:$4 sm:$0xff]  }
 0x2cd   :  { %v827_v22 = vadd.f32 %v823_v18, %v788_v21  ;;  %v790_v23 = vpop.f32.mrb[10].mxu1  ;;  %v6753_v21 = vld [vmem:[%s9126_s4 + $0xa8] ss:$16 sps:$4 sm:$0xff]  }
 0x2ce   :  { %v842_v24 = vmul.f32 0.2, %v826_v20  ;;  %v828_v25 = vadd.f32 %v819_v17, %v790_v23  ;;  %v792_v26 = vpop.f32.mrb[11].mxu1  ;;  %vm834_vm6 = vcmp.gt.f32.partialorder %v826_v20, 0.0  ;;  %v6660_v23 = vld [vmem:[%s9126_s4 + $0x2c0] ss:$16 sps:$4 sm:$0xff]  }
 0x2cf   :  { %v843_v27 = vmul.f32 0.2, %v827_v22  ;;  %v829_v28 = vadd.f32 %v823_v18, %v792_v26  ;;  %vm835_vm7 = vcmp.gt.f32.partialorder %v827_v22, 0.0  ;;  %v6761_v26 = vld [vmem:[%s9126_s4 + $0xec] ss:$16 sps:$4 sm:$0xff]  }
 0x2d0   :  { %vm836_vm8 = vcmp.gt.f32.partialorder %v828_v25, 0.0  ;;  %v844_v29 = vmul.f32 0.2, %v828_v25  ;;  %v850_v31 = vsel %vm834_vm6, %v826_v20, %v842_v24  ;;  %v6662_v20 = vld [vmem:[%s9126_s4 + $0x2c4] ss:$16 sps:$4 sm:$0xff]  }
 0x2d1   :  { %vm837_vm9 = vcmp.gt.f32.partialorder %v829_v28, 0.0  ;;  %v845_v30 = vmul.f32 0.2, %v829_v28  ;;  %v851_v34 = vsel %vm835_vm7, %v827_v22, %v843_v27  ;;  %v6758_v22 = vld [vmem:[%s9126_s4 + $0xcc] ss:$16 sps:$4 sm:$0xff]  }
 0x2d2   :  { %v852_v32 = vsel %vm836_vm8, %v828_v25, %v844_v29  ;;  %v6665_v24 = vld [vmem:[%s9126_s4 + $0x2e4] ss:$16 sps:$4 sm:$0xff]   ;;  %v6756_v25 = vld [vmem:[%s9126_s4 + $0xc8] ss:$16 sps:$4 sm:$0xff]   ;;  %v6663_v27 = vld [vmem:[%s9126_s4 + $0x2e0] ss:$16 sps:$4 sm:$0xff]  }
 0x2d3   :  { %v7603_v35 = vpack.c.bf16 %v852_v32, %v850_v31  ;;  %v853_v36 = vsel %vm837_vm9, %v829_v28, %v845_v30  ;;  %v796_v37 = vpop.f32.mrb[12].mxu1  ;;  %v6668_v28 = vld [vmem:[%s9126_s4 + $0x304] ss:$16 sps:$4 sm:$0xff]   ;;  %v6759_v29 = vld [vmem:[%s9126_s4 + $0xe8] ss:$16 sps:$4 sm:$0xff]  }
 0x2d4   :  { %v7605_v38 = vpack.c.bf16 %v853_v36, %v851_v34  ;;  %v830_v39 = vadd.f32 %v819_v17, %v796_v37  ;;  %v798_v41 = vpop.f32.mrb[13].mxu1  ;;  %v6764_v30 = vld [vmem:[%s9126_s4 + $0x10c] ss:$16 sps:$4 sm:$0xff]   ;;  %v6666_v31 = vld [vmem:[%s9126_s4 + $0x300] ss:$16 sps:$4 sm:$0xff]  }
 0x2d5   :  { %v831_v43 = vadd.f32 %v823_v18, %v798_v41  ;;  %v800_v44 = vpop.f32.mrb[14].mxu1  ;;  %v6671_v32 = vld [vmem:[%s9126_s4 + $0x324] ss:$16 sps:$4 sm:$0xff]   ;;  %v6762_v34 = vld [vmem:[%s9126_s4 + $0x108] ss:$16 sps:$4 sm:$0xff]  }
 0x2d6   :  { %v846_v45 = vmul.f32 0.2, %v830_v39  ;;  %v832_v46 = vadd.f32 %v819_v17, %v800_v44  ;;  %v802_v47 = vpop.f32.mrb[15].mxu1  ;;  %862 = vmatprep.subr.bf16.mxu0 %v7605_v38  ;;  %1486 = vmatprep.mubr.bf16.mxu1 %v7605_v38  ;;  %vm838_vm10 = vcmp.gt.f32.partialorder %v830_v39, 0.0  ;;  %v6750_v17 = vld [vmem:[%s9126_s4 + $0x88] ss:$16 sps:$4 sm:$0xff]  }
 0x2d7   :  { %v847_v48 = vmul.f32 0.2, %v831_v43  ;;  %v833_v49 = vadd.f32 %v823_v18, %v802_v47  ;;  %863 = vmatpush1.bf16.msra.mxu0 %v7603_v35  ;;  %1487 = vmatmul.mubr.bf16.vlgmr.msra.gmra.mrb[16].mxu1 %v7603_v35  ;;  %vm839_vm11 = vcmp.gt.f32.partialorder %v831_v43, 0.0  ;;  %v6755_v18 = vld [vmem:[%s9126_s4 + $0xac] ss:$16 sps:$4 sm:$0xff]  }
 0x2d8   :  { %vm840_vm12 = vcmp.gt.f32.partialorder %v832_v46, 0.0  ;;  %v848_v50 = vmul.f32 0.2, %v832_v46  ;;  %v854_v52 = vsel %vm838_vm10, %v830_v39, %v846_v45  ;;  %1881 = vmatpush1.bf16.msra.mxu1 %v6738_v61  ;;  %v6767_v36 = vld [vmem:[%s9126_s4 + $0x12c] ss:$16 sps:$4 sm:$0xff]  }
 0x2d9   :  { %vm841_vm13 = vcmp.gt.f32.partialorder %v833_v49, 0.0  ;;  %v849_v51 = vmul.f32 0.2, %v833_v49  ;;  %v855_v54 = vsel %vm839_vm11, %v831_v43, %v847_v48  ;;  %1882 = vmatprep.subr.bf16.mxu1 %v6743_v63  ;;  %v6669_v37 = vld [vmem:[%s9126_s4 + $0x320] ss:$16 sps:$4 sm:$0xff]  }
 0x2da   :  { %v856_v53 = vsel %vm840_vm12, %v832_v46, %v848_v50  ;;  %5467 = vmatmul.mubr.msk.bf16.vlgmr.msra.gmra.mrb[12].mxu0 %vm174_vm3, %v7325_v33  ;;  %v6674_v39 = vld [vmem:[%s9126_s4 + $0x344] ss:$16 sps:$4 sm:$0xff]   ;;  %v6765_v41 = vld [vmem:[%s9126_s4 + $0x128] ss:$16 sps:$4 sm:$0xff]   ;;  %v6770_v43 = vld [vmem:[%s9126_s4 + $0x14c] ss:$16 sps:$4 sm:$0xff]  }
 0x2db   :  { %v7613_v55 = vpack.c.bf16 %v856_v53, %v854_v52  ;;  %v857_v56 = vsel %vm841_vm13, %v833_v49, %v849_v51  ;;  %937 = vmatprep.mubr.bf16.mxu0 %v7228_v40  ;;  %v6672_v44 = vld [vmem:[%s9126_s4 + $0x340] ss:$16 sps:$4 sm:$0xff]   ;;  %v6677_v45 = vld [vmem:[%s9126_s4 + $0x364] ss:$16 sps:$4 sm:$0xff]   ;;  %v6768_v46 = vld [vmem:[%s9126_s4 + $0x148] ss:$16 sps:$4 sm:$0xff]  }
 0x2dc   :  { %v7616_v57 = vpack.c.bf16 %v857_v56, %v855_v54  ;;  %1883 = vmatpush1.bf16.msra.mxu1 %v6741_v2  ;;  %v6773_v47 = vld [vmem:[%s9126_s4 + $0x16c] ss:$16 sps:$4 sm:$0xff]   ;;  %v6675_v48 = vld [vmem:[%s9126_s4 + $0x360] ss:$16 sps:$4 sm:$0xff]   ;;  %v6680_v49 = vld [vmem:[%s9126_s4 + $0x384] ss:$16 sps:$4 sm:$0xff]  }
 0x2dd   :  { %1884 = vmatprep.subr.bf16.mxu1 %v6746_v3  ;;  %v6771_v50 = vld [vmem:[%s9126_s4 + $0x168] ss:$16 sps:$4 sm:$0xff]   ;;  %v6776_v51 = vld [vmem:[%s9126_s4 + $0x18c] ss:$16 sps:$4 sm:$0xff]   ;;  %v6678_v52 = vld [vmem:[%s9126_s4 + $0x380] ss:$16 sps:$4 sm:$0xff]  }
 0x2de   :  { %905 = vmatprep.subr.bf16.mxu0 %v7616_v57  ;;  %1496 = vmatprep.mubr.bf16.mxu1 %v7616_v57  ;;  %v6683_v53 = vld [vmem:[%s9126_s4 + $0x3a4] ss:$16 sps:$4 sm:$0xff]   ;;  %v6774_v54 = vld [vmem:[%s9126_s4 + $0x188] ss:$16 sps:$4 sm:$0xff]   ;;  %v6779_v56 = vld [vmem:[%s9126_s4 + $0x1ac] ss:$16 sps:$4 sm:$0xff]  }
 0x2df   :  { %906 = vmatpush1.bf16.msra.mxu0 %v7613_v55  ;;  %1497 = vmatmul.mubr.bf16.gmra.mrb[20].mxu1 %v7613_v55  ;;  %v6782_v61 = vld [vmem:[%s9126_s4 + $0x1cc] ss:$16 sps:$4 sm:$0xff]   ;;  %v6689_v63 = vld [vmem:[%s9126_s4 + $0x3e4] ss:$16 sps:$4 sm:$0xff]   ;;  %v6690_v3 = vld [vmem:[%s9126_s4] ss:$16 sps:$4 sm:$0xff]  }
 0x2e0   :  { %1401 = vmatprep.subr.bf16.mxu0 %v6644_v58  ;;  %1885 = vmatpush1.bf16.msra.mxu1 %v6744_v6  ;;  %v6681_v58 = vld [vmem:[%s9126_s4 + $0x3a0] ss:$16 sps:$4 sm:$0xff]   ;;  %v6692_v2 = vld [vmem:[%s9126_s4 + $0x4] ss:$16 sps:$4 sm:$0xff]  }
 0x2e1   :  { %1886 = vmatprep.subr.bf16.mxu1 %v6749_v7  ;;  %v6698_v6 = vld [vmem:[%s9126_s4 + $0x44] ss:$16 sps:$4 sm:$0xff]   ;;  %v6696_v7 = vld [vmem:[%s9126_s4 + $0x40] ss:$16 sps:$4 sm:$0xff]  }
 0x2e2   :  { %5468 = vmatmul.mubr.msk.bf16.vlgmr.msra.gmra.mrb[16].mxu0 %vm174_vm3, %v7325_v33 }
 0x2e3   :  { %1402 = vmatpush1.bf16.msra.mxu0 %v6642_v59  ;;  %1433 = vmatprep.mubr.bf16.mxu0 %v7605_v38  ;;  %v6686_v59 = vld [vmem:[%s9126_s4 + $0x3c4] ss:$16 sps:$4 sm:$0xff]  }
 0x2e4   :  { %1403 = vmatprep.subr.bf16.mxu0 %v6647_v60  ;;  %1887 = vmatpush1.bf16.msra.mxu1 %v6747_v10  ;;  %v6777_v60 = vld [vmem:[%s9126_s4 + $0x1a8] ss:$16 sps:$4 sm:$0xff]   ;;  %v6704_v10 = vld [vmem:[%s9126_s4 + $0x84] ss:$16 sps:$4 sm:$0xff]  }
 0x2e5   :  { %1888 = vmatprep.subr.bf16.mxu1 %v6752_v11  ;;  %v6785_v11 = vld [vmem:[%s9126_s4 + $0x1ec] ss:$16 sps:$4 sm:$0xff]  }
 0x2e7   :  { %1404 = vmatpush1.bf16.msra.mxu0 %v6645_v0  ;;  %v6780_v0 = vld [vmem:[%s9126_s4 + $0x1c8] ss:$16 sps:$4 sm:$0xff]  }
 0x2e8   :  { %1405 = vmatprep.subr.bf16.mxu0 %v6650_v1  ;;  %1889 = vmatpush1.bf16.msra.mxu1 %v6750_v17  ;;  %v6687_v1 = vld [vmem:[%s9126_s4 + $0x3e0] ss:$16 sps:$4 sm:$0xff]   ;;  %v6707_v17 = vld [vmem:[%s9126_s4 + $0xa4] ss:$16 sps:$4 sm:$0xff]  }
 0x2e9   :  { %1890 = vmatprep.subr.bf16.mxu1 %v6755_v18  ;;  %v6705_v18 = vld [vmem:[%s9126_s4 + $0xa0] ss:$16 sps:$4 sm:$0xff]  }
 0x2eb   :  { %1406 = vmatpush1.bf16.msra.mxu0 %v6648_v4  ;;  %v6695_v4 = vld [vmem:[%s9126_s4 + $0x24] ss:$16 sps:$4 sm:$0xff]  }
 0x2ec   :  { %1407 = vmatprep.subr.bf16.mxu0 %v6653_v5  ;;  %1891 = vmatpush1.bf16.msra.mxu1 %v6753_v21  ;;  %v6693_v5 = vld [vmem:[%s9126_s4 + $0x20] ss:$16 sps:$4 sm:$0xff]   ;;  %v6713_v21 = vld [vmem:[%s9126_s4 + $0xe4] ss:$16 sps:$4 sm:$0xff]  }
 0x2ed   :  { %1892 = vmatprep.subr.bf16.mxu1 %v6758_v22  ;;  %v6711_v22 = vld [vmem:[%s9126_s4 + $0xe0] ss:$16 sps:$4 sm:$0xff]  }
 0x2ef   :  { %1408 = vmatpush1.bf16.msra.mxu0 %v6651_v8  ;;  %v6701_v8 = vld [vmem:[%s9126_s4 + $0x64] ss:$16 sps:$4 sm:$0xff]  }
 0x2f0   :  { %1409 = vmatprep.subr.bf16.mxu0 %v6656_v9  ;;  %1893 = vmatpush1.bf16.msra.mxu1 %v6756_v25  ;;  %v6699_v9 = vld [vmem:[%s9126_s4 + $0x60] ss:$16 sps:$4 sm:$0xff]   ;;  %v6719_v25 = vld [vmem:[%s9126_s4 + $0x124] ss:$16 sps:$4 sm:$0xff]  }
 0x2f1   :  { %1894 = vmatprep.subr.bf16.mxu1 %v6761_v26  ;;  %v6717_v26 = vld [vmem:[%s9126_s4 + $0x120] ss:$16 sps:$4 sm:$0xff]  }
 0x2f3   :  { %1410 = vmatpush1.bf16.msra.mxu0 %v6654_v13  ;;  %v6702_v13 = vld [vmem:[%s9126_s4 + $0x80] ss:$16 sps:$4 sm:$0xff]  }
 0x2f4   :  { %1411 = vmatprep.subr.bf16.mxu0 %v6659_v15  ;;  %1895 = vmatpush1.bf16.msra.mxu1 %v6759_v29  ;;  %v6783_v15 = vld [vmem:[%s9126_s4 + $0x1e8] ss:$16 sps:$4 sm:$0xff]   ;;  %v6725_v29 = vld [vmem:[%s9126_s4 + $0x164] ss:$16 sps:$4 sm:$0xff]  }
 0x2f5   :  { %1896 = vmatprep.subr.bf16.mxu1 %v6764_v30  ;;  %v6723_v30 = vld [vmem:[%s9126_s4 + $0x160] ss:$16 sps:$4 sm:$0xff]  }
 0x2f7   :  { %1412 = vmatpush1.bf16.msra.mxu0 %v6657_v19  ;;  %v6710_v19 = vld [vmem:[%s9126_s4 + $0xc4] ss:$16 sps:$4 sm:$0xff]  }
 0x2f8   :  { %1413 = vmatprep.subr.bf16.mxu0 %v6662_v20  ;;  %1897 = vmatpush1.bf16.msra.mxu1 %v6762_v34  ;;  %v6708_v20 = vld [vmem:[%s9126_s4 + $0xc0] ss:$16 sps:$4 sm:$0xff]  }
 0x2f9   :  { %1898 = vmatprep.subr.bf16.mxu1 %v6767_v36  ;;  %v6726_v34 = vld [vmem:[%s9126_s4 + $0x180] ss:$16 sps:$4 sm:$0xff]   ;;  %v6731_v36 = vld [vmem:[%s9126_s4 + $0x1a4] ss:$16 sps:$4 sm:$0xff]  }
 0x2fb   :  { %1414 = vmatpush1.bf16.msra.mxu0 %v6660_v23  ;;  %v6716_v23 = vld [vmem:[%s9126_s4 + $0x104] ss:$16 sps:$4 sm:$0xff]  }
 0x2fc   :  { %1415 = vmatprep.subr.bf16.mxu0 %v6665_v24  ;;  %1899 = vmatpush1.bf16.msra.mxu1 %v6765_v41  ;;  %v6714_v24 = vld [vmem:[%s9126_s4 + $0x100] ss:$16 sps:$4 sm:$0xff]  }
 0x2fd   :  { %1900 = vmatprep.subr.bf16.mxu1 %v6770_v43  ;;  %v6732_v41 = vld [vmem:[%s9126_s4 + $0x1c0] ss:$16 sps:$4 sm:$0xff]   ;;  %v6737_v43 = vld [vmem:[%s9126_s4 + $0x1e4] ss:$16 sps:$4 sm:$0xff]  }
 0x2ff   :  { %1416 = vmatpush1.bf16.msra.mxu0 %v6663_v27  ;;  %v6722_v27 = vld [vmem:[%s9126_s4 + $0x144] ss:$16 sps:$4 sm:$0xff]  }
 0x300   :  { %1417 = vmatprep.subr.bf16.mxu0 %v6668_v28  ;;  %1901 = vmatpush1.bf16.msra.mxu1 %v6768_v46  ;;  %v6720_v28 = vld [vmem:[%s9126_s4 + $0x140] ss:$16 sps:$4 sm:$0xff]  }
 0x301   :  { %1902 = vmatprep.subr.bf16.mxu1 %v6773_v47 }
 0x303   :  { %1418 = vmatpush1.bf16.msra.mxu0 %v6666_v31  ;;  %v6728_v31 = vld [vmem:[%s9126_s4 + $0x184] ss:$16 sps:$4 sm:$0xff]  }
 0x304   :  { %1419 = vmatprep.subr.bf16.mxu0 %v6671_v32  ;;  %1903 = vmatpush1.bf16.msra.mxu1 %v6771_v50  ;;  %v6788_v32 = vld [vmem:[%s9126_s4 + $0x404] ss:$16 sps:$4 sm:$0xff]  }
 0x305   :  { %1904 = vmatprep.subr.bf16.mxu1 %v6776_v51  ;;  %v6786_v51 = vld [vmem:[%s9126_s4 + $0x400] ss:$16 sps:$4 sm:$0xff]  }
 0x307   :  { %1420 = vmatpush1.bf16.msra.mxu0 %v6669_v37  ;;  %v6729_v37 = vld [vmem:[%s9126_s4 + $0x1a0] ss:$16 sps:$4 sm:$0xff]  }
 0x308   :  { %1421 = vmatprep.subr.bf16.mxu0 %v6674_v39  ;;  %1905 = vmatpush1.bf16.msra.mxu1 %v6774_v54  ;;  %v6734_v39 = vld [vmem:[%s9126_s4 + $0x1c4] ss:$16 sps:$4 sm:$0xff]  }
 0x309   :  { %1906 = vmatprep.subr.bf16.mxu1 %v6779_v56  ;;  %v6794_v56 = vld [vmem:[%s9126_s4 + $0x444] ss:$16 sps:$4 sm:$0xff]  }
 0x30b   :  { %1422 = vmatpush1.bf16.msra.mxu0 %v6672_v44  ;;  %v6735_v44 = vld [vmem:[%s9126_s4 + $0x1e0] ss:$16 sps:$4 sm:$0xff]  }
 0x30c   :  { %1423 = vmatprep.subr.bf16.mxu0 %v6677_v45  ;;  %1907 = vmatpush1.bf16.msra.mxu1 %v6777_v60 }
 0x30d   :  { %1908 = vmatprep.subr.bf16.mxu1 %v6782_v61 }
 0x30f   :  { %1424 = vmatpush1.bf16.msra.mxu0 %v6675_v48 }
 0x310   :  { %1425 = vmatprep.subr.bf16.mxu0 %v6680_v49  ;;  %1909 = vmatpush1.bf16.msra.mxu1 %v6780_v0  ;;  %v6798_v0 = vld [vmem:[%s9126_s4 + $0x480] ss:$16 sps:$4 sm:$0xff]  }
 0x311   :  { %1910 = vmatprep.subr.bf16.mxu1 %v6785_v11  ;;  %v6816_v11 = vld [vmem:[%s9126_s4 + $0x540] ss:$16 sps:$4 sm:$0xff]  }
 0x313   :  { %1426 = vmatpush1.bf16.msra.mxu0 %v6678_v52  ;;  %v6791_v52 = vld [vmem:[%s9126_s4 + $0x424] ss:$16 sps:$4 sm:$0xff]  }
 0x314   :  { %1427 = vmatprep.subr.bf16.mxu0 %v6683_v53  ;;  %1911 = vmatpush1.bf16.msra.mxu1 %v6783_v15  ;;  %v6789_v53 = vld [vmem:[%s9126_s4 + $0x420] ss:$16 sps:$4 sm:$0xff]  }
 0x315   :  { %2408 = vmatprep.subr.bf16.mxu1 %v6788_v32  ;;  %v6819_v15 = vld [vmem:[%s9126_s4 + $0x560] ss:$16 sps:$4 sm:$0xff]  }
 0x317   :  { %1428 = vmatpush1.bf16.msra.mxu0 %v6681_v58 }
 0x318   :  { %1429 = vmatprep.subr.bf16.mxu0 %v6686_v59 }
 0x31b   :  { %1430 = vmatpush1.bf16.msra.mxu0 %v6684_v62  ;;  %v6795_v62 = vld [vmem:[%s9126_s4 + $0x460] ss:$16 sps:$4 sm:$0xff]  }
 0x31c   :  { %1431 = vmatprep.subr.bf16.mxu0 %v6689_v63  ;;  %v6800_v63 = vld [vmem:[%s9126_s4 + $0x484] ss:$16 sps:$4 sm:$0xff]  }
 0x31f   :  { %1432 = vmatpush1.bf16.msra.mxu0 %v6687_v1  ;;  %v6803_v1 = vld [vmem:[%s9126_s4 + $0x4a4] ss:$16 sps:$4 sm:$0xff]  }
 0x320   :  { %1827 = vmatprep.subr.bf16.mxu0 %v6692_v2  ;;  %v6801_v2 = vld [vmem:[%s9126_s4 + $0x4a0] ss:$16 sps:$4 sm:$0xff]  }
 0x322   :  { %1434 = vmatmul.mubr.bf16.vlgmr.msra.gmra.mrb[20].mxu0 %v7603_v35 }
 0x323   :  { %1443 = vmatprep.mubr.bf16.mxu0 %v7616_v57  ;;  %1828 = vmatpush1.bf16.msra.mxu0 %v6690_v3  ;;  %v6806_v3 = vld [vmem:[%s9126_s4 + $0x4c4] ss:$16 sps:$4 sm:$0xff]  }
 0x324   :  { %1829 = vmatprep.subr.bf16.mxu0 %v6695_v4  ;;  %v6804_v4 = vld [vmem:[%s9126_s4 + $0x4c0] ss:$16 sps:$4 sm:$0xff]  }
 0x327   :  { %1830 = vmatpush1.bf16.msra.mxu0 %v6693_v5  ;;  %v6807_v5 = vld [vmem:[%s9126_s4 + $0x4e0] ss:$16 sps:$4 sm:$0xff]  }
 0x328   :  { %1831 = vmatprep.subr.bf16.mxu0 %v6698_v6  ;;  %v6812_v6 = vld [vmem:[%s9126_s4 + $0x504] ss:$16 sps:$4 sm:$0xff]  }
 0x32a   :  { %1444 = vmatmul.mubr.bf16.gmra.mrb[24].mxu0 %v7613_v55 }
 0x32b   :  { %1832 = vmatpush1.bf16.msra.mxu0 %v6696_v7  ;;  %v6810_v7 = vld [vmem:[%s9126_s4 + $0x500] ss:$16 sps:$4 sm:$0xff]  }
 0x32c   :  { %1833 = vmatprep.subr.bf16.mxu0 %v6701_v8  ;;  %v6815_v8 = vld [vmem:[%s9126_s4 + $0x524] ss:$16 sps:$4 sm:$0xff]  }
 0x32f   :  { %1834 = vmatpush1.bf16.msra.mxu0 %v6699_v9  ;;  %v6813_v9 = vld [vmem:[%s9126_s4 + $0x520] ss:$16 sps:$4 sm:$0xff]  }
 0x330   :  { %1835 = vmatprep.subr.bf16.mxu0 %v6704_v10  ;;  %v6818_v10 = vld [vmem:[%s9126_s4 + $0x544] ss:$16 sps:$4 sm:$0xff]  }
 0x333   :  { %1836 = vmatpush1.bf16.msra.mxu0 %v6702_v13  ;;  %v6821_v13 = vld [vmem:[%s9126_s4 + $0x564] ss:$16 sps:$4 sm:$0xff]  }
 0x334   :  { %1837 = vmatprep.subr.bf16.mxu0 %v6707_v17  ;;  %v6824_v17 = vld [vmem:[%s9126_s4 + $0x584] ss:$16 sps:$4 sm:$0xff]  }
 0x337   :  { %1838 = vmatpush1.bf16.msra.mxu0 %v6705_v18  ;;  %v6822_v18 = vld [vmem:[%s9126_s4 + $0x580] ss:$16 sps:$4 sm:$0xff]  }
 0x338   :  { %1839 = vmatprep.subr.bf16.mxu0 %v6710_v19  ;;  %v6827_v19 = vld [vmem:[%s9126_s4 + $0x5a4] ss:$16 sps:$4 sm:$0xff]  }
 0x33b   :  { %1840 = vmatpush1.bf16.msra.mxu0 %v6708_v20  ;;  %v6825_v20 = vld [vmem:[%s9126_s4 + $0x5a0] ss:$16 sps:$4 sm:$0xff]  }
 0x33c   :  { %1841 = vmatprep.subr.bf16.mxu0 %v6713_v21  ;;  %v6830_v21 = vld [vmem:[%s9126_s4 + $0x5c4] ss:$16 sps:$4 sm:$0xff]  }
 0x33f   :  { %1842 = vmatpush1.bf16.msra.mxu0 %v6711_v22  ;;  %v6828_v22 = vld [vmem:[%s9126_s4 + $0x5c0] ss:$16 sps:$4 sm:$0xff]  }
 0x340   :  { %1843 = vmatprep.subr.bf16.mxu0 %v6716_v23  ;;  %v6833_v23 = vld [vmem:[%s9126_s4 + $0x5e4] ss:$16 sps:$4 sm:$0xff]  }
 0x343   :  { %1844 = vmatpush1.bf16.msra.mxu0 %v6714_v24  ;;  %v6831_v24 = vld [vmem:[%s9126_s4 + $0x5e0] ss:$16 sps:$4 sm:$0xff]  }
 0x344   :  { %1845 = vmatprep.subr.bf16.mxu0 %v6719_v25  ;;  %v6836_v25 = vld [vmem:[%s9126_s4 + $0x40c] ss:$16 sps:$4 sm:$0xff]  }
 0x347   :  { %1846 = vmatpush1.bf16.msra.mxu0 %v6717_v26 }
 0x348   :  { %1847 = vmatprep.subr.bf16.mxu0 %v6722_v27 }
 0x34b   :  { %1848 = vmatpush1.bf16.msra.mxu0 %v6720_v28 }
 0x34c   :  { %1849 = vmatprep.subr.bf16.mxu0 %v6725_v29 }
 0x34f   :  { %1850 = vmatpush1.bf16.msra.mxu0 %v6723_v30 }
 0x350   :  { %1851 = vmatprep.subr.bf16.mxu0 %v6728_v31 }
 0x353   :  { %1852 = vmatpush1.bf16.msra.mxu0 %v6726_v34 }
 0x354   :  { %1853 = vmatprep.subr.bf16.mxu0 %v6731_v36 }
 0x357   :  { %1854 = vmatpush1.bf16.msra.mxu0 %v6729_v37 }
 0x358   :  { %1855 = vmatprep.subr.bf16.mxu0 %v6734_v39 }
 0x35b   :  { %1856 = vmatpush1.bf16.msra.mxu0 %v6732_v41 }
 0x35c   :  { %1857 = vmatprep.subr.bf16.mxu0 %v6737_v43 }
 0x35f   :  { %1858 = vmatpush1.bf16.msra.mxu0 %v6735_v44 }
 0x360   :  { %1933 = vmatprep.subr.bf16.mxu0 %v7605_v38 }
 0x3ad   :  { %v896_v45 = vpop.f32.mrb[12].mxu0 }
 0x3ae   :  { %v898_v46 = vpop.f32.mrb[13].mxu0 }
 0x3af   :  { %v900_v47 = vpop.f32.mrb[14].mxu0 }
 0x3b0   :  { %v948_v48 = vpack.c.bf16 %v900_v47, %v896_v45  ;;  %v902_v49 = vpop.f32.mrb[15].mxu0  ;;  %v6834_v45 = vld [vmem:[%s9126_s4 + $0x408] ss:$16 sps:$4 sm:$0xff]  }
 0x3b1   :  { %v949_v50 = vpack.c.bf16 %v902_v49, %v898_v46  ;;  %v6839_v46 = vld [vmem:[%s9126_s4 + $0x42c] ss:$16 sps:$4 sm:$0xff]  }
 0x3b3   :  { %1859 = vmatprep.mubr.bf16.mxu0 %v949_v50  ;;  %1912 = vmatprep.mubr.bf16.mxu1 %v949_v50  ;;  %v6842_v50 = vld [vmem:[%s9126_s4 + $0x44c] ss:$16 sps:$4 sm:$0xff]  }
 0x3b4   :  { %1860 = vmatmul.mubr.bf16.vlgmr.msra.gmra.mrb[20].mxu0 %v948_v48  ;;  %1913 = vmatmul.mubr.bf16.vlgmr.msra.gmra.mrb[16].mxu1 %v948_v48  ;;  %v6837_v48 = vld [vmem:[%s9126_s4 + $0x428] ss:$16 sps:$4 sm:$0xff]  }
 0x3b5   :  { %1934 = vmatpush1.bf16.msra.mxu0 %v7603_v35  ;;  %v939_v38 = vpop.f32.mrb[16].mxu0  ;;  %2409 = vmatpush1.bf16.msra.mxu1 %v6786_v51  ;;  %v6792_v35 = vld [vmem:[%s9126_s4 + $0x440] ss:$16 sps:$4 sm:$0xff]  }
 0x3b6   :  { %1976 = vmatprep.subr.bf16.mxu0 %v7616_v57  ;;  %v941_v54 = vpop.f32.mrb[17].mxu0  ;;  %2410 = vmatprep.subr.bf16.mxu1 %v6791_v52  ;;  %v6797_v57 = vld [vmem:[%s9126_s4 + $0x464] ss:$16 sps:$4 sm:$0xff]  }
 0x3b7   :  { %v943_v58 = vpop.f32.mrb[18].mxu0 }
 0x3b8   :  { %v950_v59 = vpack.c.bf16 %v943_v58, %v939_v38  ;;  %v945_v60 = vpop.f32.mrb[19].mxu0  ;;  %v6843_v58 = vld [vmem:[%s9126_s4 + $0x468] ss:$16 sps:$4 sm:$0xff]  }
 0x3b9   :  { %v951_v61 = vpack.c.bf16 %v945_v60, %v941_v54  ;;  %2411 = vmatpush1.bf16.msra.mxu1 %v6789_v53  ;;  %v6840_v54 = vld [vmem:[%s9126_s4 + $0x448] ss:$16 sps:$4 sm:$0xff]  }
 0x3ba   :  { %2412 = vmatprep.subr.bf16.mxu1 %v6794_v56  ;;  %v6845_v56 = vld [vmem:[%s9126_s4 + $0x46c] ss:$16 sps:$4 sm:$0xff]   ;;  %v6846_v60 = vld [vmem:[%s9126_s4 + $0x488] ss:$16 sps:$4 sm:$0xff]  }
 0x3bb   :  { %1869 = vmatprep.mubr.bf16.mxu0 %v951_v61  ;;  %1922 = vmatprep.mubr.bf16.mxu1 %v951_v61  ;;  %v6851_v61 = vld [vmem:[%s9126_s4 + $0x4ac] ss:$16 sps:$4 sm:$0xff]  }
 0x3bc   :  { %1870 = vmatmul.mubr.bf16.gmra.mrb[24].mxu0 %v950_v59  ;;  %1923 = vmatmul.mubr.bf16.gmra.mrb[20].mxu1 %v950_v59  ;;  %v6848_v59 = vld [vmem:[%s9126_s4 + $0x48c] ss:$16 sps:$4 sm:$0xff]  }
 0x3bd   :  { %1965 = vmatprep.mubr.bf16.mxu0 %v7228_v40  ;;  %2413 = vmatpush1.bf16.msra.mxu1 %v6792_v35  ;;  %v6849_v35 = vld [vmem:[%s9126_s4 + $0x4a8] ss:$16 sps:$4 sm:$0xff]  }
 0x3be   :  { %2414 = vmatprep.subr.bf16.mxu1 %v6797_v57  ;;  %v6854_v57 = vld [vmem:[%s9126_s4 + $0x4cc] ss:$16 sps:$4 sm:$0xff]  }
 0x3c1   :  { %2415 = vmatpush1.bf16.msra.mxu1 %v6795_v62  ;;  %v6852_v62 = vld [vmem:[%s9126_s4 + $0x4c8] ss:$16 sps:$4 sm:$0xff]  }
 0x3c2   :  { %2416 = vmatprep.subr.bf16.mxu1 %v6800_v63  ;;  %v6857_v63 = vld [vmem:[%s9126_s4 + $0x4ec] ss:$16 sps:$4 sm:$0xff]  }
 0x3c4   :  { %5661 = vmatmul.mubr.msk.bf16.vlgmr.msra.gmra.mrb[28].mxu0 %vm174_vm3, %v7354_v42 }
 0x3c5   :  { %1977 = vmatpush1.bf16.msra.mxu0 %v7613_v55  ;;  %2008 = vmatprep.mubr.bf16.mxu0 %v7228_v40  ;;  %v6809_v55 = vld [vmem:[%s9126_s4 + $0x4e4] ss:$16 sps:$4 sm:$0xff]  }
 0x3c6   :  { %2417 = vmatpush1.bf16.msra.mxu1 %v6798_v0  ;;  %v6855_v0 = vld [vmem:[%s9126_s4 + $0x4e8] ss:$16 sps:$4 sm:$0xff]  }
 0x3c7   :  { %2418 = vmatprep.subr.bf16.mxu1 %v6803_v1  ;;  %v6860_v1 = vld [vmem:[%s9126_s4 + $0x50c] ss:$16 sps:$4 sm:$0xff]  }
 0x3ca   :  { %2419 = vmatpush1.bf16.msra.mxu1 %v6801_v2  ;;  %v6858_v2 = vld [vmem:[%s9126_s4 + $0x508] ss:$16 sps:$4 sm:$0xff]  }
 0x3cb   :  { %2420 = vmatprep.subr.bf16.mxu1 %v6806_v3  ;;  %v6863_v3 = vld [vmem:[%s9126_s4 + $0x52c] ss:$16 sps:$4 sm:$0xff]  }
 0x3cc   :  { %5662 = vmatmul.mubr.msk.bf16.vlgmr.msra.gmra.mrb[32].mxu0 %vm174_vm3, %v7354_v42 }
 0x3cd   :  { %2657 = vmatprep.mubr.bf16.mxu0 %v7228_v40 }
 0x3ce   :  { %2421 = vmatpush1.bf16.msra.mxu1 %v6804_v4  ;;  %v6861_v4 = vld [vmem:[%s9126_s4 + $0x528] ss:$16 sps:$4 sm:$0xff]  }
 0x3cf   :  { %2422 = vmatprep.subr.bf16.mxu1 %v6809_v55  ;;  %v6866_v55 = vld [vmem:[%s9126_s4 + $0x54c] ss:$16 sps:$4 sm:$0xff]  }
 0x3d2   :  { %2423 = vmatpush1.bf16.msra.mxu1 %v6807_v5  ;;  %v6864_v5 = vld [vmem:[%s9126_s4 + $0x548] ss:$16 sps:$4 sm:$0xff]  }
 0x3d3   :  { %2424 = vmatprep.subr.bf16.mxu1 %v6812_v6  ;;  %v6869_v6 = vld [vmem:[%s9126_s4 + $0x56c] ss:$16 sps:$4 sm:$0xff]  }
 0x3d6   :  { %2425 = vmatpush1.bf16.msra.mxu1 %v6810_v7  ;;  %v6867_v7 = vld [vmem:[%s9126_s4 + $0x568] ss:$16 sps:$4 sm:$0xff]  }
 0x3d7   :  { %2426 = vmatprep.subr.bf16.mxu1 %v6815_v8  ;;  %v6872_v8 = vld [vmem:[%s9126_s4 + $0x58c] ss:$16 sps:$4 sm:$0xff]  }
 0x3da   :  { %2427 = vmatpush1.bf16.msra.mxu1 %v6813_v9  ;;  %v6870_v9 = vld [vmem:[%s9126_s4 + $0x588] ss:$16 sps:$4 sm:$0xff]  }
 0x3db   :  { %2428 = vmatprep.subr.bf16.mxu1 %v6818_v10  ;;  %v6875_v10 = vld [vmem:[%s9126_s4 + $0x5ac] ss:$16 sps:$4 sm:$0xff]  }
 0x3de   :  { %2429 = vmatpush1.bf16.msra.mxu1 %v6816_v11  ;;  %v6873_v11 = vld [vmem:[%s9126_s4 + $0x5a8] ss:$16 sps:$4 sm:$0xff]  }
 0x3df   :  { %2430 = vmatprep.subr.bf16.mxu1 %v6821_v13  ;;  %v6878_v13 = vld [vmem:[%s9126_s4 + $0x5cc] ss:$16 sps:$4 sm:$0xff]  }
 0x3e2   :  { %2431 = vmatpush1.bf16.msra.mxu1 %v6819_v15  ;;  %v6876_v15 = vld [vmem:[%s9126_s4 + $0x5c8] ss:$16 sps:$4 sm:$0xff]  }
 0x3e3   :  { %2432 = vmatprep.subr.bf16.mxu1 %v6824_v17  ;;  %v6881_v17 = vld [vmem:[%s9126_s4 + $0x5ec] ss:$16 sps:$4 sm:$0xff]  }
 0x3e6   :  { %2433 = vmatpush1.bf16.msra.mxu1 %v6822_v18  ;;  %v6879_v18 = vld [vmem:[%s9126_s4 + $0x5e8] ss:$16 sps:$4 sm:$0xff]  }
 0x3e7   :  { %2434 = vmatprep.subr.bf16.mxu1 %v6827_v19  ;;  %v5791_v19 = vld [vmem:[%s9125_s1 + $0x2] ss:$8 sm:$0xf] }
 0x3ea   :  { %2435 = vmatpush1.bf16.msra.mxu1 %v6825_v20  ;;  %v2536_v20 = vrot.slane %v5791_v19, %v7593_v14 }
 0x3eb   :  { %2436 = vmatprep.subr.bf16.mxu1 %v6830_v21 }
 0x3ee   :  { %2437 = vmatpush1.bf16.msra.mxu1 %v6828_v22  ;;  %v2540_v22 = vrot.slane %v5791_v19, %v7599_v16 }
 0x3ef   :  { %2438 = vmatprep.subr.bf16.mxu1 %v6833_v23 }
 0x3f2   :  { %2439 = vmatpush1.bf16.msra.mxu1 %v6831_v24 }
 0x3f3   :  { %2461 = vmatprep.subr.bf16.mxu1 %v6836_v25 }
 0x487   :  { %v8026_v26 = vpop.f32.mrb[20].mxu0 }
 0x488   :  { %v8028_v27 = vpop.f32.mrb[21].mxu0 }
 0x489   :  { %v8030_v28 = vpop.f32.mrb[22].mxu0 }
 0x48a   :  { %v8032_v29 = vpop.f32.mrb[23].mxu0 }
 0x48f   :  { %v8034_v30 = vpop.f32.mrb[24].mxu0 }
 0x490   :  { %v8036_v31 = vpop.f32.mrb[25].mxu0 }
 0x491   :  { %v8038_v32 = vpop.f32.mrb[26].mxu0 }
 0x492   :  { %v8040_v34 = vpop.f32.mrb[27].mxu0 }
 0x497   :  { %v1967_v36 = vpop.f32.mrb[28].mxu0 }
 0x498   :  { %v1969_v37 = vpop.f32.mrb[29].mxu0 }
 0x499   :  { %v1971_v39 = vpop.f32.mrb[30].mxu0 }
 0x49a   :  { %v8042_v41 = vpack.c.bf16 %v1971_v39, %v1967_v36  ;;  %v1973_v43 = vpop.f32.mrb[31].mxu0 }
 0x49b   :  { %v2020_v44 = vpack.c.bf16 %v1973_v43, %v1969_v37 }
 0x49d   :  { %2440 = vmatprep.mubr.bf16.mxu1 %v2020_v44 }
 0x49e   :  { %2441 = vmatmul.mubr.bf16.vlgmr.msra.gmra.mrb[24].mxu1 %v8042_v41 }
 0x49f   :  { %2462 = vmatpush1.bf16.msra.mxu1 %v6834_v45  ;;  %v2010_v47 = vpop.f32.mrb[32].mxu0 }
 0x4a0   :  { %v2012_v49 = vpop.f32.mrb[33].mxu0  ;;  %2463 = vmatprep.subr.bf16.mxu1 %v6839_v46 }
 0x4a1   :  { %v2014_v51 = vpop.f32.mrb[34].mxu0 }
 0x4a2   :  { %v8057_v52 = vpack.c.bf16 %v2014_v51, %v2010_v47  ;;  %v2016_v38 = vpop.f32.mrb[35].mxu0 }
 0x4a3   :  { %v2022_v53 = vpack.c.bf16 %v2016_v38, %v2012_v49  ;;  %2464 = vmatpush1.bf16.msra.mxu1 %v6837_v48 }
 0x4a4   :  { %2465 = vmatprep.subr.bf16.mxu1 %v6842_v50 }
 0x4a5   :  { %2450 = vmatprep.mubr.bf16.mxu1 %v2022_v53 }
 0x4a6   :  { %2451 = vmatmul.mubr.bf16.gmra.mrb[28].mxu1 %v8057_v52 }
 0x4a7   :  { %2466 = vmatpush1.bf16.msra.mxu1 %v6840_v54  ;;  %2493 = vmatprep.mubr.bf16.mxu1 %v2020_v44 }
 0x4a8   :  { %2467 = vmatprep.subr.bf16.mxu1 %v6845_v56 }
 0x4ab   :  { %2468 = vmatpush1.bf16.msra.mxu1 %v6843_v58 }
 0x4ac   :  { %2469 = vmatprep.subr.bf16.mxu1 %v6848_v59 }
 0x4af   :  { %2470 = vmatpush1.bf16.msra.mxu1 %v6846_v60 }
 0x4b0   :  { %2471 = vmatprep.subr.bf16.mxu1 %v6851_v61 }
 0x4b3   :  { %2472 = vmatpush1.bf16.msra.mxu1 %v6849_v35 }
 0x4b4   :  { %2473 = vmatprep.subr.bf16.mxu1 %v6854_v57 }
 0x4b7   :  { %2474 = vmatpush1.bf16.msra.mxu1 %v6852_v62 }
 0x4b8   :  { %2475 = vmatprep.subr.bf16.mxu1 %v6857_v63 }
 0x4bb   :  { %2476 = vmatpush1.bf16.msra.mxu1 %v6855_v0 }
 0x4bc   :  { %2477 = vmatprep.subr.bf16.mxu1 %v6860_v1 }
 0x4bf   :  { %2478 = vmatpush1.bf16.msra.mxu1 %v6858_v2 }
 0x4c0   :  { %2479 = vmatprep.subr.bf16.mxu1 %v6863_v3 }
 0x4c3   :  { %2480 = vmatpush1.bf16.msra.mxu1 %v6861_v4 }
 0x4c4   :  { %2481 = vmatprep.subr.bf16.mxu1 %v6866_v55 }
 0x4c7   :  { %2482 = vmatpush1.bf16.msra.mxu1 %v6864_v5  ;;  %v2543_v5 = vsub.s32 2, %v7310_v12 }
 0x4c8   :  { %2483 = vmatprep.subr.bf16.mxu1 %v6869_v6  ;;  %v2547_v6 = vsub.s32 3, %v7310_v12 }
 0x4cb   :  { %2484 = vmatpush1.bf16.msra.mxu1 %v6867_v7  ;;  %v2544_v7 = vrot.slane %v5791_v19, %v2543_v5  ;;  %v6908_v5 = vld [vmem:[%s9127_s5 + $0x284] ss:$8 sps:$4 sm:$0xff]  }
 0x4cc   :  { %2485 = vmatprep.subr.bf16.mxu1 %v6872_v8  ;;  %v2548_v8 = vrot.slane %v5791_v19, %v2547_v6  ;;  %v6906_v6 = vld [vmem:[%s9127_s5 + $0x280] ss:$8 sps:$4 sm:$0xff]  }
 0x4cf   :  { %2486 = vmatpush1.bf16.msra.mxu1 %v6870_v9 }
 0x4d0   :  { %2487 = vmatprep.subr.bf16.mxu1 %v6875_v10 }
 0x4d3   :  { %2488 = vmatpush1.bf16.msra.mxu1 %v6873_v11 }
 0x4d4   :  { %2489 = vmatprep.subr.bf16.mxu1 %v6878_v13 }
 0x4d7   :  { %2490 = vmatpush1.bf16.msra.mxu1 %v6876_v15 }
 0x4d8   :  { %2491 = vmatprep.subr.bf16.mxu1 %v6881_v17 }
 0x4db   :  { %2492 = vmatpush1.bf16.msra.mxu1 %v6879_v18 }
 0x4de   :  { %2494 = vmatmul.mubr.bf16.vlgmr.msra.gmra.mrb[16].mxu1 %v8042_v41 }
 0x4df   :  { %2503 = vmatprep.mubr.bf16.mxu1 %v2022_v53 }
 0x4e6   :  { %2504 = vmatmul.mubr.bf16.gmra.mrb[20].mxu1 %v8057_v52 }
 0x4e7   :  { %2786 = vmatprep.mubr.bf16.mxu1 %v7228_v40 }
 0x571   :  { %v2442_v21 = vpop.f32.mrb[24].mxu1 }
 0x572   :  { %v6421_v23 = vadd.f32 %v2442_v21, %v8026_v26  ;;  %v2444_v24 = vpop.f32.mrb[25].mxu1 }
 0x573   :  { %v6422_v25 = vadd.f32 %v2444_v24, %v8028_v27  ;;  %v2446_v36 = vpop.f32.mrb[26].mxu1 }
 0x574   :  { %v2553_v37 = vadd.f32 %v6421_v23, %v2536_v20  ;;  %v6423_v39 = vadd.f32 %v2446_v36, %v8030_v28  ;;  %v2448_v41 = vpop.f32.mrb[27].mxu1 }
 0x575   :  { %v2554_v43 = vadd.f32 %v6422_v25, %v2540_v22  ;;  %v6424_v44 = vadd.f32 %v2448_v41, %v8032_v29 }
 0x576   :  { %vm2569_vm14 = vcmp.gt.f32.partialorder %v2553_v37, 0.0  ;;  %v2585_v45 = vmul.f32 0.2, %v2553_v37  ;;  %v2557_v46 = vadd.f32 %v6423_v39, %v2536_v20 }
 0x577   :  { %vm2570_vm15 = vcmp.gt.f32.partialorder %v2554_v43, 0.0  ;;  %v2586_v47 = vmul.f32 0.2, %v2554_v43  ;;  %v2558_v48 = vadd.f32 %v6424_v44, %v2540_v22 }
 0x578   :  { %vm2573_vm0 = vcmp.gt.f32.partialorder %v2557_v46, 0.0  ;;  %v2589_v49 = vmul.f32 0.2, %v2557_v46  ;;  %v2601_v27 = vsel %vm2569_vm14, %v2553_v37, %v2585_v45 }
 0x579   :  { %vm2574_vm1 = vcmp.gt.f32.partialorder %v2558_v48, 0.0  ;;  %v2590_v26 = vmul.f32 0.2, %v2558_v48  ;;  %v2452_v50 = vpop.f32.mrb[28].mxu1  ;;  %v2602_v29 = vsel %vm2570_vm15, %v2554_v43, %v2586_v47 }
 0x57a   :  { %v2605_v51 = vsel %vm2573_vm0, %v2557_v46, %v2589_v49  ;;  %v6425_v52 = vadd.f32 %v2452_v50, %v8034_v30  ;;  %v2454_v28 = vpop.f32.mrb[29].mxu1 }
 0x57b   :  { %v6426_v38 = vadd.f32 %v2454_v28, %v8036_v31  ;;  %v2456_v53 = vpop.f32.mrb[30].mxu1  ;;  %v2606_v54 = vsel %vm2574_vm1, %v2558_v48, %v2590_v26  ;;  %v8155_v56 = vpack.c.bf16 %v2605_v51, %v2601_v27  ;;  %v6884_v51 = vld [vmem:[%s9127_s5 + $0x204] ss:$8 sps:$4 sm:$0xff]  }
 0x57c   :  { %v2561_v58 = vadd.f32 %v6425_v52, %v2536_v20  ;;  %v6427_v59 = vadd.f32 %v2456_v53, %v8038_v32  ;;  %v2458_v60 = vpop.f32.mrb[31].mxu1  ;;  %v8158_v61 = vpack.c.bf16 %v2606_v54, %v2602_v29 }
 0x57d   :  { %v2562_v35 = vadd.f32 %v6426_v38, %v2540_v22  ;;  %v6428_v57 = vadd.f32 %v2458_v60, %v8040_v34  ;;  %v6887_v60 = vld [vmem:[%s9127_s5 + $0x214] ss:$8 sps:$4 sm:$0xff]  }
 0x57e   :  { %vm2577_vm2 = vcmp.gt.f32.partialorder %v2561_v58, 0.0  ;;  %v2593_v62 = vmul.f32 0.2, %v2561_v58  ;;  %v2565_v30 = vadd.f32 %v6427_v59, %v2536_v20  ;;  %2625 = vmatprep.subr.bf16.mxu0 %v8158_v61  ;;  %v6882_v59 = vld [vmem:[%s9127_s5 + $0x200] ss:$8 sps:$4 sm:$0xff]  }
 0x57f   :  { %vm2578_vm4 = vcmp.gt.f32.partialorder %v2562_v35, 0.0  ;;  %v2594_v31 = vmul.f32 0.2, %v2562_v35  ;;  %v2566_v63 = vadd.f32 %v6428_v57, %v2540_v22  ;;  %2626 = vmatpush1.bf16.msra.mxu0 %v8155_v56  ;;  %v6890_v57 = vld [vmem:[%s9127_s5 + $0x224] ss:$8 sps:$4 sm:$0xff]  }
 0x580   :  { %vm2581_vm5 = vcmp.gt.f32.partialorder %v2565_v30, 0.0  ;;  %v2597_v0 = vmul.f32 0.2, %v2565_v30  ;;  %v2609_v1 = vsel %vm2577_vm2, %v2561_v58, %v2593_v62  ;;  %v6893_v62 = vld [vmem:[%s9127_s5 + $0x234] ss:$8 sps:$4 sm:$0xff]  }
 0x581   :  { %vm2582_vm6 = vcmp.gt.f32.partialorder %v2566_v63, 0.0  ;;  %v2598_v32 = vmul.f32 0.2, %v2566_v63  ;;  %v2610_v34 = vsel %vm2578_vm4, %v2562_v35, %v2594_v31  ;;  %v6885_v35 = vld [vmem:[%s9127_s5 + $0x210] ss:$8 sps:$4 sm:$0xff]  }
 0x582   :  { %v2613_v2 = vsel %vm2581_vm5, %v2565_v30, %v2597_v0  ;;  %5792 = vmatmul.mubr.msk.bf16.vlgmr.msra.gmra.mrb[36].mxu0 %vm174_vm3, %v7325_v33  ;;  %v6891_v30 = vld [vmem:[%s9127_s5 + $0x230] ss:$8 sps:$4 sm:$0xff]   ;;  %v6896_v31 = vld [vmem:[%s9127_s5 + $0x244] ss:$8 sps:$4 sm:$0xff]   ;;  %v6899_v0 = vld [vmem:[%s9127_s5 + $0x254] ss:$8 sps:$4 sm:$0xff]  }
 0x583   :  { %v2614_v3 = vsel %vm2582_vm6, %v2566_v63, %v2598_v32  ;;  %2700 = vmatprep.mubr.bf16.mxu0 %v7228_v40  ;;  %v8166_v4 = vpack.c.bf16 %v2613_v2, %v2609_v1  ;;  %v6894_v63 = vld [vmem:[%s9127_s5 + $0x240] ss:$8 sps:$4 sm:$0xff]   ;;  %v6897_v32 = vld [vmem:[%s9127_s5 + $0x250] ss:$8 sps:$4 sm:$0xff]   ;;  %v6902_v1 = vld [vmem:[%s9127_s5 + $0x264] ss:$8 sps:$4 sm:$0xff]  }
 0x584   :  { %v8168_v55 = vpack.c.bf16 %v2614_v3, %v2610_v34  ;;  %v6900_v2 = vld [vmem:[%s9127_s5 + $0x260] ss:$8 sps:$4 sm:$0xff]   ;;  %v6905_v34 = vld [vmem:[%s9127_s5 + $0x274] ss:$8 sps:$4 sm:$0xff]   ;;  %v6903_v3 = vld [vmem:[%s9127_s5 + $0x270] ss:$8 sps:$4 sm:$0xff]  }
 0x5b1   :  { %v2495_v9 = vpop.f32.mrb[16].mxu1 }
 0x5b2   :  { %v2555_v10 = vadd.f32 %v2544_v7, %v2495_v9  ;;  %v2497_v11 = vpop.f32.mrb[17].mxu1  ;;  %v6914_v9 = vld [vmem:[%s9127_s5 + $0x2a4] ss:$8 sps:$4 sm:$0xff]  }
 0x5b3   :  { %v2556_v13 = vadd.f32 %v2548_v8, %v2497_v11  ;;  %v2499_v15 = vpop.f32.mrb[18].mxu1  ;;  %v6917_v11 = vld [vmem:[%s9127_s5 + $0x2b4] ss:$8 sps:$4 sm:$0xff]  }
 0x5b4   :  { %v2587_v17 = vmul.f32 0.2, %v2555_v10  ;;  %v2559_v18 = vadd.f32 %v2544_v7, %v2499_v15  ;;  %v2501_v20 = vpop.f32.mrb[19].mxu1  ;;  %vm2571_vm7 = vcmp.gt.f32.partialorder %v2555_v10, 0.0  ;;  %v6920_v15 = vld [vmem:[%s9127_s5 + $0x2c4] ss:$8 sps:$4 sm:$0xff]  }
 0x5b5   :  { %v2588_v21 = vmul.f32 0.2, %v2556_v13  ;;  %v2560_v22 = vadd.f32 %v2548_v8, %v2501_v20  ;;  %vm2572_vm8 = vcmp.gt.f32.partialorder %v2556_v13, 0.0  ;;  %v6921_v20 = vld [vmem:[%s9127_s5 + $0x2d0] ss:$8 sps:$4 sm:$0xff]  }
 0x5b6   :  { %vm2575_vm9 = vcmp.gt.f32.partialorder %v2559_v18, 0.0  ;;  %v2591_v23 = vmul.f32 0.2, %v2559_v18  ;;  %v2603_v25 = vsel %vm2571_vm7, %v2555_v10, %v2587_v17  ;;  %v6912_v10 = vld [vmem:[%s9127_s5 + $0x2a0] ss:$8 sps:$4 sm:$0xff]  }
 0x5b7   :  { %vm2576_vm10 = vcmp.gt.f32.partialorder %v2560_v22, 0.0  ;;  %v2592_v24 = vmul.f32 0.2, %v2560_v22  ;;  %v2604_v37 = vsel %vm2572_vm8, %v2556_v13, %v2588_v21  ;;  %v6915_v13 = vld [vmem:[%s9127_s5 + $0x2b0] ss:$8 sps:$4 sm:$0xff]  }
 0x5b8   :  { %v2607_v12 = vsel %vm2575_vm9, %v2559_v18, %v2591_v23  ;;  %v6918_v17 = vld [vmem:[%s9127_s5 + $0x2c0] ss:$8 sps:$4 sm:$0xff]   ;;  %v6923_v18 = vld [vmem:[%s9127_s5 + $0x2d4] ss:$8 sps:$4 sm:$0xff]   ;;  %v6926_v21 = vld [vmem:[%s9127_s5 + $0x2e4] ss:$8 sps:$4 sm:$0xff]  }
 0x5b9   :  { %v8172_v36 = vpack.c.bf16 %v2607_v12, %v2603_v25  ;;  %v2505_v19 = vpop.f32.mrb[20].mxu1  ;;  %v2608_v39 = vsel %vm2576_vm10, %v2560_v22, %v2592_v24  ;;  %v6924_v22 = vld [vmem:[%s9127_s5 + $0x2e0] ss:$8 sps:$4 sm:$0xff]   ;;  %v6929_v23 = vld [vmem:[%s9127_s5 + $0x2f4] ss:$8 sps:$4 sm:$0xff]  }
 0x5ba   :  { %v2563_v41 = vadd.f32 %v2544_v7, %v2505_v19  ;;  %v2507_v43 = vpop.f32.mrb[21].mxu1  ;;  %v8174_v44 = vpack.c.bf16 %v2608_v39, %v2604_v37  ;;  %v6927_v24 = vld [vmem:[%s9127_s5 + $0x2f0] ss:$8 sps:$4 sm:$0xff]   ;;  %v6932_v25 = vld [vmem:[%s9127_s5 + $0x304] ss:$8 sps:$4 sm:$0xff]  }
 0x5bb   :  { %v2564_v45 = vadd.f32 %v2548_v8, %v2507_v43  ;;  %v2509_v46 = vpop.f32.mrb[22].mxu1  ;;  %v6930_v12 = vld [vmem:[%s9127_s5 + $0x300] ss:$8 sps:$4 sm:$0xff]   ;;  %v6935_v19 = vld [vmem:[%s9127_s5 + $0x314] ss:$8 sps:$4 sm:$0xff]  }
 0x5bc   :  { %v2595_v47 = vmul.f32 0.2, %v2563_v41  ;;  %v2567_v48 = vadd.f32 %v2544_v7, %v2509_v46  ;;  %v2511_v49 = vpop.f32.mrb[23].mxu1  ;;  %2668 = vmatprep.subr.bf16.mxu0 %v8174_v44  ;;  %vm2579_vm11 = vcmp.gt.f32.partialorder %v2563_v41, 0.0  ;;  %v6911_v7 = vld [vmem:[%s9127_s5 + $0x294] ss:$8 sps:$4 sm:$0xff]  }
 0x5bd   :  { %v2596_v26 = vmul.f32 0.2, %v2564_v45  ;;  %v2568_v50 = vadd.f32 %v2548_v8, %v2511_v49  ;;  %2669 = vmatpush1.bf16.msra.mxu0 %v8172_v36  ;;  %vm2580_vm12 = vcmp.gt.f32.partialorder %v2564_v45, 0.0  ;;  %v6909_v8 = vld [vmem:[%s9127_s5 + $0x290] ss:$8 sps:$4 sm:$0xff]  }
 0x5be   :  { %vm2583_vm13 = vcmp.gt.f32.partialorder %v2567_v48, 0.0  ;;  %v2599_v27 = vmul.f32 0.2, %v2567_v48  ;;  %2711 = vmatprep.subr.bf16.mxu0 %v8168_v55  ;;  %v2611_v28 = vsel %vm2579_vm11, %v2563_v41, %v2595_v47  ;;  %v6933_v37 = vld [vmem:[%s9127_s5 + $0x310] ss:$8 sps:$4 sm:$0xff]  }
 0x5bf   :  { %vm2584_vm14 = vcmp.gt.f32.partialorder %v2568_v50, 0.0  ;;  %v2600_v52 = vmul.f32 0.2, %v2568_v50  ;;  %v2612_v29 = vsel %vm2580_vm12, %v2564_v45, %v2596_v26  ;;  %v6938_v39 = vld [vmem:[%s9127_s5 + $0x324] ss:$8 sps:$4 sm:$0xff]  }
 0x5c0   :  { %v2615_v38 = vsel %vm2583_vm13, %v2567_v48, %v2599_v27  ;;  %5793 = vmatmul.mubr.msk.bf16.vlgmr.msra.gmra.mrb[40].mxu0 %vm174_vm3, %v7325_v33  ;;  %v6936_v41 = vld [vmem:[%s9127_s5 + $0x320] ss:$8 sps:$4 sm:$0xff]   ;;  %v6944_v43 = vld [vmem:[%s9127_s5 + $0x344] ss:$8 sps:$4 sm:$0xff]   ;;  %v6953_v48 = vld [vmem:[%s9127_s5 + $0x374] ss:$8 sps:$4 sm:$0xff]  }
 0x5c1   :  { %v8184_v53 = vpack.c.bf16 %v2615_v38, %v2611_v28  ;;  %2712 = vmatpush1.bf16.msra.mxu0 %v8166_v4  ;;  %v2616_v54 = vsel %vm2584_vm14, %v2568_v50, %v2600_v52  ;;  %2743 = vmatprep.mubr.bf16.mxu0 %v7228_v40  ;;  %v6942_v45 = vld [vmem:[%s9127_s5 + $0x340] ss:$8 sps:$4 sm:$0xff]   ;;  %v6950_v46 = vld [vmem:[%s9127_s5 + $0x364] ss:$8 sps:$4 sm:$0xff]   ;;  %v6951_v49 = vld [vmem:[%s9127_s5 + $0x370] ss:$8 sps:$4 sm:$0xff]  }
 0x5c2   :  { %v8188_v58 = vpack.c.bf16 %v2616_v54, %v2612_v29  ;;  %3254 = vmatprep.subr.bf16.mxu0 %v6884_v51  ;;  %v6948_v47 = vld [vmem:[%s9127_s5 + $0x360] ss:$8 sps:$4 sm:$0xff]   ;;  %v6956_v26 = vld [vmem:[%s9127_s5 + $0x384] ss:$8 sps:$4 sm:$0xff]   ;;  %v6959_v27 = vld [vmem:[%s9127_s5 + $0x394] ss:$8 sps:$4 sm:$0xff]  }
 0x5c3   :  { %v6954_v50 = vld [vmem:[%s9127_s5 + $0x380] ss:$8 sps:$4 sm:$0xff]   ;;  %v6957_v51 = vld [vmem:[%s9127_s5 + $0x390] ss:$8 sps:$4 sm:$0xff]   ;;  %v6962_v52 = vld [vmem:[%s9127_s5 + $0x3a4] ss:$8 sps:$4 sm:$0xff]  }
 0x5c4   :  { %2754 = vmatprep.subr.bf16.mxu1 %v8188_v58  ;;  %v6960_v28 = vld [vmem:[%s9127_s5 + $0x3a0] ss:$8 sps:$4 sm:$0xff]   ;;  %v6965_v38 = vld [vmem:[%s9127_s5 + $0x3b4] ss:$8 sps:$4 sm:$0xff]   ;;  %v6963_v29 = vld [vmem:[%s9127_s5 + $0x3b0] ss:$8 sps:$4 sm:$0xff]  }
 0x5c5   :  { %2755 = vmatpush1.bf16.msra.mxu1 %v8184_v53  ;;  %v6968_v54 = vld [vmem:[%s9127_s5 + $0x3c4] ss:$8 sps:$4 sm:$0xff]  }
 0x5c6   :  { %3786 = vmatprep.subr.bf16.mxu1 %v8158_v61 }
 0x5c8   :  { %5794 = vmatmul.mubr.msk.bf16.vlgmr.msra.gmra.mrb[44].mxu0 %vm174_vm3, %v7325_v33  ;;  %5795 = vmatmul.mubr.msk.bf16.vlgmr.msra.gmra.mrb[32].mxu1 %vm174_vm3, %v7325_v33 }
 0x5c9   :  { %3255 = vmatpush1.bf16.msra.mxu0 %v6882_v59  ;;  %3286 = vmatprep.mubr.bf16.mxu0 %v8158_v61  ;;  %v6888_v61 = vld [vmem:[%s9127_s5 + $0x220] ss:$8 sps:$4 sm:$0xff]  }
 0x5ca   :  { %3787 = vmatpush1.bf16.msra.mxu1 %v8155_v56  ;;  %3256 = vmatprep.subr.bf16.mxu0 %v6887_v60  ;;  %v6966_v59 = vld [vmem:[%s9127_s5 + $0x3c0] ss:$8 sps:$4 sm:$0xff]   ;;  %v6971_v60 = vld [vmem:[%s9127_s5 + $0x3d4] ss:$8 sps:$4 sm:$0xff]  }
 0x5cb   :  { %3829 = vmatprep.subr.bf16.mxu1 %v8174_v44  ;;  %3818 = vmatprep.mubr.bf16.mxu1 %v7228_v40 }
 0x5cd   :  { %3257 = vmatpush1.bf16.msra.mxu0 %v6885_v35  ;;  %v6969_v35 = vld [vmem:[%s9127_s5 + $0x3d0] ss:$8 sps:$4 sm:$0xff]  }
 0x5ce   :  { %3258 = vmatprep.subr.bf16.mxu0 %v6890_v57  ;;  %v6974_v57 = vld [vmem:[%s9127_s5 + $0x3e4] ss:$8 sps:$4 sm:$0xff]  }
 0x5d0   :  { %5988 = vmatmul.mubr.msk.bf16.vlgmr.msra.gmra.mrb[36].mxu1 %vm174_vm3, %v7354_v42 }
 0x5d1   :  { %3259 = vmatpush1.bf16.msra.mxu0 %v6888_v61  ;;  %3830 = vmatpush1.bf16.msra.mxu1 %v8172_v36  ;;  %v6972_v61 = vld [vmem:[%s9127_s5 + $0x3e0] ss:$8 sps:$4 sm:$0xff]  }
 0x5d2   :  { %3872 = vmatprep.subr.bf16.mxu1 %v8168_v55  ;;  %3260 = vmatprep.subr.bf16.mxu0 %v6893_v62  ;;  %v6977_v62 = vld [vmem:[%s9127_s5 + $0x3f4] ss:$8 sps:$4 sm:$0xff]  }
 0x5d3   :  { %3861 = vmatprep.mubr.bf16.mxu1 %v7228_v40 }
 0x5d5   :  { %3261 = vmatpush1.bf16.msra.mxu0 %v6891_v30  ;;  %v6975_v30 = vld [vmem:[%s9127_s5 + $0x3f0] ss:$8 sps:$4 sm:$0xff]  }
 0x5d6   :  { %3262 = vmatprep.subr.bf16.mxu0 %v6896_v31  ;;  %v6980_v31 = vld [vmem:[%s9127_s5 + $0x4] ss:$8 sps:$4 sm:$0xff]  }
 0x5d8   :  { %5989 = vmatmul.mubr.msk.bf16.vlgmr.msra.gmra.mrb[40].mxu1 %vm174_vm3, %v7354_v42 }
 0x5d9   :  { %3263 = vmatpush1.bf16.msra.mxu0 %v6894_v63  ;;  %3873 = vmatpush1.bf16.msra.mxu1 %v8166_v4  ;;  %v6978_v63 = vld [vmem:[%s9127_s5] ss:$8 sps:$4 sm:$0xff]  }
 0x5da   :  { %3915 = vmatprep.subr.bf16.mxu1 %v8188_v58  ;;  %3264 = vmatprep.subr.bf16.mxu0 %v6899_v0  ;;  %v6983_v0 = vld [vmem:[%s9127_s5 + $0x14] ss:$8 sps:$4 sm:$0xff]  }
 0x5db   :  { %3904 = vmatprep.mubr.bf16.mxu1 %v7228_v40 }
 0x5dd   :  { %3265 = vmatpush1.bf16.msra.mxu0 %v6897_v32  ;;  %v6981_v32 = vld [vmem:[%s9127_s5 + $0x10] ss:$8 sps:$4 sm:$0xff]  }
 0x5de   :  { %3266 = vmatprep.subr.bf16.mxu0 %v6902_v1  ;;  %v6986_v1 = vld [vmem:[%s9127_s5 + $0x24] ss:$8 sps:$4 sm:$0xff]  }
 0x5e0   :  { %5990 = vmatmul.mubr.msk.bf16.vlgmr.msra.gmra.mrb[44].mxu1 %vm174_vm3, %v7354_v42 }
 0x5e1   :  { %3267 = vmatpush1.bf16.msra.mxu0 %v6900_v2  ;;  %3916 = vmatpush1.bf16.msra.mxu1 %v8184_v53  ;;  %v6984_v2 = vld [vmem:[%s9127_s5 + $0x20] ss:$8 sps:$4 sm:$0xff]  }
 0x5e2   :  { %3268 = vmatprep.subr.bf16.mxu0 %v6905_v34  ;;  %3947 = vmatprep.mubr.bf16.mxu1 %v7228_v40  ;;  %v6992_v34 = vld [vmem:[%s9127_s5 + $0x44] ss:$8 sps:$4 sm:$0xff]  }
 0x5e5   :  { %3269 = vmatpush1.bf16.msra.mxu0 %v6903_v3  ;;  %v6990_v3 = vld [vmem:[%s9127_s5 + $0x40] ss:$8 sps:$4 sm:$0xff]  }
 0x5e6   :  { %3270 = vmatprep.subr.bf16.mxu0 %v6908_v5 }
 0x5e8   :  { %5991 = vmatmul.mubr.msk.bf16.vlgmr.msra.gmra.mrb[48].mxu1 %vm174_vm3, %v7354_v42 }
 0x5e9   :  { %3271 = vmatpush1.bf16.msra.mxu0 %v6906_v6  ;;  %4546 = vmatprep.mubr.bf16.mxu1 %v7228_v40 }
 0x5ea   :  { %3272 = vmatprep.subr.bf16.mxu0 %v6911_v7 }
 0x5ed   :  { %3273 = vmatpush1.bf16.msra.mxu0 %v6909_v8 }
 0x5ee   :  { %3274 = vmatprep.subr.bf16.mxu0 %v6914_v9 }
 0x5f1   :  { %3275 = vmatpush1.bf16.msra.mxu0 %v6912_v10  ;;  %v6993_v10 = vld [vmem:[%s9127_s5 + $0x50] ss:$8 sps:$4 sm:$0xff]  }
 0x5f2   :  { %3276 = vmatprep.subr.bf16.mxu0 %v6917_v11 }
 0x5f5   :  { %3277 = vmatpush1.bf16.msra.mxu0 %v6915_v13  ;;  %v6998_v13 = vld [vmem:[%s9127_s5 + $0x64] ss:$8 sps:$4 sm:$0xff]  }
 0x5f6   :  { %3278 = vmatprep.subr.bf16.mxu0 %v6920_v15  ;;  %v6996_v15 = vld [vmem:[%s9127_s5 + $0x60] ss:$8 sps:$4 sm:$0xff]  }
 0x5f9   :  { %3279 = vmatpush1.bf16.msra.mxu0 %v6918_v17  ;;  %v7001_v17 = vld [vmem:[%s9127_s5 + $0x74] ss:$8 sps:$4 sm:$0xff]  }
 0x5fa   :  { %3280 = vmatprep.subr.bf16.mxu0 %v6923_v18  ;;  %v6999_v18 = vld [vmem:[%s9127_s5 + $0x70] ss:$8 sps:$4 sm:$0xff]  }
 0x5fd   :  { %3281 = vmatpush1.bf16.msra.mxu0 %v6921_v20  ;;  %v7004_v20 = vld [vmem:[%s9127_s5 + $0x84] ss:$8 sps:$4 sm:$0xff]  }
 0x5fe   :  { %3282 = vmatprep.subr.bf16.mxu0 %v6926_v21  ;;  %v7002_v21 = vld [vmem:[%s9127_s5 + $0x80] ss:$8 sps:$4 sm:$0xff]  }
 0x601   :  { %3283 = vmatpush1.bf16.msra.mxu0 %v6924_v22  ;;  %v7007_v22 = vld [vmem:[%s9127_s5 + $0x94] ss:$8 sps:$4 sm:$0xff]  }
 0x602   :  { %3284 = vmatprep.subr.bf16.mxu0 %v6929_v23  ;;  %v7005_v23 = vld [vmem:[%s9127_s5 + $0x90] ss:$8 sps:$4 sm:$0xff]  }
 0x605   :  { %3285 = vmatpush1.bf16.msra.mxu0 %v6927_v24  ;;  %v7010_v24 = vld [vmem:[%s9127_s5 + $0xa4] ss:$8 sps:$4 sm:$0xff]  }
 0x606   :  { %3307 = vmatprep.subr.bf16.mxu0 %v6932_v25  ;;  %v7008_v25 = vld [vmem:[%s9127_s5 + $0xa0] ss:$8 sps:$4 sm:$0xff]  }
 0x608   :  { %3287 = vmatmul.mubr.bf16.vlgmr.msra.gmra.mrb[48].mxu0 %v8155_v56  ;;  %v6941_v56 = vld [vmem:[%s9127_s5 + $0x334] ss:$8 sps:$4 sm:$0xff]  }
 0x609   :  { %3296 = vmatprep.mubr.bf16.mxu0 %v8168_v55  ;;  %3308 = vmatpush1.bf16.msra.mxu0 %v6930_v12  ;;  %v6939_v55 = vld [vmem:[%s9127_s5 + $0x330] ss:$8 sps:$4 sm:$0xff]   ;;  %v7013_v12 = vld [vmem:[%s9127_s5 + $0xb4] ss:$8 sps:$4 sm:$0xff]  }
 0x60a   :  { %3309 = vmatprep.subr.bf16.mxu0 %v6935_v19  ;;  %v7011_v19 = vld [vmem:[%s9127_s5 + $0xb0] ss:$8 sps:$4 sm:$0xff]  }
 0x60d   :  { %3310 = vmatpush1.bf16.msra.mxu0 %v6933_v37  ;;  %v7016_v37 = vld [vmem:[%s9127_s5 + $0xc4] ss:$8 sps:$4 sm:$0xff]  }
 0x60e   :  { %3311 = vmatprep.subr.bf16.mxu0 %v6938_v39  ;;  %v7014_v39 = vld [vmem:[%s9127_s5 + $0xc0] ss:$8 sps:$4 sm:$0xff]  }
 0x610   :  { %3297 = vmatmul.mubr.bf16.gmra.mrb[52].mxu0 %v8166_v4  ;;  %v6947_v4 = vld [vmem:[%s9127_s5 + $0x354] ss:$8 sps:$4 sm:$0xff]  }
 0x611   :  { %3312 = vmatpush1.bf16.msra.mxu0 %v6936_v41  ;;  %3339 = vmatprep.mubr.bf16.mxu0 %v8174_v44  ;;  %v6945_v44 = vld [vmem:[%s9127_s5 + $0x350] ss:$8 sps:$4 sm:$0xff]   ;;  %v7019_v41 = vld [vmem:[%s9127_s5 + $0xd4] ss:$8 sps:$4 sm:$0xff]  }
 0x612   :  { %3313 = vmatprep.subr.bf16.mxu0 %v6941_v56  ;;  %v7017_v56 = vld [vmem:[%s9127_s5 + $0xd0] ss:$8 sps:$4 sm:$0xff]  }
 0x615   :  { %3314 = vmatpush1.bf16.msra.mxu0 %v6939_v55  ;;  %v7022_v55 = vld [vmem:[%s9127_s5 + $0xe4] ss:$8 sps:$4 sm:$0xff]  }
 0x616   :  { %3315 = vmatprep.subr.bf16.mxu0 %v6944_v43  ;;  %v7020_v43 = vld [vmem:[%s9127_s5 + $0xe0] ss:$8 sps:$4 sm:$0xff]  }
 0x619   :  { %3316 = vmatpush1.bf16.msra.mxu0 %v6942_v45  ;;  %v7025_v45 = vld [vmem:[%s9127_s5 + $0xf4] ss:$8 sps:$4 sm:$0xff]  }
 0x61a   :  { %3317 = vmatprep.subr.bf16.mxu0 %v6947_v4  ;;  %v7023_v4 = vld [vmem:[%s9127_s5 + $0xf0] ss:$8 sps:$4 sm:$0xff]  }
 0x61d   :  { %3318 = vmatpush1.bf16.msra.mxu0 %v6945_v44  ;;  %v7028_v44 = vld [vmem:[%s9127_s5 + $0x104] ss:$8 sps:$4 sm:$0xff]  }
 0x61e   :  { %3319 = vmatprep.subr.bf16.mxu0 %v6950_v46  ;;  %v7026_v46 = vld [vmem:[%s9127_s5 + $0x100] ss:$8 sps:$4 sm:$0xff]  }
 0x621   :  { %3320 = vmatpush1.bf16.msra.mxu0 %v6948_v47  ;;  %v7031_v47 = vld [vmem:[%s9127_s5 + $0x114] ss:$8 sps:$4 sm:$0xff]  }
 0x622   :  { %3321 = vmatprep.subr.bf16.mxu0 %v6953_v48  ;;  %v7029_v48 = vld [vmem:[%s9127_s5 + $0x110] ss:$8 sps:$4 sm:$0xff]  }
 0x625   :  { %3322 = vmatpush1.bf16.msra.mxu0 %v6951_v49  ;;  %v7034_v49 = vld [vmem:[%s9127_s5 + $0x124] ss:$8 sps:$4 sm:$0xff]  }
 0x626   :  { %3323 = vmatprep.subr.bf16.mxu0 %v6956_v26  ;;  %v7032_v26 = vld [vmem:[%s9127_s5 + $0x120] ss:$8 sps:$4 sm:$0xff]  }
 0x629   :  { %3324 = vmatpush1.bf16.msra.mxu0 %v6954_v50  ;;  %v7037_v50 = vld [vmem:[%s9127_s5 + $0x134] ss:$8 sps:$4 sm:$0xff]  }
 0x62a   :  { %3325 = vmatprep.subr.bf16.mxu0 %v6959_v27  ;;  %v7035_v27 = vld [vmem:[%s9127_s5 + $0x130] ss:$8 sps:$4 sm:$0xff]  }
 0x62d   :  { %3326 = vmatpush1.bf16.msra.mxu0 %v6957_v51  ;;  %v7040_v51 = vld [vmem:[%s9127_s5 + $0x144] ss:$8 sps:$4 sm:$0xff]  }
 0x62e   :  { %3327 = vmatprep.subr.bf16.mxu0 %v6962_v52 }
 0x631   :  { %3328 = vmatpush1.bf16.msra.mxu0 %v6960_v28 }
 0x632   :  { %3329 = vmatprep.subr.bf16.mxu0 %v6965_v38 }
 0x635   :  { %3330 = vmatpush1.bf16.msra.mxu0 %v6963_v29  ;;  %v7038_v29 = vld [vmem:[%s9127_s5 + $0x140] ss:$8 sps:$4 sm:$0xff]  }
 0x636   :  { %3331 = vmatprep.subr.bf16.mxu0 %v6968_v54 }
 0x639   :  { %3332 = vmatpush1.bf16.msra.mxu0 %v6966_v59 }
 0x63a   :  { %3333 = vmatprep.subr.bf16.mxu0 %v6971_v60  ;;  %v7043_v60 = vld [vmem:[%s9127_s5 + $0x154] ss:$8 sps:$4 sm:$0xff]  }
 0x63d   :  { %3334 = vmatpush1.bf16.msra.mxu0 %v6969_v35 }
 0x63e   :  { %3335 = vmatprep.subr.bf16.mxu0 %v6974_v57  ;;  %v7041_v57 = vld [vmem:[%s9127_s5 + $0x150] ss:$8 sps:$4 sm:$0xff]  }
 0x641   :  { %3336 = vmatpush1.bf16.msra.mxu0 %v6972_v61  ;;  %v7046_v61 = vld [vmem:[%s9127_s5 + $0x164] ss:$8 sps:$4 sm:$0xff]  }
 0x642   :  { %3337 = vmatprep.subr.bf16.mxu0 %v6977_v62 }
 0x645   :  { %3338 = vmatpush1.bf16.msra.mxu0 %v6975_v30 }
 0x646   :  { %3680 = vmatprep.subr.bf16.mxu0 %v6980_v31 }
 0x648   :  { %3340 = vmatmul.mubr.bf16.vlgmr.msra.gmra.mrb[48].mxu0 %v8172_v36  ;;  %v6989_v36 = vld [vmem:[%s9127_s5 + $0x34] ss:$8 sps:$4 sm:$0xff]  }
 0x649   :  { %3349 = vmatprep.mubr.bf16.mxu0 %v8188_v58  ;;  %3681 = vmatpush1.bf16.msra.mxu0 %v6978_v63  ;;  %v6987_v58 = vld [vmem:[%s9127_s5 + $0x30] ss:$8 sps:$4 sm:$0xff]  }
 0x64a   :  { %3682 = vmatprep.subr.bf16.mxu0 %v6983_v0 }
 0x64d   :  { %3683 = vmatpush1.bf16.msra.mxu0 %v6981_v32  ;;  %v7044_v32 = vld [vmem:[%s9127_s5 + $0x160] ss:$8 sps:$4 sm:$0xff]  }
 0x64e   :  { %3684 = vmatprep.subr.bf16.mxu0 %v6986_v1 }
 0x650   :  { %3350 = vmatmul.mubr.bf16.gmra.mrb[52].mxu0 %v8184_v53  ;;  %v6995_v53 = vld [vmem:[%s9127_s5 + $0x54] ss:$8 sps:$4 sm:$0xff]  }
 0x651   :  { %3685 = vmatpush1.bf16.msra.mxu0 %v6984_v2 }
 0x652   :  { %3686 = vmatprep.subr.bf16.mxu0 %v6989_v36 }
 0x655   :  { %3687 = vmatpush1.bf16.msra.mxu0 %v6987_v58  ;;  %v2659_v5 = vpop.f32.mrb[36].mxu0  ;;  %v7049_v58 = vld [vmem:[%s9127_s5 + $0x174] ss:$8 sps:$4 sm:$0xff]  }
 0x656   :  { %3688 = vmatprep.subr.bf16.mxu0 %v6992_v34  ;;  %v2661_v6 = vpop.f32.mrb[37].mxu0 }
 0x657   :  { %v2663_v7 = vpop.f32.mrb[38].mxu0 }
 0x658   :  { %v2797_v8 = vpack.c.bf16 %v2663_v7, %v2659_v5  ;;  %v2665_v9 = vpop.f32.mrb[39].mxu0  ;;  %v7052_v7 = vld [vmem:[%s9127_s5 + $0x184] ss:$8 sps:$4 sm:$0xff]  }
 0x659   :  { %3689 = vmatpush1.bf16.msra.mxu0 %v6990_v3  ;;  %v2798_v11 = vpack.c.bf16 %v2665_v9, %v2661_v6  ;;  %v7047_v6 = vld [vmem:[%s9127_s5 + $0x170] ss:$8 sps:$4 sm:$0xff]  }
 0x65a   :  { %3690 = vmatprep.subr.bf16.mxu0 %v6995_v53 }
 0x65b   :  { %3712 = vmatprep.mubr.bf16.mxu0 %v2798_v11 }
 0x65d   :  { %3691 = vmatpush1.bf16.msra.mxu0 %v6993_v10  ;;  %v7050_v10 = vld [vmem:[%s9127_s5 + $0x180] ss:$8 sps:$4 sm:$0xff]  }
 0x65e   :  { %3692 = vmatprep.subr.bf16.mxu0 %v6998_v13  ;;  %v7055_v13 = vld [vmem:[%s9127_s5 + $0x194] ss:$8 sps:$4 sm:$0xff]  }
 0x661   :  { %3693 = vmatpush1.bf16.msra.mxu0 %v6996_v15 }
 0x662   :  { %3694 = vmatprep.subr.bf16.mxu0 %v7001_v17 }
 0x665   :  { %3695 = vmatpush1.bf16.msra.mxu0 %v6999_v18 }
 0x666   :  { %3696 = vmatprep.subr.bf16.mxu0 %v7004_v20  ;;  %v7053_v20 = vld [vmem:[%s9127_s5 + $0x190] ss:$8 sps:$4 sm:$0xff]  }
 0x669   :  { %3697 = vmatpush1.bf16.msra.mxu0 %v7002_v21  ;;  %v7058_v21 = vld [vmem:[%s9127_s5 + $0x1a4] ss:$8 sps:$4 sm:$0xff]  }
 0x66a   :  { %3698 = vmatprep.subr.bf16.mxu0 %v7007_v22 }
 0x66d   :  { %3699 = vmatpush1.bf16.msra.mxu0 %v7005_v23 }
 0x66e   :  { %3700 = vmatprep.subr.bf16.mxu0 %v7010_v24  ;;  %v7056_v24 = vld [vmem:[%s9127_s5 + $0x1a0] ss:$8 sps:$4 sm:$0xff]  }
 0x671   :  { %3701 = vmatpush1.bf16.msra.mxu0 %v7008_v25 }
 0x672   :  { %3702 = vmatprep.subr.bf16.mxu0 %v7013_v12  ;;  %v7061_v12 = vld [vmem:[%s9127_s5 + $0x1b4] ss:$8 sps:$4 sm:$0xff]  }
 0x675   :  { %3703 = vmatpush1.bf16.msra.mxu0 %v7011_v19 }
 0x676   :  { %3704 = vmatprep.subr.bf16.mxu0 %v7016_v37 }
 0x679   :  { %3705 = vmatpush1.bf16.msra.mxu0 %v7014_v39 }
 0x67a   :  { %3706 = vmatprep.subr.bf16.mxu0 %v7019_v41  ;;  %v7059_v41 = vld [vmem:[%s9127_s5 + $0x1b0] ss:$8 sps:$4 sm:$0xff]  }
 0x67d   :  { %3707 = vmatpush1.bf16.msra.mxu0 %v7017_v56  ;;  %v7064_v56 = vld [vmem:[%s9127_s5 + $0x1c4] ss:$8 sps:$4 sm:$0xff]  }
 0x67e   :  { %3708 = vmatprep.subr.bf16.mxu0 %v7022_v55 }
 0x681   :  { %3709 = vmatpush1.bf16.msra.mxu0 %v7020_v43 }
 0x682   :  { %3710 = vmatprep.subr.bf16.mxu0 %v7025_v45  ;;  %v7062_v45 = vld [vmem:[%s9127_s5 + $0x1c0] ss:$8 sps:$4 sm:$0xff]  }
 0x685   :  { %3711 = vmatpush1.bf16.msra.mxu0 %v7023_v4 }
 0x686   :  { %3733 = vmatprep.subr.bf16.mxu0 %v7028_v44  ;;  %v7067_v44 = vld [vmem:[%s9127_s5 + $0x1d4] ss:$8 sps:$4 sm:$0xff]  }
 0x688   :  { %3713 = vmatmul.mubr.bf16.vlgmr.msra.gmra.mrb[48].mxu0 %v2797_v8 }
 0x689   :  { %3734 = vmatpush1.bf16.msra.mxu0 %v7026_v46 }
 0x68a   :  { %3735 = vmatprep.subr.bf16.mxu0 %v7031_v47 }
 0x68d   :  { %3736 = vmatpush1.bf16.msra.mxu0 %v7029_v48 }
 0x68e   :  { %3737 = vmatprep.subr.bf16.mxu0 %v7034_v49  ;;  %v7065_v49 = vld [vmem:[%s9127_s5 + $0x1d0] ss:$8 sps:$4 sm:$0xff]  }
 0x691   :  { %3738 = vmatpush1.bf16.msra.mxu0 %v7032_v26  ;;  %v7070_v26 = vld [vmem:[%s9127_s5 + $0x1e4] ss:$8 sps:$4 sm:$0xff]  }
 0x692   :  { %3739 = vmatprep.subr.bf16.mxu0 %v7037_v50  ;;  %v7068_v50 = vld [vmem:[%s9127_s5 + $0x1e0] ss:$8 sps:$4 sm:$0xff]  }
 0x693   :  { %v8537_v52 = vpop.f32.mrb[40].mxu0 }
 0x694   :  { %v2704_v28 = vpop.f32.mrb[41].mxu0 }
 0x695   :  { %3740 = vmatpush1.bf16.msra.mxu0 %v7035_v27  ;;  %v8539_v38 = vpop.f32.mrb[42].mxu0  ;;  %v7073_v27 = vld [vmem:[%s9127_s5 + $0x1f4] ss:$8 sps:$4 sm:$0xff]  }
 0x696   :  { %v2799_v54 = vpack.c.bf16 %v8539_v38, %v8537_v52  ;;  %v2708_v59 = vpop.f32.mrb[43].mxu0  ;;  %3741 = vmatprep.subr.bf16.mxu0 %v7040_v51  ;;  %v7071_v51 = vld [vmem:[%s9127_s5 + $0x1f0] ss:$8 sps:$4 sm:$0xff]   ;;  %v7082_v52 = vld [vmem:[%s9127_s5 + $0x424] ss:$8 sps:$4 sm:$0xff]  }
 0x697   :  { %v2800_v35 = vpack.c.bf16 %v2708_v59, %v2704_v28  ;;  %v7076_v28 = vld [vmem:[%s9127_s5 + $0x404] ss:$8 sps:$4 sm:$0xff]   ;;  %v7080_v38 = vld [vmem:[%s9127_s5 + $0x420] ss:$8 sps:$4 sm:$0xff]  }
 0x699   :  { %3742 = vmatpush1.bf16.msra.mxu0 %v7038_v29  ;;  %v7074_v29 = vld [vmem:[%s9127_s5 + $0x400] ss:$8 sps:$4 sm:$0xff]  }
 0x69a   :  { %3743 = vmatprep.subr.bf16.mxu0 %v7043_v60  ;;  %v7079_v60 = vld [vmem:[%s9127_s5 + $0x414] ss:$8 sps:$4 sm:$0xff]  }
 0x69b   :  { %v2745_v62 = vpop.f32.mrb[44].mxu0  ;;  %v8555_v30 = vpop.f32.mrb[32].mxu1 }
 0x69c   :  { %v2747_v31 = vpop.f32.mrb[45].mxu0  ;;  %v8557_v63 = vpop.f32.mrb[33].mxu1 }
 0x69d   :  { %3744 = vmatpush1.bf16.msra.mxu0 %v7041_v57  ;;  %v2749_v0 = vpop.f32.mrb[46].mxu0  ;;  %v8562_v1 = vpop.f32.mrb[34].mxu1 }
 0x69e   :  { %v2801_v2 = vpack.c.bf16 %v2749_v0, %v2745_v62  ;;  %v2751_v36 = vpop.f32.mrb[47].mxu0  ;;  %3745 = vmatprep.subr.bf16.mxu0 %v7046_v61  ;;  %v2803_v34 = vpack.c.bf16 %v8562_v1, %v8555_v30  ;;  %v8569_v3 = vpop.f32.mrb[35].mxu1  ;;  %v7086_v30 = vld [vmem:[%s9127_s5 + $0x440] ss:$8 sps:$4 sm:$0xff]   ;;  %v7091_v1 = vld [vmem:[%s9127_s5 + $0x454] ss:$8 sps:$4 sm:$0xff]  }
 0x69f   :  { %v2802_v5 = vpack.c.bf16 %v2751_v36, %v2747_v31  ;;  %v2804_v53 = vpack.c.bf16 %v8569_v3, %v8557_v63  ;;  %v7077_v31 = vld [vmem:[%s9127_s5 + $0x410] ss:$8 sps:$4 sm:$0xff]   ;;  %v7094_v36 = vld [vmem:[%s9127_s5 + $0x464] ss:$8 sps:$4 sm:$0xff]  }
 0x6a0   :  { %v7083_v63 = vld [vmem:[%s9127_s5 + $0x430] ss:$8 sps:$4 sm:$0xff]  }
 0x6a1   :  { %3746 = vmatpush1.bf16.msra.mxu0 %v7044_v32  ;;  %3722 = vmatprep.mubr.bf16.mxu0 %v2802_v5  ;;  %v7088_v32 = vld [vmem:[%s9127_s5 + $0x444] ss:$8 sps:$4 sm:$0xff]   ;;  %v7095_v3 = vld [vmem:[%s9127_s5 + $0x470] ss:$8 sps:$4 sm:$0xff]  }
 0x6a2   :  { %3723 = vmatmul.mubr.bf16.gmra.mrb[52].mxu0 %v2801_v2  ;;  %3747 = vmatprep.subr.bf16.mxu0 %v7049_v58  ;;  %v7089_v2 = vld [vmem:[%s9127_s5 + $0x450] ss:$8 sps:$4 sm:$0xff]   ;;  %v7092_v58 = vld [vmem:[%s9127_s5 + $0x460] ss:$8 sps:$4 sm:$0xff]   ;;  %v7100_v5 = vld [vmem:[%s9127_s5 + $0x484] ss:$8 sps:$4 sm:$0xff]  }
 0x6a3   :  { %3765 = vmatprep.mubr.bf16.mxu0 %v2800_v35  ;;  %v8579_v8 = vpop.f32.mrb[36].mxu1 }
 0x6a4   :  { %v8581_v9 = vpop.f32.mrb[37].mxu1 }
 0x6a5   :  { %3748 = vmatpush1.bf16.msra.mxu0 %v7047_v6  ;;  %v8586_v11 = vpop.f32.mrb[38].mxu1  ;;  %v7103_v6 = vld [vmem:[%s9127_s5 + $0x494] ss:$8 sps:$4 sm:$0xff]  }
 0x6a6   :  { %3749 = vmatprep.subr.bf16.mxu0 %v7052_v7  ;;  %v3958_v15 = vpack.c.bf16 %v8586_v11, %v8579_v8  ;;  %v8593_v17 = vpop.f32.mrb[39].mxu1  ;;  %v7101_v7 = vld [vmem:[%s9127_s5 + $0x490] ss:$8 sps:$4 sm:$0xff]   ;;  %v7128_v8 = vld [vmem:[%s9127_s5 + $0x520] ss:$8 sps:$4 sm:$0xff]  }
 0x6a7   :  { %v3959_v18 = vpack.c.bf16 %v8593_v17, %v8581_v9  ;;  %v7106_v9 = vld [vmem:[%s9127_s5 + $0x4a4] ss:$8 sps:$4 sm:$0xff]   ;;  %v7107_v17 = vld [vmem:[%s9127_s5 + $0x4b0] ss:$8 sps:$4 sm:$0xff]   ;;  %v7133_v11 = vld [vmem:[%s9127_s5 + $0x534] ss:$8 sps:$4 sm:$0xff]  }
 0x6a9   :  { %3750 = vmatpush1.bf16.msra.mxu0 %v7050_v10  ;;  %v7104_v10 = vld [vmem:[%s9127_s5 + $0x4a0] ss:$8 sps:$4 sm:$0xff]  }
 0x6aa   :  { %3751 = vmatprep.subr.bf16.mxu0 %v7055_v13  ;;  %v7109_v13 = vld [vmem:[%s9127_s5 + $0x4b4] ss:$8 sps:$4 sm:$0xff]  }
 0x6ab   :  { %v8603_v22 = vpop.f32.mrb[40].mxu1 }
 0x6ac   :  { %v8605_v23 = vpop.f32.mrb[41].mxu1 }
 0x6ad   :  { %3752 = vmatpush1.bf16.msra.mxu0 %v7053_v20  ;;  %v8610_v25 = vpop.f32.mrb[42].mxu1  ;;  %v7110_v20 = vld [vmem:[%s9127_s5 + $0x4c0] ss:$8 sps:$4 sm:$0xff]  }
 0x6ae   :  { %3753 = vmatprep.subr.bf16.mxu0 %v7058_v21  ;;  %v3960_v19 = vpack.c.bf16 %v8610_v25, %v8603_v22  ;;  %v8617_v37 = vpop.f32.mrb[43].mxu1  ;;  %v7115_v21 = vld [vmem:[%s9127_s5 + $0x4d4] ss:$8 sps:$4 sm:$0xff]  }
 0x6af   :  { %v3961_v39 = vpack.c.bf16 %v8617_v37, %v8605_v23  ;;  %v7137_v23 = vld [vmem:[%s9127_s5 + $0x550] ss:$8 sps:$4 sm:$0xff]   ;;  %v7142_v37 = vld [vmem:[%s9127_s5 + $0x564] ss:$8 sps:$4 sm:$0xff]  }
 0x6b1   :  { %3754 = vmatpush1.bf16.msra.mxu0 %v7056_v24  ;;  %v7113_v24 = vld [vmem:[%s9127_s5 + $0x4d0] ss:$8 sps:$4 sm:$0xff]  }
 0x6b2   :  { %3755 = vmatprep.subr.bf16.mxu0 %v7061_v12  ;;  %v7118_v12 = vld [vmem:[%s9127_s5 + $0x4e4] ss:$8 sps:$4 sm:$0xff]  }
 0x6b3   :  { %v8627_v55 = vpop.f32.mrb[44].mxu1 }
 0x6b4   :  { %v8629_v43 = vpop.f32.mrb[45].mxu1 }
 0x6b5   :  { %3756 = vmatpush1.bf16.msra.mxu0 %v7059_v41  ;;  %v8634_v4 = vpop.f32.mrb[46].mxu1  ;;  %v7116_v41 = vld [vmem:[%s9127_s5 + $0x4e0] ss:$8 sps:$4 sm:$0xff]  }
 0x6b6   :  { %3757 = vmatprep.subr.bf16.mxu0 %v7064_v56  ;;  %v3962_v46 = vpack.c.bf16 %v8634_v4, %v8627_v55  ;;  %v8641_v47 = vpop.f32.mrb[47].mxu1  ;;  %v7121_v56 = vld [vmem:[%s9127_s5 + $0x4f4] ss:$8 sps:$4 sm:$0xff]   ;;  %v7134_v55 = vld [vmem:[%s9127_s5 + $0x540] ss:$8 sps:$4 sm:$0xff]  }
 0x6b7   :  { %v3963_v48 = vpack.c.bf16 %v8641_v47, %v8629_v43  ;;  %v7136_v43 = vld [vmem:[%s9127_s5 + $0x544] ss:$8 sps:$4 sm:$0xff]   ;;  %v7139_v4 = vld [vmem:[%s9127_s5 + $0x554] ss:$8 sps:$4 sm:$0xff]   ;;  %v7143_v47 = vld [vmem:[%s9127_s5 + $0x570] ss:$8 sps:$4 sm:$0xff]  }
 0x6b9   :  { %3758 = vmatpush1.bf16.msra.mxu0 %v7062_v45  ;;  %v7119_v45 = vld [vmem:[%s9127_s5 + $0x4f0] ss:$8 sps:$4 sm:$0xff]  }
 0x6ba   :  { %3759 = vmatprep.subr.bf16.mxu0 %v7067_v44  ;;  %v7124_v44 = vld [vmem:[%s9127_s5 + $0x504] ss:$8 sps:$4 sm:$0xff]  }
 0x6bb   :  { %v8666_v59 = vpop.f32.mrb[48].mxu1 }
 0x6bc   :  { %v8671_v35 = vpop.f32.mrb[49].mxu1 }
 0x6bd   :  { %3760 = vmatpush1.bf16.msra.mxu0 %v7065_v49  ;;  %v8673_v57 = vpop.f32.mrb[50].mxu1  ;;  %v7122_v49 = vld [vmem:[%s9127_s5 + $0x500] ss:$8 sps:$4 sm:$0xff]  }
 0x6be   :  { %3761 = vmatprep.subr.bf16.mxu0 %v7070_v26  ;;  %v3964_v61 = vpack.c.bf16 %v8673_v57, %v8666_v59  ;;  %v8680_v62 = vpop.f32.mrb[51].mxu1  ;;  %v7127_v26 = vld [vmem:[%s9127_s5 + $0x514] ss:$8 sps:$4 sm:$0xff]  }
 0x6bf   :  { %v3965_v0 = vpack.c.bf16 %v8680_v62, %v8671_v35 }
 0x6c1   :  { %3762 = vmatpush1.bf16.msra.mxu0 %v7068_v50  ;;  %v7125_v50 = vld [vmem:[%s9127_s5 + $0x510] ss:$8 sps:$4 sm:$0xff]  }
 0x6c2   :  { %3763 = vmatprep.subr.bf16.mxu0 %v7073_v27  ;;  %v7130_v27 = vld [vmem:[%s9127_s5 + $0x524] ss:$8 sps:$4 sm:$0xff]  }
 0x6c5   :  { %3764 = vmatpush1.bf16.msra.mxu0 %v7071_v51  ;;  %v7146_v51 = vld [vmem:[%s9127_s5 + $0x580] ss:$8 sps:$4 sm:$0xff]  }
 0x6c6   :  { %4351 = vmatprep.subr.bf16.mxu0 %v7076_v28  ;;  %v7151_v28 = vld [vmem:[%s9127_s5 + $0x594] ss:$8 sps:$4 sm:$0xff]  }
 0x6c8   :  { %3766 = vmatmul.mubr.bf16.vlgmr.msra.gmra.mrb[48].mxu0 %v2799_v54  ;;  %v7085_v54 = vld [vmem:[%s9127_s5 + $0x434] ss:$8 sps:$4 sm:$0xff]  }
 0x6c9   :  { %4352 = vmatpush1.bf16.msra.mxu0 %v7074_v29  ;;  %3775 = vmatprep.mubr.bf16.mxu0 %v2804_v53  ;;  %v7098_v53 = vld [vmem:[%s9127_s5 + $0x480] ss:$8 sps:$4 sm:$0xff]   ;;  %v7149_v29 = vld [vmem:[%s9127_s5 + $0x590] ss:$8 sps:$4 sm:$0xff]  }
 0x6ca   :  { %4353 = vmatprep.subr.bf16.mxu0 %v7079_v60  ;;  %v7154_v60 = vld [vmem:[%s9127_s5 + $0x5a4] ss:$8 sps:$4 sm:$0xff]  }
 0x6cd   :  { %4354 = vmatpush1.bf16.msra.mxu0 %v7077_v31  ;;  %v7152_v31 = vld [vmem:[%s9127_s5 + $0x5a0] ss:$8 sps:$4 sm:$0xff]  }
 0x6ce   :  { %4355 = vmatprep.subr.bf16.mxu0 %v7082_v52  ;;  %v7157_v52 = vld [vmem:[%s9127_s5 + $0x5b4] ss:$8 sps:$4 sm:$0xff]  }
 0x6d0   :  { %3776 = vmatmul.mubr.bf16.gmra.mrb[52].mxu0 %v2803_v34  ;;  %v7097_v34 = vld [vmem:[%s9127_s5 + $0x474] ss:$8 sps:$4 sm:$0xff]  }
 0x6d1   :  { %4356 = vmatpush1.bf16.msra.mxu0 %v7080_v38  ;;  %4383 = vmatprep.mubr.bf16.mxu0 %v3959_v18  ;;  %v7112_v18 = vld [vmem:[%s9127_s5 + $0x4c4] ss:$8 sps:$4 sm:$0xff]   ;;  %v7155_v38 = vld [vmem:[%s9127_s5 + $0x5b0] ss:$8 sps:$4 sm:$0xff]  }
 0x6d2   :  { %4357 = vmatprep.subr.bf16.mxu0 %v7085_v54  ;;  %v7160_v54 = vld [vmem:[%s9127_s5 + $0x5c4] ss:$8 sps:$4 sm:$0xff]  }
 0x6d5   :  { %4358 = vmatpush1.bf16.msra.mxu0 %v7083_v63  ;;  %v7158_v63 = vld [vmem:[%s9127_s5 + $0x5c0] ss:$8 sps:$4 sm:$0xff]  }
 0x6d6   :  { %4359 = vmatprep.subr.bf16.mxu0 %v7088_v32  ;;  %v7163_v32 = vld [vmem:[%s9127_s5 + $0x5d4] ss:$8 sps:$4 sm:$0xff]  }
 0x6d9   :  { %4360 = vmatpush1.bf16.msra.mxu0 %v7086_v30  ;;  %v7161_v30 = vld [vmem:[%s9127_s5 + $0x5d0] ss:$8 sps:$4 sm:$0xff]  }
 0x6da   :  { %4361 = vmatprep.subr.bf16.mxu0 %v7091_v1  ;;  %v7166_v1 = vld [vmem:[%s9127_s5 + $0x5e4] ss:$8 sps:$4 sm:$0xff]  }
 0x6dd   :  { %4362 = vmatpush1.bf16.msra.mxu0 %v7089_v2  ;;  %v7164_v2 = vld [vmem:[%s9127_s5 + $0x5e0] ss:$8 sps:$4 sm:$0xff]  }
 0x6de   :  { %4363 = vmatprep.subr.bf16.mxu0 %v7094_v36  ;;  %v7169_v36 = vld [vmem:[%s9127_s5 + $0x5f4] ss:$8 sps:$4 sm:$0xff]  }
 0x6e1   :  { %4364 = vmatpush1.bf16.msra.mxu0 %v7092_v58  ;;  %v7167_v58 = vld [vmem:[%s9127_s5 + $0x5f0] ss:$8 sps:$4 sm:$0xff]  }
 0x6e2   :  { %4365 = vmatprep.subr.bf16.mxu0 %v7097_v34  ;;  %v6120_v34 = vld [vmem:[%s9125_s1 + $0x3] ss:$8 sm:$0x3] }
 0x6e5   :  { %4366 = vmatpush1.bf16.msra.mxu0 %v7095_v3  ;;  %v4471_v3 = vrot.slane %v6120_v34, %v7593_v14 }
 0x6e6   :  { %4367 = vmatprep.subr.bf16.mxu0 %v7100_v5  ;;  %v4475_v5 = vrot.slane %v6120_v34, %v7599_v16  ;;  %v7193_v34 = vld [vmem:[%s9128_s6 + $0x18] sm:$0xff]  }
 0x6e9   :  { %4368 = vmatpush1.bf16.msra.mxu0 %v7098_v53 }
 0x6ea   :  { %4369 = vmatprep.subr.bf16.mxu0 %v7103_v6 }
 0x6ed   :  { %4370 = vmatpush1.bf16.msra.mxu0 %v7101_v7 }
 0x6ee   :  { %4371 = vmatprep.subr.bf16.mxu0 %v7106_v9 }
 0x6f1   :  { %4372 = vmatpush1.bf16.msra.mxu0 %v7104_v10 }
 0x6f2   :  { %4373 = vmatprep.subr.bf16.mxu0 %v7109_v13 }
 0x6f5   :  { %4374 = vmatpush1.bf16.msra.mxu0 %v7107_v17 }
 0x6f6   :  { %4375 = vmatprep.subr.bf16.mxu0 %v7112_v18 }
 0x6f9   :  { %4376 = vmatpush1.bf16.msra.mxu0 %v7110_v20 }
 0x6fa   :  { %4377 = vmatprep.subr.bf16.mxu0 %v7115_v21 }
 0x6fd   :  { %4378 = vmatpush1.bf16.msra.mxu0 %v7113_v24 }
 0x6fe   :  { %4379 = vmatprep.subr.bf16.mxu0 %v7118_v12 }
 0x701   :  { %4380 = vmatpush1.bf16.msra.mxu0 %v7116_v41 }
 0x702   :  { %4381 = vmatprep.subr.bf16.mxu0 %v7121_v56 }
 0x705   :  { %4382 = vmatpush1.bf16.msra.mxu0 %v7119_v45 }
 0x706   :  { %4404 = vmatprep.subr.bf16.mxu0 %v7124_v44 }
 0x708   :  { %4384 = vmatmul.mubr.bf16.vlgmr.msra.gmra.mrb[48].mxu0 %v3958_v15  ;;  %v7131_v15 = vld [vmem:[%s9127_s5 + $0x530] ss:$8 sps:$4 sm:$0xff]  }
 0x709   :  { %4405 = vmatpush1.bf16.msra.mxu0 %v7122_v49  ;;  %4393 = vmatprep.mubr.bf16.mxu0 %v3963_v48  ;;  %v7148_v48 = vld [vmem:[%s9127_s5 + $0x584] ss:$8 sps:$4 sm:$0xff]  }
 0x70a   :  { %4406 = vmatprep.subr.bf16.mxu0 %v7127_v26 }
 0x70d   :  { %4407 = vmatpush1.bf16.msra.mxu0 %v7125_v50 }
 0x70e   :  { %4408 = vmatprep.subr.bf16.mxu0 %v7130_v27 }
 0x710   :  { %4394 = vmatmul.mubr.bf16.gmra.mrb[52].mxu0 %v3962_v46  ;;  %v7145_v46 = vld [vmem:[%s9127_s5 + $0x574] ss:$8 sps:$4 sm:$0xff]  }
 0x711   :  { %4409 = vmatpush1.bf16.msra.mxu0 %v7128_v8  ;;  %4436 = vmatprep.mubr.bf16.mxu0 %v3961_v39  ;;  %v7140_v39 = vld [vmem:[%s9127_s5 + $0x560] ss:$8 sps:$4 sm:$0xff]  }
 0x712   :  { %4410 = vmatprep.subr.bf16.mxu0 %v7133_v11 }
 0x715   :  { %4411 = vmatpush1.bf16.msra.mxu0 %v7131_v15 }
 0x716   :  { %4412 = vmatprep.subr.bf16.mxu0 %v7136_v43 }
 0x719   :  { %4413 = vmatpush1.bf16.msra.mxu0 %v7134_v55 }
 0x71a   :  { %4414 = vmatprep.subr.bf16.mxu0 %v7139_v4  ;;  %v7170_v4 = vld [vmem:[%s9128_s6 + $0xc0] sm:$0xff]  }
 0x71d   :  { %4415 = vmatpush1.bf16.msra.mxu0 %v7137_v23  ;;  %v7171_v23 = vld [vmem:[%s9128_s6 + $0x80] sm:$0xff]  }
 0x71e   :  { %4416 = vmatprep.subr.bf16.mxu0 %v7142_v37  ;;  %v7172_v37 = vld [vmem:[%s9128_s6 + $0xc8] sm:$0xff]  }
 0x721   :  { %4417 = vmatpush1.bf16.msra.mxu0 %v7140_v39  ;;  %v7173_v39 = vld [vmem:[%s9128_s6 + $0x88] sm:$0xff]  }
 0x722   :  { %4418 = vmatprep.subr.bf16.mxu0 %v7145_v46  ;;  %v7174_v46 = vld [vmem:[%s9128_s6 + $0xd0] sm:$0xff]  }
 0x725   :  { %4419 = vmatpush1.bf16.msra.mxu0 %v7143_v47  ;;  %v7175_v47 = vld [vmem:[%s9128_s6 + $0x90] sm:$0xff]  }
 0x726   :  { %4420 = vmatprep.subr.bf16.mxu0 %v7148_v48  ;;  %v7177_v48 = vld [vmem:[%s9128_s6 + $0x98] sm:$0xff]  }
 0x729   :  { %4421 = vmatpush1.bf16.msra.mxu0 %v7146_v51  ;;  %v7178_v51 = vld [vmem:[%s9128_s6 + $0xe0] sm:$0xff]  }
 0x72a   :  { %4422 = vmatprep.subr.bf16.mxu0 %v7151_v28  ;;  %v7179_v28 = vld [vmem:[%s9128_s6 + $0xa0] sm:$0xff]  }
 0x72d   :  { %4423 = vmatpush1.bf16.msra.mxu0 %v7149_v29  ;;  %v7180_v29 = vld [vmem:[%s9128_s6 + $0xe8] sm:$0xff]  }
 0x72e   :  { %4424 = vmatprep.subr.bf16.mxu0 %v7154_v60  ;;  %v7181_v60 = vld [vmem:[%s9128_s6 + $0xa8] sm:$0xff]  }
 0x731   :  { %4425 = vmatpush1.bf16.msra.mxu0 %v7152_v31  ;;  %v7182_v31 = vld [vmem:[%s9128_s6 + $0xf0] sm:$0xff]  }
 0x732   :  { %4426 = vmatprep.subr.bf16.mxu0 %v7157_v52  ;;  %v7183_v52 = vld [vmem:[%s9128_s6 + $0xb0] sm:$0xff]  }
 0x735   :  { %4427 = vmatpush1.bf16.msra.mxu0 %v7155_v38  ;;  %v7184_v38 = vld [vmem:[%s9128_s6 + $0xf8] sm:$0xff]  }
 0x736   :  { %4428 = vmatprep.subr.bf16.mxu0 %v7160_v54  ;;  %v7185_v54 = vld [vmem:[%s9128_s6 + $0xb8] sm:$0xff]  }
 0x739   :  { %4429 = vmatpush1.bf16.msra.mxu0 %v7158_v63  ;;  %v7186_v63 = vld [vmem:[%s9128_s6 + $0x40] sm:$0xff]  }
 0x73a   :  { %4430 = vmatprep.subr.bf16.mxu0 %v7163_v32  ;;  %v7187_v32 = vld [vmem:[%s9128_s6] sm:$0xff]  }
 0x73d   :  { %4431 = vmatpush1.bf16.msra.mxu0 %v7161_v30  ;;  %v7188_v30 = vld [vmem:[%s9128_s6 + $0x48] sm:$0xff]  }
 0x73e   :  { %4432 = vmatprep.subr.bf16.mxu0 %v7166_v1  ;;  %v7189_v1 = vld [vmem:[%s9128_s6 + $0x8] sm:$0xff]  }
 0x741   :  { %4433 = vmatpush1.bf16.msra.mxu0 %v7164_v2  ;;  %v7190_v2 = vld [vmem:[%s9128_s6 + $0x50] sm:$0xff]  }
 0x742   :  { %4434 = vmatprep.subr.bf16.mxu0 %v7169_v36  ;;  %v7191_v36 = vld [vmem:[%s9128_s6 + $0x10] sm:$0xff]  }
 0x745   :  { %4435 = vmatpush1.bf16.msra.mxu0 %v7167_v58  ;;  %v7192_v58 = vld [vmem:[%s9128_s6 + $0x58] sm:$0xff]  }
 0x748   :  { %4437 = vmatmul.mubr.bf16.vlgmr.msra.gmra.mrb[48].mxu0 %v3960_v19 }
 0x749   :  { %4446 = vmatprep.mubr.bf16.mxu0 %v3965_v0 }
 0x750   :  { %4447 = vmatmul.mubr.bf16.gmra.mrb[52].mxu0 %v3964_v61 }
 0x81b   :  { %v4438_v53 = vpop.f32.mrb[48].mxu0 }
 0x81c   :  { %v4478_v6 = vadd.f32 %v4471_v3, %v4438_v53  ;;  %v4440_v22 = vpop.f32.mrb[49].mxu0  ;;  %v7196_v53 = vld [vmem:[%s9128_s6 + $0x68] sm:$0xff]  }
 0x81d   :  { %v4479_v25 = vadd.f32 %v4475_v5, %v4440_v22  ;;  %v4442_v19 = vpop.f32.mrb[50].mxu0  ;;  %v7198_v22 = vld [vmem:[%s9128_s6 + $0x70] sm:$0xff]  }
 0x81e   :  { %v4494_v7 = vmul.f32 0.2, %v4478_v6  ;;  %v4480_v35 = vadd.f32 %v4471_v3, %v4442_v19  ;;  %v4444_v62 = vpop.f32.mrb[51].mxu0  ;;  %vm4486_vm15 = vcmp.gt.f32.partialorder %v4478_v6, 0.0  ;;  %v7200_v19 = vld [vmem:[%s9128_s6 + $0x78] sm:$0xff]  }
 0x81f   :  { %v4495_v0 = vmul.f32 0.2, %v4479_v25  ;;  %v4481_v59 = vadd.f32 %v4475_v5, %v4444_v62  ;;  %vm4487_vm0 = vcmp.gt.f32.partialorder %v4479_v25, 0.0 }
 0x820   :  { %vm4488_vm1 = vcmp.gt.f32.partialorder %v4480_v35, 0.0  ;;  %v4496_v57 = vmul.f32 0.2, %v4480_v35  ;;  %v4502_v9 = vsel %vm4486_vm15, %v4478_v6, %v4494_v7  ;;  %v7197_v6 = vld [vmem:[%s9128_s6 + $0x28] sm:$0xff]   ;;  %v7201_v7 = vld [vmem:[%s9128_s6 + $0x38] sm:$0xff]  }
 0x821   :  { %vm4489_vm2 = vcmp.gt.f32.partialorder %v4481_v59, 0.0  ;;  %v4497_v61 = vmul.f32 0.2, %v4481_v59  ;;  %v4503_v13 = vsel %vm4487_vm0, %v4479_v25, %v4495_v0  ;;  %v7199_v25 = vld [vmem:[%s9128_s6 + $0x30] sm:$0xff]  }
 0x822   :  { %v4504_v14 = vsel %vm4488_vm1, %v4480_v35, %v4496_v57 }
 0x823   :  { %v8902_v10 = vpack.c.bf16 %v4504_v14, %v4502_v9  ;;  %v4448_v16 = vpop.f32.mrb[52].mxu0  ;;  %v4505_v17 = vsel %vm4489_vm2, %v4481_v59, %v4497_v61 }
 0x824   :  { %v4482_v18 = vadd.f32 %v4471_v3, %v4448_v16  ;;  %v4450_v20 = vpop.f32.mrb[53].mxu0  ;;  %v8904_v21 = vpack.c.bf16 %v4505_v17, %v4503_v13 }
 0x825   :  { %v4483_v24 = vadd.f32 %v4475_v5, %v4450_v20  ;;  %v4452_v12 = vpop.f32.mrb[54].mxu0  ;;  %v7202_v20 = vld [vmem:[%s9128_s6 + $0x140] sm:$0xff]  }
 0x826   :  { %v4498_v41 = vmul.f32 0.2, %v4482_v18  ;;  %v4484_v56 = vadd.f32 %v4471_v3, %v4452_v12  ;;  %v4454_v45 = vpop.f32.mrb[55].mxu0  ;;  %4514 = vmatprep.subr.bf16.mxu1 %v8904_v21  ;;  %vm4490_vm4 = vcmp.gt.f32.partialorder %v4482_v18, 0.0  ;;  %v7194_v3 = vld [vmem:[%s9128_s6 + $0x60] sm:$0xff]  }
 0x827   :  { %v4499_v44 = vmul.f32 0.2, %v4483_v24  ;;  %v4485_v49 = vadd.f32 %v4475_v5, %v4454_v45  ;;  %4515 = vmatpush1.bf16.msra.mxu1 %v8902_v10  ;;  %vm4491_vm5 = vcmp.gt.f32.partialorder %v4483_v24, 0.0  ;;  %v7195_v5 = vld [vmem:[%s9128_s6 + $0x20] sm:$0xff]  }
 0x828   :  { %vm4492_vm6 = vcmp.gt.f32.partialorder %v4484_v56, 0.0  ;;  %v4500_v26 = vmul.f32 0.2, %v4484_v56  ;;  %v4506_v27 = vsel %vm4490_vm4, %v4482_v18, %v4498_v41 }
 0x829   :  { %vm4493_vm7 = vcmp.gt.f32.partialorder %v4485_v49, 0.0  ;;  %v4501_v50 = vmul.f32 0.2, %v4485_v49  ;;  %v4507_v15 = vsel %vm4491_vm5, %v4483_v24, %v4499_v44  ;;  %v7205_v24 = vld [vmem:[%s9128_s6 + $0x108] sm:$0xff]  }
 0x82a   :  { %v4508_v8 = vsel %vm4492_vm6, %v4484_v56, %v4500_v26  ;;  %6121 = vmatmul.mubr.msk.bf16.vlgmr.msra.gmra.mrb[52].mxu1 %vm174_vm3, %v7325_v33 }
 0x82b   :  { %v8910_v11 = vpack.c.bf16 %v4508_v8, %v4506_v27  ;;  %v4509_v43 = vsel %vm4493_vm7, %v4485_v49, %v4501_v50  ;;  %4589 = vmatprep.mubr.bf16.mxu1 %v7228_v40 }
 0x82c   :  { %v8913_v55 = vpack.c.bf16 %v4509_v43, %v4507_v15  ;;  %v7207_v15 = vld [vmem:[%s9128_s6 + $0x110] sm:$0xff]   ;;  %v7208_v43 = vld [vmem:[%s9128_s6 + $0x158] sm:$0xff]  }
 0x82e   :  { %4557 = vmatprep.subr.bf16.mxu1 %v8913_v55 }
 0x82f   :  { %4558 = vmatpush1.bf16.msra.mxu1 %v8910_v11 }
 0x830   :  { %6263 = vmatprep.subr.bf16.mxu1 %v7170_v4  ;;  %v7210_v4 = vld [vmem:[%s9128_s6 + $0x160] sm:$0xff]  }
 0x832   :  { %6122 = vmatmul.mubr.msk.bf16.vlgmr.msra.gmra.mrb[56].mxu1 %vm174_vm3, %v7325_v33  ;;  %v7176_v33 = vld [vmem:[%s9128_s6 + $0xd8] sm:$0xff]  }
 0x833   :  { %6264 = vmatpush3.bf16.msra.mxu1 %v7171_v23  ;;  %4797 = vmatprep.mubr.bf16.mxu1 %v8904_v21  ;;  %v7211_v23 = vld [vmem:[%s9128_s6 + $0x120] sm:$0xff]  }
 0x834   :  { %6265 = vmatprep.subr.bf16.mxu1 %v7172_v37  ;;  %v7212_v37 = vld [vmem:[%s9128_s6 + $0x168] sm:$0xff]  }
 0x837   :  { %6266 = vmatpush3.bf16.msra.mxu1 %v7173_v39  ;;  %v7213_v39 = vld [vmem:[%s9128_s6 + $0x128] sm:$0xff]  }
 0x838   :  { %6267 = vmatprep.subr.bf16.mxu1 %v7174_v46  ;;  %v7214_v46 = vld [vmem:[%s9128_s6 + $0x170] sm:$0xff]  }
 0x83b   :  { %6268 = vmatpush3.bf16.msra.mxu1 %v7175_v47  ;;  %v7215_v47 = vld [vmem:[%s9128_s6 + $0x130] sm:$0xff]  }
 0x83c   :  { %6269 = vmatprep.subr.bf16.mxu1 %v7176_v33  ;;  %v7216_v33 = vld [vmem:[%s9128_s6 + $0x178] sm:$0xff]  }
 0x83f   :  { %6270 = vmatpush3.bf16.msra.mxu1 %v7177_v48  ;;  %v7217_v48 = vld [vmem:[%s9128_s6 + $0x138] sm:$0xff]  }
 0x840   :  { %6271 = vmatprep.subr.bf16.mxu1 %v7178_v51  ;;  %v7218_v51 = vld [vmem:[%s9129_s7] sm:$0xff]  }
 0x843   :  { %6272 = vmatpush3.bf16.msra.mxu1 %v7179_v28 }
 0x844   :  { %6273 = vmatprep.subr.bf16.mxu1 %v7180_v29 }
 0x847   :  { %6274 = vmatpush3.bf16.msra.mxu1 %v7181_v60 }
 0x848   :  { %6275 = vmatprep.subr.bf16.mxu1 %v7182_v31 }
 0x84b   :  { %6276 = vmatpush3.bf16.msra.mxu1 %v7183_v52 }
 0x84c   :  { %6277 = vmatprep.subr.bf16.mxu1 %v7184_v38 }
 0x84f   :  { %6278 = vmatpush3.bf16.msra.mxu1 %v7185_v54 }
 0x850   :  { %6291 = vmatprep.subr.bf16.mxu1 %v7186_v63 }
 0x852   :  { %4798 = vmatmul.mubr.bf16.vlgmr.msra.gmra.mrb[60].mxu1 %v8902_v10 }
 0x853   :  { %4805 = vmatprep.mubr.bf16.mxu1 %v8913_v55  ;;  %6292 = vmatpush3.bf16.msra.mxu1 %v7187_v32 }
 0x854   :  { %6293 = vmatprep.subr.bf16.mxu1 %v7188_v30 }
 0x857   :  { %6294 = vmatpush3.bf16.msra.mxu1 %v7189_v1 }
 0x858   :  { %6295 = vmatprep.subr.bf16.mxu1 %v7190_v2 }
 0x85a   :  { %4806 = vmatmul.mubr.bf16.gmra.mrb[64].mxu1 %v8910_v11 }
 0x85b   :  { %6296 = vmatpush3.bf16.msra.mxu1 %v7191_v36 }
 0x85c   :  { %6297 = vmatprep.subr.bf16.mxu1 %v7192_v58 }
 0x85f   :  { %6298 = vmatpush3.bf16.msra.mxu1 %v7193_v34 }
 0x860   :  { %6299 = vmatprep.subr.bf16.mxu1 %v7194_v3 }
 0x863   :  { %6300 = vmatpush3.bf16.msra.mxu1 %v7195_v5 }
 0x864   :  { %6301 = vmatprep.subr.bf16.mxu1 %v7196_v53 }
 0x867   :  { %6302 = vmatpush3.bf16.msra.mxu1 %v7197_v6 }
 0x868   :  { %6303 = vmatprep.subr.bf16.mxu1 %v7198_v22 }
 0x86b   :  { %6304 = vmatpush3.bf16.msra.mxu1 %v7199_v25 }
 0x86c   :  { %6305 = vmatprep.subr.bf16.mxu1 %v7200_v19 }
 0x86f   :  { %6306 = vmatpush3.bf16.msra.mxu1 %v7201_v7  ;;  %v7219_v7 = vld [vmem:[%s9129_s7 + $0x8] sm:$0xff]  }
 0x870   :  { %4959 = vmatprep.subr.bf16.mxu1 %v8904_v21  ;;  %v7204_v21 = vld [vmem:[%s9128_s6 + $0x148] sm:$0xff]  }
 0x8fd   :  { %v4548_v35 = vpop.f32.mrb[52].mxu1 }
 0x8fe   :  { %v4550_v62 = vpop.f32.mrb[53].mxu1 }
 0x8ff   :  { %v4552_v0 = vpop.f32.mrb[54].mxu1 }
 0x900   :  { %v4600_v59 = vpack.c.bf16 %v4552_v0, %v4548_v35  ;;  %v4554_v57 = vpop.f32.mrb[55].mxu1  ;;  %v7220_v0 = vld [vmem:[%s9129_s7 + $0x10] sm:$0xff]  }
 0x901   :  { %v4601_v61 = vpack.c.bf16 %v4554_v57, %v4550_v62 }
 0x903   :  { %4942 = vmatprep.mubr.bf16.mxu1 %v4601_v61 }
 0x904   :  { %4943 = vmatmul.mubr.bf16.vlgmr.msra.gmra.mrb[68].mxu1 %v4600_v59 }
 0x905   :  { %4960 = vmatpush1.bf16.msra.mxu1 %v8902_v10  ;;  %v4591_v9 = vpop.f32.mrb[56].mxu1  ;;  %v7203_v10 = vld [vmem:[%s9128_s6 + $0x100] sm:$0xff]  }
 0x906   :  { %5002 = vmatprep.subr.bf16.mxu1 %v8913_v55  ;;  %v4593_v14 = vpop.f32.mrb[57].mxu1  ;;  %v7209_v55 = vld [vmem:[%s9128_s6 + $0x118] sm:$0xff]  }
 0x907   :  { %v4595_v16 = vpop.f32.mrb[58].mxu1 }
 0x908   :  { %v4602_v13 = vpack.c.bf16 %v4595_v16, %v4591_v9  ;;  %v4597_v17 = vpop.f32.mrb[59].mxu1  ;;  %v7222_v16 = vld [vmem:[%s9129_s7 + $0x20] sm:$0xff]  }
 0x909   :  { %v4603_v18 = vpack.c.bf16 %v4597_v17, %v4593_v14  ;;  %v7221_v14 = vld [vmem:[%s9129_s7 + $0x18] sm:$0xff]   ;;  %v7224_v17 = vld [vmem:[%s9129_s7 + $0x30] sm:$0xff]  }
 0x90b   :  { %4950 = vmatprep.mubr.bf16.mxu1 %v4603_v18  ;;  %v7225_v18 = vld [vmem:[%s9129_s7 + $0x38] sm:$0xff]  }
 0x90c   :  { %4951 = vmatmul.mubr.bf16.gmra.mrb[72].mxu1 %v4602_v13  ;;  %v7223_v13 = vld [vmem:[%s9129_s7 + $0x28] sm:$0xff]  }
 0x90d   :  { %4991 = vmatprep.mubr.bf16.mxu1 %v7228_v40 }
 0x914   :  { %6187 = vmatmul.mubr.msk.bf16.vlgmr.msra.gmra.mrb[76].mxu1 %vm174_vm3, %v7354_v42 }
 0x915   :  { %5003 = vmatpush1.bf16.msra.mxu1 %v8910_v11  ;;  %5034 = vmatprep.mubr.bf16.mxu1 %v7228_v40  ;;  %v7206_v40 = vld [vmem:[%s9128_s6 + $0x150] sm:$0xff]  }
 0x916   :  { %6319 = vmatprep.subr.bf16.mxu1 %v7202_v20 }
 0x91c   :  { %6188 = vmatmul.mubr.msk.bf16.vlgmr.msra.gmra.mrb[80].mxu1 %vm174_vm3, %v7354_v42 }
 0x91d   :  { %6320 = vmatpush3.bf16.msra.mxu1 %v7203_v10 }
 0x91e   :  { %6321 = vmatprep.subr.bf16.mxu1 %v7204_v21 }
 0x921   :  { %6322 = vmatpush3.bf16.msra.mxu1 %v7205_v24 }
 0x922   :  { %6323 = vmatprep.subr.bf16.mxu1 %v7206_v40  ;;  %v5231_v40 = vld [vmem:[%s9125_s1 + $0x4] ss:$0 sm:$0xff] }
 0x925   :  { %v6279_v12 = vpop.f32.mrb[60].mxu1  ;;  %6324 = vmatpush3.bf16.msra.mxu1 %v7207_v15 }
 0x926   :  { %v6280_v41 = vpop.f32.mrb[61].mxu1  ;;  %6325 = vmatprep.subr.bf16.mxu1 %v7208_v43 }
 0x927   :  { %v6281_v56 = vadd.f32 %v6280_v41, %v6279_v12  ;;  %v6282_v45 = vpop.f32.mrb[62].mxu1 }
 0x928   :  { %v6283_v44 = vpop.f32.mrb[63].mxu1 }
 0x929   :  { %v6284_v49 = vadd.f32 %v6283_v44, %v6282_v45  ;;  %6326 = vmatpush3.bf16.msra.mxu1 %v7209_v55 }
 0x92a   :  { %6327 = vmatprep.subr.bf16.mxu1 %v7210_v4 }
 0x92d   :  { %v6285_v26 = vpop.f32.mrb[64].mxu1  ;;  %6328 = vmatpush3.bf16.msra.mxu1 %v7211_v23 }
 0x92e   :  { %v6286_v42 = vpop.f32.mrb[65].mxu1  ;;  %6329 = vmatprep.subr.bf16.mxu1 %v7212_v37 }
 0x92f   :  { %v6287_v50 = vadd.f32 %v6286_v42, %v6285_v26  ;;  %v6288_v27 = vpop.f32.mrb[66].mxu1 }
 0x930   :  { %v6289_v8 = vpop.f32.mrb[67].mxu1 }
 0x931   :  { %v6290_v11 = vadd.f32 %v6289_v8, %v6288_v27  ;;  %6330 = vmatpush3.bf16.msra.mxu1 %v7213_v39 }
 0x932   :  { %6331 = vmatprep.subr.bf16.mxu1 %v7214_v46 }
 0x935   :  { %6332 = vmatpush3.bf16.msra.mxu1 %v7215_v47 }
 0x936   :  { %6333 = vmatprep.subr.bf16.mxu1 %v7216_v33 }
 0x939   :  { %6334 = vmatpush3.bf16.msra.mxu1 %v7217_v48 }
 0x93a   :  { %6401 = vmatprep.subr.bf16.mxu1 %v7218_v51 }
 0x9d7   :  { %v6307_v28 = vpop.f32.mrb[68].mxu1 }
 0x9d8   :  { %v6308_v29 = vpop.f32.mrb[69].mxu1 }
 0x9d9   :  { %v6309_v60 = vadd.f32 %v6308_v29, %v6307_v28  ;;  %v6310_v31 = vpop.f32.mrb[70].mxu1 }
 0x9da   :  { %v6311_v52 = vpop.f32.mrb[71].mxu1 }
 0x9db   :  { %v4945_v38 = vadd.f32 %v6309_v60, %v6281_v56  ;;  %v6312_v54 = vadd.f32 %v6311_v52, %v6310_v31  ;;  %v5266_v60 = vld [vmem:[%s9125_s1 + $0x5] ss:$0 sm:$0xff] }
 0x9dd   :  { %v4948_v63 = vadd.f32 %v6312_v54, %v6284_v49 }
 0x9df   :  { %v6313_v32 = vpop.f32.mrb[72].mxu1 }
 0x9e0   :  { %v6314_v30 = vpop.f32.mrb[73].mxu1 }
 0x9e1   :  { %v6315_v1 = vadd.f32 %v6314_v30, %v6313_v32  ;;  %v6316_v2 = vpop.f32.mrb[74].mxu1 }
 0x9e2   :  { %v6317_v36 = vpop.f32.mrb[75].mxu1 }
 0x9e3   :  { %v4953_v58 = vadd.f32 %v6315_v1, %v6287_v50  ;;  %v6318_v34 = vadd.f32 %v6317_v36, %v6316_v2 }
 0x9e5   :  { %v9080_v3 = vadd.f32 %v6318_v34, %v6290_v11 }
 0x9e7   :  { %v4993_v5 = vpop.f32.mrb[76].mxu1 }
 0x9e8   :  { %v4995_v53 = vpop.f32.mrb[77].mxu1 }
 0x9e9   :  { %v4997_v6 = vpop.f32.mrb[78].mxu1 }
 0x9ea   :  { %v5045_v22 = vpack.c.bf16 %v4997_v6, %v4993_v5  ;;  %v4999_v25 = vpop.f32.mrb[79].mxu1 }
 0x9eb   :  { %v5046_v19 = vpack.c.bf16 %v4999_v25, %v4995_v53 }
 0x9ed   :  { %5210 = vmatprep.mubr.bf16.mxu1 %v5046_v19 }
 0x9ee   :  { %5211 = vmatmul.mubr.bf16.vlgmr.msra.gmra.mrb[84].mxu1 %v5045_v22 }
 0x9ef   :  { %v5036_v35 = vpop.f32.mrb[80].mxu1  ;;  %6402 = vmatpush3.bf16.msra.mxu1 %v7218_v51 }
 0x9f0   :  { %v5038_v62 = vpop.f32.mrb[81].mxu1  ;;  %6403 = vmatprep.subr.bf16.mxu1 %v7219_v7 }
 0x9f1   :  { %v5040_v59 = vpop.f32.mrb[82].mxu1 }
 0x9f2   :  { %v5047_v57 = vpack.c.bf16 %v5040_v59, %v5036_v35  ;;  %v5042_v61 = vpop.f32.mrb[83].mxu1 }
 0x9f3   :  { %v5048_v9 = vpack.c.bf16 %v5042_v61, %v5038_v62  ;;  %6404 = vmatpush3.bf16.msra.mxu1 %v7219_v7 }
 0x9f4   :  { %6405 = vmatprep.subr.bf16.mxu1 %v7220_v0 }
 0x9f5   :  { %5218 = vmatprep.mubr.bf16.mxu1 %v5048_v9 }
 0x9f6   :  { %5219 = vmatmul.mubr.bf16.gmra.mrb[88].mxu1 %v5047_v57 }
 0x9f7   :  { %6406 = vmatpush3.bf16.msra.mxu1 %v7220_v0 }
 0x9f8   :  { %6407 = vmatprep.subr.bf16.mxu1 %v7221_v14 }
 0x9fb   :  { %6408 = vmatpush3.bf16.msra.mxu1 %v7221_v14 }
 0x9fc   :  { %6409 = vmatprep.subr.bf16.mxu1 %v7222_v16 }
 0x9ff   :  { %6410 = vmatpush3.bf16.msra.mxu1 %v7222_v16 }
 0xa00   :  { %6411 = vmatprep.subr.bf16.mxu1 %v7223_v13 }
 0xa03   :  { %6412 = vmatpush3.bf16.msra.mxu1 %v7223_v13 }
 0xa04   :  { %6413 = vmatprep.subr.bf16.mxu1 %v7224_v17 }
 0xa07   :  { %6414 = vmatpush3.bf16.msra.mxu1 %v7224_v17 }
 0xa08   :  { %6415 = vmatprep.subr.bf16.mxu1 %v7225_v18 }
 0xa0b   :  { %6416 = vmatpush3.bf16.msra.mxu1 %v7225_v18 }
 0xac1   :  { %v6335_v20 = vpop.f32.mrb[84].mxu1 }
 0xac2   :  { %v6336_v10 = vpop.f32.mrb[85].mxu1 }
 0xac3   :  { %v6337_v21 = vadd.f32 %v6336_v10, %v6335_v20  ;;  %v6338_v24 = vpop.f32.mrb[86].mxu1 }
 0xac4   :  { %v6339_v12 = vpop.f32.mrb[87].mxu1 }
 0xac5   :  { %v5227_v41 = vadd.f32 %v6337_v21, %v4945_v38  ;;  %v6340_v56 = vadd.f32 %v6339_v12, %v6338_v24 }
 0xac7   :  { %v5232_v45 = vadd.f32 %v5231_v40, %v5227_v41  ;;  %v5228_v44 = vadd.f32 %v6340_v56, %v4948_v63 }
 0xac9   :  { %v5240_v49 = vmul.f32 0.2, %v5232_v45  ;;  %v5233_v26 = vadd.f32 %v5231_v40, %v5228_v44  ;;  %v6341_v42 = vpop.f32.mrb[88].mxu1  ;;  %vm5236_vm3 = vcmp.gt.f32.partialorder %v5232_v45, 0.0 }
 0xaca   :  { %v6342_v50 = vpop.f32.mrb[89].mxu1 }
 0xacb   :  { %v5241_v27 = vmul.f32 0.2, %v5233_v26  ;;  %v6343_v8 = vadd.f32 %v6342_v50, %v6341_v42  ;;  %v6344_v11 = vpop.f32.mrb[90].mxu1  ;;  %vm5237_vm8 = vcmp.gt.f32.partialorder %v5233_v26, 0.0  ;;  %v5244_v4 = vsel %vm5236_vm3, %v5232_v45, %v5240_v49 }
 0xacc   :  { %v6345_v15 = vpop.f32.mrb[91].mxu1 }
 0xacd   :  { %v5229_v43 = vadd.f32 %v6343_v8, %v4953_v58  ;;  %v6346_v55 = vadd.f32 %v6345_v15, %v6344_v11  ;;  %v5245_v23 = vsel %vm5237_vm8, %v5233_v26, %v5241_v27 }
 0xace   :  { %v5248_v37 = vpack.c.bf16 %v5245_v23, %v5244_v4 }
 0xacf   :  { %v5234_v39 = vadd.f32 %v5231_v40, %v5229_v43  ;;  %v5230_v46 = vadd.f32 %v6346_v55, %v9080_v3 }
 0xad0   :  { %6417 = vmatprep.mubr.bf16.mxu1 %v5248_v37 }
 0xad1   :  { %v5242_v47 = vmul.f32 0.2, %v5234_v39  ;;  %v5235_v33 = vadd.f32 %v5231_v40, %v5230_v46  ;;  %vm5238_vm9 = vcmp.gt.f32.partialorder %v5234_v39, 0.0 }
 0xad3   :  { %vm5239_vm10 = vcmp.gt.f32.partialorder %v5235_v33, 0.0  ;;  %v5243_v48 = vmul.f32 0.2, %v5235_v33  ;;  %v5246_v51 = vsel %vm5238_vm9, %v5234_v39, %v5242_v47 }
 0xad5   :  { %v5247_v28 = vsel %vm5239_vm10, %v5235_v33, %v5243_v48 }
 0xad6   :  { %v5249_v29 = vpack.c.bf16 %v5247_v28, %v5246_v51 }
 0xad8   :  { %6418 = vmatmul.mubr.bf16.vlgmr.msra.gmra.mrb[92].mxu1 %v5249_v29 }
 0xbab   :  { %v6419_v31 = vpop.f32.mrb[92].mxu1 }
 0xbac   :  { %v5358_v52 = vadd.f32 %v6419_v31, %v5266_v60  ;;  %v5349_v38 = vpop.f32.mrb[93].mxu1 }
 0xbad   :  { %v5350_v54 = vadd.f32 %v5349_v38, %v5266_v60  ;;  %v6420_v63 = vpop.f32.mrb[94].mxu1 }
 0xbae   :  { %5366 = vst [vmem:[%s9130_s8 + $0x10] sm:$0xff] %v5358_v52  ;;  %v5361_v32 = vadd.f32 %v6420_v63, %v5266_v60  ;;  %v5352_v30 = vpop.f32.mrb[95].mxu1 }
 0xbaf   :  { %5364 = vst [vmem:[%s9130_s8] sm:$0xff] %v5350_v54  ;;  %v5353_v1 = vadd.f32 %v5352_v30, %v5266_v60 }
 0xbb0   :  { %5367 = vst [vmem:[%s9130_s8 + $0x18] sm:$0xff] %v5361_v32 }
 0xbb1   :  { %5365 = vst [vmem:[%s9130_s8 + $0x8] sm:$0xff] %v5353_v1 }

</bundles_post_ra>
